<compile_context>
chip_gen: v5e
topology: v5e:2x2
jax: 0.10.0
libtpu: 0.0.40
codegen_flags: <defaults>
</compile_context>

<pallas_src>
import math

import jax
import jax.numpy as jnp
from jax import lax
from jax.experimental import pallas as pl
from jax.experimental.pallas import tpu as pltpu


def _layer_norm(x, g, b, eps=1e-5):
    # Single pass: sum and sum-of-squares, var = E[x^2] - E[x]^2.
    n = x.shape[-1]
    s1 = jnp.sum(x, axis=-1, keepdims=True)
    s2 = jnp.sum(x * x, axis=-1, keepdims=True)
    mu = s1 * (1.0 / n)
    var = s2 * (1.0 / n) - mu * mu
    return (x - mu) * lax.rsqrt(var + eps) * g + b


def _gelu_exact(x):
    # F.gelu default (erf-based, not tanh approximation)
    return 0.5 * x * (1.0 + lax.erf(x * (1.0 / math.sqrt(2.0))))


def _make_kernel(return_attn, compute_dtype, approx_recip):
    cd = compute_dtype

    def kernel(xq_ref, xf_ref,
               wq_ref, wk_ref, wv_ref, wo_ref,
               bq_ref, bk_ref, bv_ref, bo_ref,
               ln1w_ref, ln1b_ref, ln2w_ref, ln2b_ref,
               w1_ref, b1_ref, w2_ref, b2_ref,
               *refs):
        if return_attn:
            out_ref, attn_ref = refs[0], refs[1]
            k_sc, v_sc = refs[2], refs[3]
        else:
            out_ref = refs[0]
            k_sc, v_sc = refs[1], refs[2]

        qi = pl.program_id(1)
        d_model = xq_ref.shape[-1]
        scale = 1.0 / math.sqrt(d_model)

        # ---- K/V projection over the full sequence, once per batch row ----
        @pl.when(qi == 0)
        def _():
            xf = xf_ref[...].astype(cd)                              # (L, D)
            k = jnp.dot(xf, wk_ref[...],
                        preferred_element_type=jnp.float32) + bk_ref[...]
            v = jnp.dot(xf, wv_ref[...],
                        preferred_element_type=jnp.float32) + bv_ref[...]
            k_sc[...] = k.astype(cd)
            v_sc[...] = v.astype(cd)

        x_tile = xq_ref[...]                                         # (TQ, D) f32
        x_cd = x_tile.astype(cd)

        # ---- Q projection; fold 1/sqrt(D) into q (O(TQ*D), not O(TQ*L)) ----
        q = jnp.dot(x_cd, wq_ref[...],
                    preferred_element_type=jnp.float32) + bq_ref[...]
        q = (q * scale).astype(cd)

        # ---- scores without k.T: contract last dims directly on the MXU ----
        scores = lax.dot_general(q, k_sc[...], (((1,), (1,)), ((), ())),
                                 preferred_element_type=jnp.float32)  # (TQ, L)
        m = jnp.max(scores, axis=-1, keepdims=True)
        p = jnp.exp(scores - m)
        l = jnp.sum(p, axis=-1, keepdims=True)
        inv_l = pl.reciprocal(l, approx=approx_recip)                # (TQ, 1)

        ctx = jnp.dot(p.astype(cd), v_sc[...],
                      preferred_element_type=jnp.float32) * inv_l    # (TQ, D)
        new_x = jnp.dot(ctx.astype(cd), wo_ref[...],
                        preferred_element_type=jnp.float32) + bo_ref[...]

        # ---- residual + norm1 (dropout == identity in eval) ----
        xn = _layer_norm(x_tile + new_x, ln1w_ref[...], ln1b_ref[...])

        # ---- FFN: conv1(k=1) -> gelu -> conv2(k=1), fused on the row tile ----
        h = _gelu_exact(jnp.dot(xn.astype(cd), w1_ref[...],
                                preferred_element_type=jnp.float32) + b1_ref[...])
        y = jnp.dot(h.astype(cd), w2_ref[...],
                    preferred_element_type=jnp.float32) + b2_ref[...]

        # ---- residual + norm2 ----
        out_ref[...] = _layer_norm(xn + y, ln2w_ref[...],
                                   ln2b_ref[...]).astype(out_ref.dtype)
        if return_attn:
            attn_ref[...] = (p * inv_l).astype(attn_ref.dtype)

    return kernel


def encoder_layer(x, params, *, tq=None, compute_dtype=jnp.bfloat16,
                  return_attn=True):
    B, L, D = x.shape
    dFf = params["w1"].shape[-1]
    if tq is None:
        tq = min(L, 128)
    assert L % tq == 0 and tq % 8 == 0, "query tile must divide L and be 8-aligned"
    nq = L // tq

    approx_recip = jnp.dtype(compute_dtype) != jnp.dtype(jnp.float32)

    # Matmul weights are cast to the compute dtype host-side (halves weight DMA
    # in bf16 mode); biases / LayerNorm params stay f32 for the f32 epilogue.
    mm_names = ("wq", "wk", "wv", "wo", "w1", "w2")
    param_order = ("wq", "wk", "wv", "wo", "bq", "bk", "bv", "bo",
                   "ln1w", "ln1b", "ln2w", "ln2b", "w1", "b1", "w2", "b2")
    cast = {n: (params[n].astype(compute_dtype) if n in mm_names
                else params[n].astype(jnp.float32)) for n in param_order}

    def rep_spec(shape):
        return pl.BlockSpec(shape, lambda b, i, _z=(0,) * len(shape): _z)

    in_specs = [
        pl.BlockSpec((None, tq, D), lambda b, i: (b, i, 0)),  # q / residual tile
        pl.BlockSpec((None, L, D), lambda b, i: (b, 0, 0)),   # full row for K/V
    ]
    in_specs += [rep_spec(cast[n].shape) for n in param_order]

    out_specs = [pl.BlockSpec((None, tq, D), lambda b, i: (b, i, 0))]
    out_shape = [jax.ShapeDtypeStruct((B, L, D), x.dtype)]
    if return_attn:
        attn_dtype = jnp.float32 if not approx_recip else jnp.bfloat16
        out_specs.append(pl.BlockSpec((None, tq, L), lambda b, i: (b, i, 0)))
        out_shape.append(jax.ShapeDtypeStruct((B, L, L), attn_dtype))

    itemsize = jnp.dtype(compute_dtype).itemsize
    flops = int(B * (8 * L * D * D + 4 * L * L * D + 4 * L * D * dFf))
    transcendentals = int(B * (L * L + L * dFf))
    bytes_accessed = int(8 * B * L * D                       # x in + out (f32)
                         + (B * L * L * itemsize if return_attn else 0)
                         + sum(int(v.size) * v.dtype.itemsize
                               for v in cast.values()))

    kernel = _make_kernel(return_attn, compute_dtype, approx_recip)

    fn = pl.pallas_call(
        kernel,
        out_shape=tuple(out_shape) if return_attn else out_shape[0],
        grid_spec=pltpu.PrefetchScalarGridSpec(
            num_scalar_prefetch=0,
            grid=(B, nq),
            in_specs=in_specs,
            out_specs=tuple(out_specs) if return_attn else out_specs[0],
            scratch_shapes=[
                pltpu.VMEM((L, D), compute_dtype),   # cached K per batch row
                pltpu.VMEM((L, D), compute_dtype),   # cached V per batch row
            ],
        ),
        compiler_params=pltpu.CompilerParams(
            # Batch axis parallel (v7x megacore); query-tile axis must stay
            # sequential ("arbitrary") because the K/V scratch filled at qi==0
            # is reused by the remaining tiles of the same batch row.
            dimension_semantics=("parallel", "arbitrary"),
            vmem_limit_bytes=48 * 1024 * 1024,
        ),
        cost_estimate=pl.CostEstimate(flops=flops,
                                      transcendentals=transcendentals,
                                      bytes_accessed=bytes_accessed),
    )
    outs = fn(x, x, *(cast[n] for n in param_order))
    if return_attn:
        return outs[0], outs[1]
    return outs, None


def reference(x, params):
    def ln(v, g, b, eps=1e-5):
        mu = jnp.mean(v, axis=-1, keepdims=True)
        var = jnp.mean((v - mu) ** 2, axis=-1, keepdims=True)
        return (v - mu) / jnp.sqrt(var + eps) * g + b

    D = x.shape[-1]
    q = x @ params["wq"] + params["bq"]
    k = x @ params["wk"] + params["bk"]
    v = x @ params["wv"] + params["bv"]
    scores = jnp.einsum("bld,bmd->blm", q, k) / math.sqrt(D)
    attn = jax.nn.softmax(scores, axis=-1)
    new_x = jnp.einsum("blm,bmd->bld", attn, v) @ params["wo"] + params["bo"]
    x1 = x + new_x
    xn = ln(x1, params["ln1w"], params["ln1b"])
    h = jax.nn.gelu(xn @ params["w1"] + params["b1"], approximate=False)
    y = h @ params["w2"] + params["b2"]
    return ln(xn + y, params["ln2w"], params["ln2b"]), attn


if __name__ == "__main__":
    # Small but lane-dense shapes: D and L multiples of 128 so stores are
    # unmasked and the MXU contraction dim is not starved.
    B, L, D = 2, 128, 128
    dFf = 4 * D            # default dFf = 4 * dModel
    TQ = 64                # 2 query tiles per batch -> exercises the tiling path

    key = jax.random.PRNGKey(0)
    keys = jax.random.split(key, 16)
    s = 0.1

    params = {
        # attention projections (D, D) so the kernel computes x @ W
        "wq": s * jax.random.normal(keys[0], (D, D), jnp.float32),
        "wk": s * jax.random.normal(keys[1], (D, D), jnp.float32),
        "wv": s * jax.random.normal(keys[2], (D, D), jnp.float32),
        "wo": s * jax.random.normal(keys[3], (D, D), jnp.float32),
        "bq": s * jax.random.normal(keys[4], (1, D), jnp.float32),
        "bk": s * jax.random.normal(keys[5], (1, D), jnp.float32),
        "bv": s * jax.random.normal(keys[6], (1, D), jnp.float32),
        "bo": s * jax.random.normal(keys[7], (1, D), jnp.float32),
        # LayerNorm params (PyTorch default init: weight=1, bias=0)
        "ln1w": jnp.ones((1, D), jnp.float32),
        "ln1b": jnp.zeros((1, D), jnp.float32),
        "ln2w": jnp.ones((1, D), jnp.float32),
        "ln2b": jnp.zeros((1, D), jnp.float32),
        # Conv1d(kernel_size=1) weights, stored pre-transposed for x @ W
        "w1": s * jax.random.normal(keys[8], (D, dFf), jnp.float32),
        "b1": s * jax.random.normal(keys[9], (1, dFf), jnp.float32),
        "w2": s * jax.random.normal(keys[10], (dFf, D), jnp.float32),
        "b2": s * jax.random.normal(keys[11], (1, D), jnp.float32),
    }

    x = jax.random.normal(keys[12], (B, L, D), jnp.float32)

    ref_out, ref_attn = reference(x, params)
    ref_out, ref_attn = jax.block_until_ready((ref_out, ref_attn))

    # 1) f32 compute mode: near-exact check of the fused/tiled semantics.
    out32, attn32 = encoder_layer(x, params, tq=TQ, compute_dtype=jnp.float32)
    out32, attn32 = jax.block_until_ready((out32, attn32))
    assert jnp.allclose(out32, ref_out, atol=5e-3, rtol=5e-3), "f32 output mismatch"
    assert jnp.allclose(attn32, ref_attn, atol=5e-3, rtol=5e-3), "f32 attn mismatch"

    # 2) bf16 MXU-operand mode (default / fast path on v5e / v6e / v7x).
    out16, attn16 = encoder_layer(x, params, tq=TQ, compute_dtype=jnp.bfloat16)
    out16, attn16 = jax.block_until_ready((out16, attn16))
    assert jnp.allclose(out16.astype(jnp.float32), ref_out,
                        atol=7e-2, rtol=7e-2), "bf16 output mismatch"
    assert jnp.allclose(attn16.astype(jnp.float32), ref_attn,
                        atol=5e-2, rtol=5e-2), "bf16 attn mismatch"

    # TODO(synk): attnMask support (module default attnMask=None) is not implemented.
    print("KERNEL_OK")
</pallas_src>

<mosaic_0001>
module attributes {stable_mosaic.version = 11 : i64} {
  func.func @kernel(%arg0: i32, %arg1: i32, %arg2: memref<1x64x128xf32, #tpu.memory_space<vmem>>, %arg3: memref<1x128x128xf32, #tpu.memory_space<vmem>>, %arg4: memref<128x128xf32, #tpu.memory_space<vmem>>, %arg5: memref<128x128xf32, #tpu.memory_space<vmem>>, %arg6: memref<128x128xf32, #tpu.memory_space<vmem>>, %arg7: memref<128x128xf32, #tpu.memory_space<vmem>>, %arg8: memref<1x128xf32, #tpu.memory_space<vmem>>, %arg9: memref<1x128xf32, #tpu.memory_space<vmem>>, %arg10: memref<1x128xf32, #tpu.memory_space<vmem>>, %arg11: memref<1x128xf32, #tpu.memory_space<vmem>>, %arg12: memref<1x128xf32, #tpu.memory_space<vmem>>, %arg13: memref<1x128xf32, #tpu.memory_space<vmem>>, %arg14: memref<1x128xf32, #tpu.memory_space<vmem>>, %arg15: memref<1x128xf32, #tpu.memory_space<vmem>>, %arg16: memref<128x512xf32, #tpu.memory_space<vmem>>, %arg17: memref<1x512xf32, #tpu.memory_space<vmem>>, %arg18: memref<512x128xf32, #tpu.memory_space<vmem>>, %arg19: memref<1x128xf32, #tpu.memory_space<vmem>>, %arg20: memref<1x64x128xf32, #tpu.memory_space<vmem>>, %arg21: memref<1x64x128xf32, #tpu.memory_space<vmem>>, %arg22: memref<128x128xf32, #tpu.memory_space<vmem>>, %arg23: memref<128x128xf32, #tpu.memory_space<vmem>>) attributes {dimension_semantics = [#tpu.dimension_semantics<parallel>, #tpu.dimension_semantics<arbitrary>], iteration_bounds = array<i64: 2, 2>, scalar_prefetch = 0 : i64, scratch_operands = 2 : i64, tpu.core_type = #tpu.core_type<tc>, window_params = [{transform_indices = @transform_0, window_bounds = array<i64: 1, 64, 128>}, {transform_indices = @transform_1, window_bounds = array<i64: 1, 128, 128>}, {pipeline_mode = #tpu.pipeline_mode<synchronous>, transform_indices = @transform_2, window_bounds = array<i64: 128, 128>}, {pipeline_mode = #tpu.pipeline_mode<synchronous>, transform_indices = @transform_3, window_bounds = array<i64: 128, 128>}, {pipeline_mode = #tpu.pipeline_mode<synchronous>, transform_indices = @transform_4, window_bounds = array<i64: 128, 128>}, {pipeline_mode = #tpu.pipeline_mode<synchronous>, transform_indices = @transform_5, window_bounds = array<i64: 128, 128>}, {pipeline_mode = #tpu.pipeline_mode<synchronous>, transform_indices = @transform_6, window_bounds = array<i64: 1, 128>}, {pipeline_mode = #tpu.pipeline_mode<synchronous>, transform_indices = @transform_7, window_bounds = array<i64: 1, 128>}, {pipeline_mode = #tpu.pipeline_mode<synchronous>, transform_indices = @transform_8, window_bounds = array<i64: 1, 128>}, {pipeline_mode = #tpu.pipeline_mode<synchronous>, transform_indices = @transform_9, window_bounds = array<i64: 1, 128>}, {pipeline_mode = #tpu.pipeline_mode<synchronous>, transform_indices = @transform_10, window_bounds = array<i64: 1, 128>}, {pipeline_mode = #tpu.pipeline_mode<synchronous>, transform_indices = @transform_11, window_bounds = array<i64: 1, 128>}, {pipeline_mode = #tpu.pipeline_mode<synchronous>, transform_indices = @transform_12, window_bounds = array<i64: 1, 128>}, {pipeline_mode = #tpu.pipeline_mode<synchronous>, transform_indices = @transform_13, window_bounds = array<i64: 1, 128>}, {pipeline_mode = #tpu.pipeline_mode<synchronous>, transform_indices = @transform_14, window_bounds = array<i64: 128, 512>}, {pipeline_mode = #tpu.pipeline_mode<synchronous>, transform_indices = @transform_15, window_bounds = array<i64: 1, 512>}, {pipeline_mode = #tpu.pipeline_mode<synchronous>, transform_indices = @transform_16, window_bounds = array<i64: 512, 128>}, {pipeline_mode = #tpu.pipeline_mode<synchronous>, transform_indices = @transform_17, window_bounds = array<i64: 1, 128>}, {transform_indices = @transform_18, window_bounds = array<i64: 1, 64, 128>}, {transform_indices = @transform_19, window_bounds = array<i64: 1, 64, 128>}]} {
    %c0_i32 = arith.constant 0 : i32
    %0 = arith.cmpi eq, %arg1, %c0_i32 : i32
    %1 = arith.extui %0 : i1 to i32
    %c0_i32_0 = arith.constant 0 : i32
    %2 = arith.cmpi ne, %1, %c0_i32_0 : i32
    scf.if %2 {
      %c0_58 = arith.constant 0 : index
      %c0_59 = arith.constant 0 : index
      %c0_60 = arith.constant 0 : index
      %107 = vector.load %arg3[%c0_58, %c0_59, %c0_60] : memref<1x128x128xf32, #tpu.memory_space<vmem>>, vector<1x128x128xf32>
      %108 = vector.shape_cast %107 : vector<1x128x128xf32> to vector<128x128xf32>
      %c0_61 = arith.constant 0 : index
      %c0_62 = arith.constant 0 : index
      %109 = vector.load %arg5[%c0_61, %c0_62] : memref<128x128xf32, #tpu.memory_space<vmem>>, vector<128x128xf32>
      %cst_63 = arith.constant dense<0.000000e+00> : vector<128x128xf32>
      %110 = tpu.matmul %108, %109, %cst_63 {dimension_numbers = #tpu.dot_dimension_numbers<[1], [0], [0], [1], [0, 0, 1, 1], [], []>} : vector<128x128xf32>, vector<128x128xf32>, vector<128x128xf32> -> vector<128x128xf32>
      %c0_64 = arith.constant 0 : index
      %c0_65 = arith.constant 0 : index
      %111 = vector.load %arg9[%c0_64, %c0_65] : memref<1x128xf32, #tpu.memory_space<vmem>>, vector<1x128xf32>
      %112 = vector.broadcast %111 : vector<1x128xf32> to vector<128x128xf32>
      %113 = arith.addf %110, %112 : vector<128x128xf32>
      %c0_66 = arith.constant 0 : index
      %c0_67 = arith.constant 0 : index
      %114 = vector.load %arg6[%c0_66, %c0_67] : memref<128x128xf32, #tpu.memory_space<vmem>>, vector<128x128xf32>
      %cst_68 = arith.constant dense<0.000000e+00> : vector<128x128xf32>
      %115 = tpu.matmul %108, %114, %cst_68 {dimension_numbers = #tpu.dot_dimension_numbers<[1], [0], [0], [1], [0, 0, 1, 1], [], []>} : vector<128x128xf32>, vector<128x128xf32>, vector<128x128xf32> -> vector<128x128xf32>
      %c0_69 = arith.constant 0 : index
      %c0_70 = arith.constant 0 : index
      %116 = vector.load %arg10[%c0_69, %c0_70] : memref<1x128xf32, #tpu.memory_space<vmem>>, vector<1x128xf32>
      %117 = vector.broadcast %116 : vector<1x128xf32> to vector<128x128xf32>
      %118 = arith.addf %115, %117 : vector<128x128xf32>
      %c0_71 = arith.constant 0 : index
      %c0_72 = arith.constant 0 : index
      %119 = vector.load %arg22[%c0_71, %c0_72] : memref<128x128xf32, #tpu.memory_space<vmem>>, vector<128x128xf32>
      tpu.vector_store %arg22[%c0_71, %c0_72], %113 {strides = array<i32>} : memref<128x128xf32, #tpu.memory_space<vmem>>, vector<128x128xf32>,
      %c0_73 = arith.constant 0 : index
      %c0_74 = arith.constant 0 : index
      %120 = vector.load %arg23[%c0_73, %c0_74] : memref<128x128xf32, #tpu.memory_space<vmem>>, vector<128x128xf32>
      tpu.vector_store %arg23[%c0_73, %c0_74], %118 {strides = array<i32>} : memref<128x128xf32, #tpu.memory_space<vmem>>, vector<128x128xf32>,
    } else {
    }
    %c0 = arith.constant 0 : index
    %c0_1 = arith.constant 0 : index
    %c0_2 = arith.constant 0 : index
    %3 = vector.load %arg2[%c0, %c0_1, %c0_2] : memref<1x64x128xf32, #tpu.memory_space<vmem>>, vector<1x64x128xf32>
    %4 = vector.shape_cast %3 : vector<1x64x128xf32> to vector<64x128xf32>
    %c0_3 = arith.constant 0 : index
    %c0_4 = arith.constant 0 : index
    %5 = vector.load %arg4[%c0_3, %c0_4] : memref<128x128xf32, #tpu.memory_space<vmem>>, vector<128x128xf32>
    %cst = arith.constant dense<0.000000e+00> : vector<64x128xf32>
    %6 = tpu.matmul %4, %5, %cst {dimension_numbers = #tpu.dot_dimension_numbers<[1], [0], [0], [1], [0, 0, 1, 1], [], []>} : vector<64x128xf32>, vector<128x128xf32>, vector<64x128xf32> -> vector<64x128xf32>
    %c0_5 = arith.constant 0 : index
    %c0_6 = arith.constant 0 : index
    %7 = vector.load %arg8[%c0_5, %c0_6] : memref<1x128xf32, #tpu.memory_space<vmem>>, vector<1x128xf32>
    %8 = vector.broadcast %7 : vector<1x128xf32> to vector<64x128xf32>
    %9 = arith.addf %6, %8 : vector<64x128xf32>
    %cst_7 = arith.constant 0.0883883461 : f32
    %10 = vector.broadcast %cst_7 : f32 to vector<64x128xf32>
    %11 = arith.mulf %9, %10 : vector<64x128xf32>
    %c0_8 = arith.constant 0 : index
    %c0_9 = arith.constant 0 : index
    %12 = vector.load %arg22[%c0_8, %c0_9] : memref<128x128xf32, #tpu.memory_space<vmem>>, vector<128x128xf32>
    %cst_10 = arith.constant dense<0.000000e+00> : vector<64x128xf32>
    %13 = tpu.matmul %11, %12, %cst_10 {dimension_numbers = #tpu.dot_dimension_numbers<[1], [1], [0], [0], [0, 0, 1, 0], [], []>} : vector<64x128xf32>, vector<128x128xf32>, vector<64x128xf32> -> vector<64x128xf32>
    %cst_11 = arith.constant dense<0xFF800000> : vector<64xf32>
    %14 = vector.multi_reduction <maximumf>, %13, %cst_11 [1] : vector<64x128xf32> to vector<64xf32>
    %15 = vector.shape_cast %14 : vector<64xf32> to vector<64x1xf32>
    %16 = vector.broadcast %15 : vector<64x1xf32> to vector<64x128xf32>
    %17 = arith.subf %13, %16 : vector<64x128xf32>
    %18 = math.exp %17 : vector<64x128xf32>
    %cst_12 = arith.constant dense<0.000000e+00> : vector<64xf32>
    %19 = vector.multi_reduction <add>, %18, %cst_12 [1] : vector<64x128xf32> to vector<64xf32>
    %20 = vector.shape_cast %19 : vector<64xf32> to vector<64x1xf32>
    %21 = tpu.reciprocal %20 : vector<64x1xf32> -> vector<64x1xf32>
    %c0_13 = arith.constant 0 : index
    %c0_14 = arith.constant 0 : index
    %22 = vector.load %arg23[%c0_13, %c0_14] : memref<128x128xf32, #tpu.memory_space<vmem>>, vector<128x128xf32>
    %cst_15 = arith.constant dense<0.000000e+00> : vector<64x128xf32>
    %23 = tpu.matmul %18, %22, %cst_15 {dimension_numbers = #tpu.dot_dimension_numbers<[1], [0], [0], [1], [0, 0, 1, 1], [], []>} : vector<64x128xf32>, vector<128x128xf32>, vector<64x128xf32> -> vector<64x128xf32>
    %24 = vector.broadcast %21 : vector<64x1xf32> to vector<64x128xf32>
    %25 = arith.mulf %23, %24 : vector<64x128xf32>
    %c0_16 = arith.constant 0 : index
    %c0_17 = arith.constant 0 : index
    %26 = vector.load %arg7[%c0_16, %c0_17] : memref<128x128xf32, #tpu.memory_space<vmem>>, vector<128x128xf32>
    %cst_18 = arith.constant dense<0.000000e+00> : vector<64x128xf32>
    %27 = tpu.matmul %25, %26, %cst_18 {dimension_numbers = #tpu.dot_dimension_numbers<[1], [0], [0], [1], [0, 0, 1, 1], [], []>} : vector<64x128xf32>, vector<128x128xf32>, vector<64x128xf32> -> vector<64x128xf32>
    %c0_19 = arith.constant 0 : index
    %c0_20 = arith.constant 0 : index
    %28 = vector.load %arg11[%c0_19, %c0_20] : memref<1x128xf32, #tpu.memory_space<vmem>>, vector<1x128xf32>
    %29 = vector.broadcast %28 : vector<1x128xf32> to vector<64x128xf32>
    %30 = arith.addf %27, %29 : vector<64x128xf32>
    %31 = arith.addf %4, %30 : vector<64x128xf32>
    %c0_21 = arith.constant 0 : index
    %c0_22 = arith.constant 0 : index
    %32 = vector.load %arg12[%c0_21, %c0_22] : memref<1x128xf32, #tpu.memory_space<vmem>>, vector<1x128xf32>
    %c0_23 = arith.constant 0 : index
    %c0_24 = arith.constant 0 : index
    %33 = vector.load %arg13[%c0_23, %c0_24] : memref<1x128xf32, #tpu.memory_space<vmem>>, vector<1x128xf32>
    %cst_25 = arith.constant dense<0.000000e+00> : vector<64xf32>
    %34 = vector.multi_reduction <add>, %31, %cst_25 [1] : vector<64x128xf32> to vector<64xf32>
    %35 = vector.shape_cast %34 : vector<64xf32> to vector<64x1xf32>
    %36 = arith.mulf %31, %31 : vector<64x128xf32>
    %cst_26 = arith.constant dense<0.000000e+00> : vector<64xf32>
    %37 = vector.multi_reduction <add>, %36, %cst_26 [1] : vector<64x128xf32> to vector<64xf32>
    %38 = vector.shape_cast %37 : vector<64xf32> to vector<64x1xf32>
    %cst_27 = arith.constant 7.812500e-03 : f32
    %39 = vector.broadcast %cst_27 : f32 to vector<64x1xf32>
    %40 = arith.mulf %35, %39 : vector<64x1xf32>
    %cst_28 = arith.constant 7.812500e-03 : f32
    %41 = vector.broadcast %cst_28 : f32 to vector<64x1xf32>
    %42 = arith.mulf %38, %41 : vector<64x1xf32>
    %43 = arith.mulf %40, %40 : vector<64x1xf32>
    %44 = arith.subf %42, %43 : vector<64x1xf32>
    %45 = vector.broadcast %40 : vector<64x1xf32> to vector<64x128xf32>
    %46 = arith.subf %31, %45 : vector<64x128xf32>
    %cst_29 = arith.constant 9.99999974E-6 : f32
    %47 = vector.broadcast %cst_29 : f32 to vector<64x1xf32>
    %48 = arith.addf %44, %47 : vector<64x1xf32>
    %49 = math.rsqrt %48 : vector<64x1xf32>
    %50 = vector.broadcast %49 : vector<64x1xf32> to vector<64x128xf32>
    %51 = arith.mulf %46, %50 : vector<64x128xf32>
    %52 = vector.broadcast %32 : vector<1x128xf32> to vector<64x128xf32>
    %53 = arith.mulf %51, %52 : vector<64x128xf32>
    %54 = vector.broadcast %33 : vector<1x128xf32> to vector<64x128xf32>
    %55 = arith.addf %53, %54 : vector<64x128xf32>
    %c0_30 = arith.constant 0 : index
    %c0_31 = arith.constant 0 : index
    %56 = vector.load %arg16[%c0_30, %c0_31] : memref<128x512xf32, #tpu.memory_space<vmem>>, vector<128x512xf32>
    %cst_32 = arith.constant dense<0.000000e+00> : vector<64x512xf32>
    %57 = tpu.matmul %55, %56, %cst_32 {dimension_numbers = #tpu.dot_dimension_numbers<[1], [0], [0], [1], [0, 0, 1, 1], [], []>} : vector<64x128xf32>, vector<128x512xf32>, vector<64x512xf32> -> vector<64x512xf32>
    %c0_33 = arith.constant 0 : index
    %c0_34 = arith.constant 0 : index
    %58 = vector.load %arg17[%c0_33, %c0_34] : memref<1x512xf32, #tpu.memory_space<vmem>>, vector<1x512xf32>
    %59 = vector.broadcast %58 : vector<1x512xf32> to vector<64x512xf32>
    %60 = arith.addf %57, %59 : vector<64x512xf32>
    %cst_35 = arith.constant 5.000000e-01 : f32
    %61 = vector.broadcast %cst_35 : f32 to vector<64x512xf32>
    %62 = arith.mulf %61, %60 : vector<64x512xf32>
    %cst_36 = arith.constant 0.707106769 : f32
    %63 = vector.broadcast %cst_36 : f32 to vector<64x512xf32>
    %64 = arith.mulf %60, %63 : vector<64x512xf32>
    %65 = math.erf %64 : vector<64x512xf32>
    %cst_37 = arith.constant 1.000000e+00 : f32
    %66 = vector.broadcast %cst_37 : f32 to vector<64x512xf32>
    %67 = arith.addf %66, %65 : vector<64x512xf32>
    %68 = arith.mulf %62, %67 : vector<64x512xf32>
    %c0_38 = arith.constant 0 : index
    %c0_39 = arith.constant 0 : index
    %69 = vector.load %arg18[%c0_38, %c0_39] : memref<512x128xf32, #tpu.memory_space<vmem>>, vector<512x128xf32>
    %cst_40 = arith.constant dense<0.000000e+00> : vector<64x128xf32>
    %70 = tpu.matmul %68, %69, %cst_40 {dimension_numbers = #tpu.dot_dimension_numbers<[1], [0], [0], [1], [0, 0, 1, 1], [], []>} : vector<64x512xf32>, vector<512x128xf32>, vector<64x128xf32> -> vector<64x128xf32>
    %c0_41 = arith.constant 0 : index
    %c0_42 = arith.constant 0 : index
    %71 = vector.load %arg19[%c0_41, %c0_42] : memref<1x128xf32, #tpu.memory_space<vmem>>, vector<1x128xf32>
    %72 = vector.broadcast %71 : vector<1x128xf32> to vector<64x128xf32>
    %73 = arith.addf %70, %72 : vector<64x128xf32>
    %74 = arith.addf %55, %73 : vector<64x128xf32>
    %c0_43 = arith.constant 0 : index
    %c0_44 = arith.constant 0 : index
    %75 = vector.load %arg14[%c0_43, %c0_44] : memref<1x128xf32, #tpu.memory_space<vmem>>, vector<1x128xf32>
    %c0_45 = arith.constant 0 : index
    %c0_46 = arith.constant 0 : index
    %76 = vector.load %arg15[%c0_45, %c0_46] : memref<1x128xf32, #tpu.memory_space<vmem>>, vector<1x128xf32>
    %cst_47 = arith.constant dense<0.000000e+00> : vector<64xf32>
    %77 = vector.multi_reduction <add>, %74, %cst_47 [1] : vector<64x128xf32> to vector<64xf32>
    %78 = vector.shape_cast %77 : vector<64xf32> to vector<64x1xf32>
    %79 = arith.mulf %74, %74 : vector<64x128xf32>
    %cst_48 = arith.constant dense<0.000000e+00> : vector<64xf32>
    %80 = vector.multi_reduction <add>, %79, %cst_48 [1] : vector<64x128xf32> to vector<64xf32>
    %81 = vector.shape_cast %80 : vector<64xf32> to vector<64x1xf32>
    %cst_49 = arith.constant 7.812500e-03 : f32
    %82 = vector.broadcast %cst_49 : f32 to vector<64x1xf32>
    %83 = arith.mulf %78, %82 : vector<64x1xf32>
    %cst_50 = arith.constant 7.812500e-03 : f32
    %84 = vector.broadcast %cst_50 : f32 to vector<64x1xf32>
    %85 = arith.mulf %81, %84 : vector<64x1xf32>
    %86 = arith.mulf %83, %83 : vector<64x1xf32>
    %87 = arith.subf %85, %86 : vector<64x1xf32>
    %88 = vector.broadcast %83 : vector<64x1xf32> to vector<64x128xf32>
    %89 = arith.subf %74, %88 : vector<64x128xf32>
    %cst_51 = arith.constant 9.99999974E-6 : f32
    %90 = vector.broadcast %cst_51 : f32 to vector<64x1xf32>
    %91 = arith.addf %87, %90 : vector<64x1xf32>
    %92 = math.rsqrt %91 : vector<64x1xf32>
    %93 = vector.broadcast %92 : vector<64x1xf32> to vector<64x128xf32>
    %94 = arith.mulf %89, %93 : vector<64x128xf32>
    %95 = vector.broadcast %75 : vector<1x128xf32> to vector<64x128xf32>
    %96 = arith.mulf %94, %95 : vector<64x128xf32>
    %97 = vector.broadcast %76 : vector<1x128xf32> to vector<64x128xf32>
    %98 = arith.addf %96, %97 : vector<64x128xf32>
    %c0_52 = arith.constant 0 : index
    %c0_53 = arith.constant 0 : index
    %c0_54 = arith.constant 0 : index
    %99 = vector.load %arg20[%c0_52, %c0_53, %c0_54] : memref<1x64x128xf32, #tpu.memory_space<vmem>>, vector<1x64x128xf32>
    %100 = vector.shape_cast %99 : vector<1x64x128xf32> to vector<64x128xf32>
    %101 = vector.shape_cast %98 : vector<64x128xf32> to vector<1x64x128xf32>
    tpu.vector_store %arg20[%c0_52, %c0_53, %c0_54], %101 {strides = array<i32>} : memref<1x64x128xf32, #tpu.memory_space<vmem>>, vector<1x64x128xf32>,
    %102 = vector.broadcast %21 : vector<64x1xf32> to vector<64x128xf32>
    %103 = arith.mulf %18, %102 : vector<64x128xf32>
    %c0_55 = arith.constant 0 : index
    %c0_56 = arith.constant 0 : index
    %c0_57 = arith.constant 0 : index
    %104 = vector.load %arg21[%c0_55, %c0_56, %c0_57] : memref<1x64x128xf32, #tpu.memory_space<vmem>>, vector<1x64x128xf32>
    %105 = vector.shape_cast %104 : vector<1x64x128xf32> to vector<64x128xf32>
    %106 = vector.shape_cast %103 : vector<64x128xf32> to vector<1x64x128xf32>
    tpu.vector_store %arg21[%c0_55, %c0_56, %c0_57], %106 {strides = array<i32>} : memref<1x64x128xf32, #tpu.memory_space<vmem>>, vector<1x64x128xf32>,
    return
  }
  func.func @transform_0(%arg0: i32, %arg1: i32) -> (i32, i32, i32) {
    %c0_i32 = arith.constant 0 : i32
    %c0_i32_0 = arith.constant 0 : i32
    return %arg0, %arg1, %c0_i32 : i32, i32, i32
  }
  func.func @transform_1(%arg0: i32, %arg1: i32) -> (i32, i32, i32) {
    %c0_i32 = arith.constant 0 : i32
    %c0_i32_0 = arith.constant 0 : i32
    %c0_i32_1 = arith.constant 0 : i32
    return %arg0, %c0_i32, %c0_i32_0 : i32, i32, i32
  }
  func.func @transform_2(%arg0: i32, %arg1: i32) -> (i32, i32) {
    %c0_i32 = arith.constant 0 : i32
    %c0_i32_0 = arith.constant 0 : i32
    %c0_i32_1 = arith.constant 0 : i32
    return %c0_i32, %c0_i32_0 : i32, i32
  }
  func.func @transform_3(%arg0: i32, %arg1: i32) -> (i32, i32) {
    %c0_i32 = arith.constant 0 : i32
    %c0_i32_0 = arith.constant 0 : i32
    %c0_i32_1 = arith.constant 0 : i32
    return %c0_i32, %c0_i32_0 : i32, i32
  }
  func.func @transform_4(%arg0: i32, %arg1: i32) -> (i32, i32) {
    %c0_i32 = arith.constant 0 : i32
    %c0_i32_0 = arith.constant 0 : i32
    %c0_i32_1 = arith.constant 0 : i32
    return %c0_i32, %c0_i32_0 : i32, i32
  }
  func.func @transform_5(%arg0: i32, %arg1: i32) -> (i32, i32) {
    %c0_i32 = arith.constant 0 : i32
    %c0_i32_0 = arith.constant 0 : i32
    %c0_i32_1 = arith.constant 0 : i32
    return %c0_i32, %c0_i32_0 : i32, i32
  }
  func.func @transform_6(%arg0: i32, %arg1: i32) -> (i32, i32) {
    %c0_i32 = arith.constant 0 : i32
    %c0_i32_0 = arith.constant 0 : i32
    %c0_i32_1 = arith.constant 0 : i32
    return %c0_i32, %c0_i32_0 : i32, i32
  }
  func.func @transform_7(%arg0: i32, %arg1: i32) -> (i32, i32) {
    %c0_i32 = arith.constant 0 : i32
    %c0_i32_0 = arith.constant 0 : i32
    %c0_i32_1 = arith.constant 0 : i32
    return %c0_i32, %c0_i32_0 : i32, i32
  }
  func.func @transform_8(%arg0: i32, %arg1: i32) -> (i32, i32) {
    %c0_i32 = arith.constant 0 : i32
    %c0_i32_0 = arith.constant 0 : i32
    %c0_i32_1 = arith.constant 0 : i32
    return %c0_i32, %c0_i32_0 : i32, i32
  }
  func.func @transform_9(%arg0: i32, %arg1: i32) -> (i32, i32) {
    %c0_i32 = arith.constant 0 : i32
    %c0_i32_0 = arith.constant 0 : i32
    %c0_i32_1 = arith.constant 0 : i32
    return %c0_i32, %c0_i32_0 : i32, i32
  }
  func.func @transform_10(%arg0: i32, %arg1: i32) -> (i32, i32) {
    %c0_i32 = arith.constant 0 : i32
    %c0_i32_0 = arith.constant 0 : i32
    %c0_i32_1 = arith.constant 0 : i32
    return %c0_i32, %c0_i32_0 : i32, i32
  }
  func.func @transform_11(%arg0: i32, %arg1: i32) -> (i32, i32) {
    %c0_i32 = arith.constant 0 : i32
    %c0_i32_0 = arith.constant 0 : i32
    %c0_i32_1 = arith.constant 0 : i32
    return %c0_i32, %c0_i32_0 : i32, i32
  }
  func.func @transform_12(%arg0: i32, %arg1: i32) -> (i32, i32) {
    %c0_i32 = arith.constant 0 : i32
    %c0_i32_0 = arith.constant 0 : i32
    %c0_i32_1 = arith.constant 0 : i32
    return %c0_i32, %c0_i32_0 : i32, i32
  }
  func.func @transform_13(%arg0: i32, %arg1: i32) -> (i32, i32) {
    %c0_i32 = arith.constant 0 : i32
    %c0_i32_0 = arith.constant 0 : i32
    %c0_i32_1 = arith.constant 0 : i32
    return %c0_i32, %c0_i32_0 : i32, i32
  }
  func.func @transform_14(%arg0: i32, %arg1: i32) -> (i32, i32) {
    %c0_i32 = arith.constant 0 : i32
    %c0_i32_0 = arith.constant 0 : i32
    %c0_i32_1 = arith.constant 0 : i32
    return %c0_i32, %c0_i32_0 : i32, i32
  }
  func.func @transform_15(%arg0: i32, %arg1: i32) -> (i32, i32) {
    %c0_i32 = arith.constant 0 : i32
    %c0_i32_0 = arith.constant 0 : i32
    %c0_i32_1 = arith.constant 0 : i32
    return %c0_i32, %c0_i32_0 : i32, i32
  }
  func.func @transform_16(%arg0: i32, %arg1: i32) -> (i32, i32) {
    %c0_i32 = arith.constant 0 : i32
    %c0_i32_0 = arith.constant 0 : i32
    %c0_i32_1 = arith.constant 0 : i32
    return %c0_i32, %c0_i32_0 : i32, i32
  }
  func.func @transform_17(%arg0: i32, %arg1: i32) -> (i32, i32) {
    %c0_i32 = arith.constant 0 : i32
    %c0_i32_0 = arith.constant 0 : i32
    %c0_i32_1 = arith.constant 0 : i32
    return %c0_i32, %c0_i32_0 : i32, i32
  }
  func.func @transform_18(%arg0: i32, %arg1: i32) -> (i32, i32, i32) {
    %c0_i32 = arith.constant 0 : i32
    %c0_i32_0 = arith.constant 0 : i32
    return %arg0, %arg1, %c0_i32 : i32, i32, i32
  }
  func.func @transform_19(%arg0: i32, %arg1: i32) -> (i32, i32, i32) {
    %c0_i32 = arith.constant 0 : i32
    %c0_i32_0 = arith.constant 0 : i32
    return %arg0, %arg1, %c0_i32 : i32, i32, i32
  }
}

</mosaic_0001>

<bundles_post_ra>
// kernel: tpu_custom_call.1
= control target key start
LH: loop header
LB: loop body
LE: loop exit
PB: predicated region body
PF: predicated region fallthrough
CT: control target
= control target key end

     0   :  { %s7318_s0 = inlined_call_operand.hbm [shape: f32[2,128,128], index: 0, kind: input, shape index: {}]   ;;  %s7319_s1 = inlined_call_operand.hbm [shape: f32[2,128,128], index: 1, kind: input, shape index: {}]   ;;  %s7320_s2 = inlined_call_operand.hbm [shape: f32[128,128], index: 2, kind: input, shape index: {}]   ;;  %s7321_s3 = inlined_call_operand.hbm [shape: f32[128,128], index: 3, kind: input, shape index: {}]   ;;  %s7322_s4 = inlined_call_operand.hbm [shape: f32[128,128], index: 4, kind: input, shape index: {}]   ;;  %s7323_s5 = inlined_call_operand.hbm [shape: f32[128,128], index: 5, kind: input, shape index: {}]   ;;  %s7324_s6 = inlined_call_operand.vmem [shape: f32[1,128], index: 6, kind: input, shape index: {}]   ;;  %s7325_s7 = inlined_call_operand.vmem [shape: f32[1,128], index: 7, kind: input, shape index: {}]   ;;  %s7326_s8 = inlined_call_operand.vmem [shape: f32[1,128], index: 8, kind: input, shape index: {}]   ;;  %s7327_s9 = inlined_call_operand.vmem [shape: f32[1,128], index: 9, kind: input, shape index: {}]   ;;  %s7328_s10 = inlined_call_operand.vmem [shape: f32[1,128], index: 10, kind: input, shape index: {}]   ;;  %s7329_s11 = inlined_call_operand.vmem [shape: f32[1,128], index: 11, kind: input, shape index: {}]   ;;  %s7330_s12 = inlined_call_operand.vmem [shape: f32[1,128], index: 12, kind: input, shape index: {}]   ;;  %s7331_s13 = inlined_call_operand.vmem [shape: f32[1,128], index: 13, kind: input, shape index: {}]   ;;  %s7332_s14 = inlined_call_operand.hbm [shape: f32[128,512], index: 14, kind: input, shape index: {}]   ;;  %s7333_s15 = inlined_call_operand.vmem [shape: f32[1,512], index: 15, kind: input, shape index: {}]   ;;  %s7334_s16 = inlined_call_operand.hbm [shape: f32[512,128], index: 16, kind: input, shape index: {}]   ;;  %s7335_s17 = inlined_call_operand.vmem [shape: f32[1,128], index: 17, kind: input, shape index: {}]   ;;  %s7336_s18 = inlined_call_operand.hbm [shape: f32[2,128,128], index: 18, kind: output, shape index: {0}]   ;;  %s7337_s19 = inlined_call_operand.hbm [shape: f32[2,128,128], index: 19, kind: output, shape index: {1}]  }
   0x1   :  { %7393 = sst [smem:[#allocation94_spill]] %s7318_s0 }
   0x2   :  { %7394 = sst [smem:[#allocation95_spill]] %s7319_s1 }
   0x3   :  { %7395 = sst [smem:[#allocation96_spill]] %s7320_s2 }
   0x4   :  { %7396 = sst [smem:[#allocation97_spill]] %s7321_s3 }
   0x5   :  { %7397 = sst [smem:[#allocation98_spill]] %s7322_s4 }
   0x6   :  { %7398 = sst [smem:[#allocation99_spill]] %s7323_s5 }
   0x7   :  { %7399 = sst [smem:[#allocation100_spill]] %s7324_s6 }
   0x8   :  { %7400 = sst [smem:[#allocation101_spill]] %s7325_s7 }
   0x9   :  { %7401 = sst [smem:[#allocation102_spill]] %s7326_s8 }
   0xa   :  { %7402 = sst [smem:[#allocation103_spill]] %s7327_s9 }
   0xb   :  { %7403 = sst [smem:[#allocation104_spill]] %s7328_s10 }
   0xc   :  { %7404 = sst [smem:[#allocation105_spill]] %s7329_s11 }
   0xd   :  { %7405 = sst [smem:[#allocation106_spill]] %s7330_s12 }
   0xe   :  { %7406 = sst [smem:[#allocation107_spill]] %s7331_s13 }
   0xf   :  { %7407 = sst [smem:[#allocation108_spill]] %s7332_s14 }
  0x10   :  { %7408 = sst [smem:[#allocation109_spill]] %s7333_s15 }
  0x11   :  { %7409 = sst [smem:[#allocation110_spill]] %s7334_s16 }
  0x12   :  { %7410 = sst [smem:[#allocation111_spill]] %s7335_s17 }
  0x13   :  { %7411 = sst [smem:[#allocation112_spill]] %s7336_s18 }
  0x14   :  { %7412 = sst [smem:[#allocation113_spill]] %s7337_s19 }
  0x15   :  { %25 = vsyncpa [#allocation5], 0 }
  0x16   :  { %27 = vsyncpa [#allocation5 + $0x1], 0 }
  0x17   :  { %28 = vsyncpa [#allocation8], 0 }
  0x18   :  { %30 = vsyncpa [#allocation8 + $0x1], 0 }
  0x19   :  { %31 = vsyncpa [#allocation11], 0 }
  0x1a   :  { %32 = vsyncpa [#allocation14], 0 }
  0x1b   :  { %33 = vsyncpa [#allocation17], 0 }
  0x1c   :  { %34 = vsyncpa [#allocation6], 0 }
  0x1d   :  { %36 = vsyncpa [#allocation6 + $0x1], 0 }
  0x1e   :  { %37 = vsyncpa [#allocation20], 0 }
  0x1f   :  { %39 = vsyncpa [#allocation20 + $0x1], 0  ;;  %s5010_s0 = smov 0   ;;  %s5012_s30 = smov 0  }
  0x20   :  { %s5014_s20 = smov 0   ;;  %s5016_s21 = smov 0  }
  0x21   :  { %s5018_s1 = smov 0   ;;  %s5020_s22 = smov 0  }
  0x22   :  { %s5022_s2 = smov 0   ;;  %s5024_s23 = smov 0  }
  0x23   :  { %s5026_s24 = smov 0   ;;  %s5028_s25 = smov 0  }
  0x24   :  { %s5030_s3 = smov 0  }
  0x25 LB: > { %7413 = sst [smem:[#allocation29_spill]] %s4884_s23  ;;  %s5066_s26 = sadd.s32 4294967295, %s4896_s3   ;;  %s4896_s3 = sphi %s5030_s3, %s45_s3   ;;  %s4892_s25 = sphi %s5028_s25, %s7667_s25   ;;  %s4888_s24 = sphi %s5026_s24, %s7658_s24   ;;  %s4884_s23 = sphi %s5024_s23, %s7666_s23   ;;  %s4880_s2 = sphi %s5022_s2, %s7657_s2   ;;  %s4876_s22 = sphi %s5020_s22, %s7665_s22   ;;  %s4872_s1 = sphi %s5018_s1, %s7664_s1   ;;  %s4868_s21 = sphi %s5016_s21, %s7663_s21   ;;  %s4864_s20 = sphi %s5014_s20, %s7662_s20   ;;  %s4860_s30 = sphi %s5012_s30, %s7661_s30   ;;  %s4856_s0 = sphi %s5010_s0, %s7660_s0  }
  0x26   : > { %7414 = sst [smem:[#allocation30_spill]] %s4888_s24  ;;  %p4016_p0 = scmp.ge.s32.totalorder %s4896_s3, 1 }
  0x27   : > { %p80_p1 = scmp.eq.s32.totalorder %s5066_s26, 0  ;;  %p508_p2 = scmp.lt.s32.totalorder %s4896_s3, 5 }
  0x28   : > { %s7415_s29 = sld [smem:[#allocation96_spill]]  ;;  %s4898_s23 = smov [#allocation9]  }
  0x29   : > { %p5074_p3 = pnand %p4016_p0, %p508_p2  ;;  %s521_s13 = sshll.u32 %s4898_s23, 4  ;;  %s522_s13 = int_to_ptr.vmem [resolvable:$true] %s521_s13 }
  0x2a   : > { %s7418_s27 = sld [smem:[#allocation97_spill]]  ;;  %s7342_s11 = smov 8  }
  0x2b   : > { %p4198_p4 = pneg %p5074_p3  ;;  %s4901_s23 = smov [#allocation10]  }
  0x2c   : > { %s535_s10 = sshll.u32 %s4901_s23, 4  ;;  %s7419_s5 = sld [smem:[#allocation99_spill]]  ;;  %s536_s10 = int_to_ptr.vmem [resolvable:$true] %s535_s10 }
  0x2d   : > { %p5082_p5 = pnand %p4198_p4, %p80_p1  ;;  %s7420_s4 = sld [smem:[#allocation98_spill]] }
  0x2e   : > { %s519_s18 = sshll.u32 %s7415_s29, 4  ;;  %s7340_s29 = smov 128   ;;  %s520_s18 = int_to_ptr.hbm [resolvable:$true] %s519_s18 }
  0x2f   : > { %4201 = dma.hbm_to_vmem [thread:$0]  (!%p5082_p5), %s520_s18, 2048, %s522_s13, [#allocation8], %s7340_s29, %s7340_s29, %s7342_s11  }
  0x30   : > { %s533_s28 = sshll.u32 %s7418_s27, 4  ;;  %s4902_s7 = smov [#allocation13]   ;;  %s534_s28 = int_to_ptr.hbm [resolvable:$true] %s533_s28 }
  0x31   : > { %4204 = dma.hbm_to_vmem [thread:$0]  (!%p5082_p5), %s534_s28, 2048, %s536_s10, [#allocation11], %s7340_s29, %s7340_s29, %s7342_s11  }
  0x32   : > { %s561_s8 = sshll.u32 %s7419_s5, 4  ;;  %s563_s13 = sshll.u32 %s4902_s7, 4  ;;  %s562_s8 = int_to_ptr.hbm [resolvable:$true] %s561_s8  ;;  %s564_s13 = int_to_ptr.vmem [resolvable:$true] %s563_s13 }
  0x33   : > { %s547_s27 = sshll.u32 %s7420_s4, 4  ;;  %s4903_s6 = smov [#allocation12]   ;;  %s548_s27 = int_to_ptr.hbm [resolvable:$true] %s547_s27 }
  0x34   : > { %4210 = dma.hbm_to_vmem [thread:$0]  (!%p5082_p5), %s562_s8, 2048, %s564_s13, [#allocation14], %s7340_s29, %s7340_s29, %s7342_s11  }
  0x35   : > { %s549_s9 = sshll.u32 %s4903_s6, 4  ;;  %s7421_s14 = sld [smem:[#allocation108_spill]]  ;;  %s550_s9 = int_to_ptr.vmem [resolvable:$true] %s549_s9 }
  0x36   : > { %4207 = dma.hbm_to_vmem [thread:$0]  (!%p5082_p5), %s548_s27, 2048, %s550_s9, [#allocation11], %s7340_s29, %s7340_s29, %s7342_s11  }
  0x37   : > { %s4904_s7 = smov [#allocation15]   ;;  %s7422_s16 = sld [smem:[#allocation110_spill]] }
  0x38   : > { %s601_s8 = sshll.u32 %s4904_s7, 4  ;;  %s4905_s13 = smov 512   ;;  %s602_s8 = int_to_ptr.vmem [resolvable:$true] %s601_s8 }
  0x39   : > { %s4906_s6 = smov 32   ;;  %s4907_s27 = smov [#allocation16]  }
  0x3a   : > { %s618_s9 = sshll.u32 %s4907_s27, 4  ;;  %s4015_s18 = sadd.s32 4294967294, %s4896_s3   ;;  %s619_s9 = int_to_ptr.vmem [resolvable:$true] %s618_s9 }
  0x3b   : > { %s599_s10 = sshll.u32 %s7421_s14, 4  ;;  %s54_s23 = sadd.s32 1, %s4888_s24  ;;  %s600_s10 = int_to_ptr.hbm [resolvable:$true] %s599_s10 }
  0x3c   : > { %4213 = dma.hbm_to_vmem [thread:$0]  (!%p5082_p5), %s600_s10, 8192, %s602_s8, [#allocation14], %s4905_s13, %s4905_s13, %s4906_s6  }
  0x3d   : > { %s616_s17 = sshll.u32 %s7422_s16, 4  ;;  %p55_p6 = scmp.ge.s32.totalorder %s54_s23, 2  ;;  %s617_s17 = int_to_ptr.hbm [resolvable:$true] %s616_s17 }
  0x3e   : > { %4216 = dma.hbm_to_vmem [thread:$0]  (!%p5082_p5), %s617_s17, 8192, %s619_s9, [#allocation17], %s7340_s29, %s7340_s29, %s7342_s11  }
  0x3f   : > { %s57_s7 = sadd.s32 1, %s4892_s25  ;;  %s66_s10 = sadd.s32 1, %s4876_s22 }
  0x40   : > { %p73_p7 = scmp.ne.s32.totalorder %s4876_s22, %s4872_s1  ;;  %s7669_s23 = smov (%p55_p6, %s54_s23), 0 }
  0x41   : > { %7423 = sst [smem:[#allocation31_spill]] %s7669_s23  ;;  %s7671_s7 = smov (!%p55_p6, %s57_s7), %s4892_s25 }
  0x42   : > { %s62_s8 = ssub.s32 %s4888_s24, %s7669_s23  ;;  %p74_p8 = scmp.eq.s32.totalorder %s4896_s3, 0 }
  0x43   : > { %p59_p9 = scmp.ge.s32.totalorder %s7671_s7, 2  ;;  %p79_p10 = scmp.ne.s32.totalorder %s4872_s1, %s4868_s21 }
  0x44   : > { %p5144_p11 = por %p74_p8, %p73_p7  ;;  %p467_p12 = scmp.eq.s32.totalorder %s5066_s26, 3 }
  0x45   : > { %s7673_s7 = smov (%p59_p9, %s7671_s7), 0  ;;  %p5153_p13 = por %p80_p1, %p79_p10 }
  0x46   : > { %7425 = sst [smem:[#allocation32_spill]] %s7673_s7  ;;  %p5157_p0 = por %p467_p12, %p73_p7 }
  0x47   : > { %s61_s17 = ssub.s32 %s4892_s25, %s7673_s7  ;;  %p473_p2 = scmp.eq.s32.totalorder %s4015_s18, 3 }
  0x48   : > { %s63_s13 = sor.u32 %s62_s8, %s61_s17  ;;  %p90_p4 = scmp.eq.s32.totalorder %s61_s17, 0 }
  0x49   : > { %p64_p5 = scmp.eq.s32.totalorder %s63_s13, 0  ;;  %p5163_p6 = por %p473_p2, %p79_p10 }
  0x4a   : > { %p4237_p9 = scmp.lt.s32.totalorder %s4896_s3, 4  ;;  %s635_s27 = sand.u32 1, %s4876_s22  }
  0x4b   : > { %s5170_s9 = scalar_select %p64_p5, %s4876_s22, %s66_s10  }
  0x4c   : > { %s4024_s29 = sshll.u32 %s635_s27, 6  ;;  %s4025_s11 = sshll.u32 %s4888_s24, 3 }
  0x4d   : > { %7429 = sst [smem:[#allocation33_spill]] %s5170_s9  ;;  %s4026_s18 = sshll.u32 %s4892_s25, 4 }
  0x4e   : > { %s639_s8 = scalar_lea.vmem [#allocation4], %s4024_s29  ;;  %s644_s4 = sadd.s32 %s4026_s18, %s4025_s11 }
  0x4f   : > { %s649_s13 = sshll.u32 %s639_s8, 4  ;;  %s4027_s5 = sshll.u32 %s644_s4, 3  ;;  %s650_s13 = int_to_ptr.vmem [resolvable:$true] %s649_s13 }
  0x50   : > { %p4218_p7 = pnand %p4237_p9, %p5144_p11  ;;  %s7430_s16 = sld [smem:[#allocation94_spill]] }
  0x51   : > { %s636_s24 = scalar_lea.sflag [#allocation5], %s635_s27  ;;  %s7431_s9 = smov 8  }
  0x52   : > { %s7432_s29 = smov 128   ;;  %s92_s8 = sadd.s32 1, %s4864_s20 }
  0x53   : > { %p99_p10 = scmp.ne.s32.totalorder %s4864_s20, %s4860_s30  ;;  %p105_p12 = scmp.ne.s32.totalorder %s4860_s30, %s4856_s0 }
  0x54   : > { %s5189_s4 = scalar_select %p90_p4, %s4864_s20, %s92_s8  }
  0x55   : > { %p101_p11 = por %p99_p10, %p74_p8  ;;  %s661_s11 = sand.u32 1, %s4864_s20  }
  0x56   : > { %s646_s7 = scalar_lea.hbm %s7430_s16, %s4027_s5  ;;  %p5198_p2 = por %p105_p12, %p80_p1 }
  0x57   : > { %s647_s23 = sshll.u32 %s646_s7, 4  ;;  %s659_s14 = sand.u32 1, %s4896_s3   ;;  %s648_s23 = int_to_ptr.hbm [resolvable:$true] %s647_s23 }
  0x58   : > { %4220 = dma.hbm_to_vmem [thread:$0]  (!%p4218_p7), %s648_s23, 1024, %s650_s13, %s636_s24, %s7432_s29, %s7432_s29, %s7431_s9  }
  0x59   : > { %s4028_s16 = sshll.u32 %s661_s11, 7  ;;  %s4085_s7 = sshll.u32 %s4892_s25, 7 }
  0x5a   : > { %s7434_s23 = sld [smem:[#allocation95_spill]]  ;;  %s663_s17 = scalar_lea.vmem [#allocation7], %s4028_s16 }
  0x5b   : > { %s671_s13 = sshll.u32 %s663_s17, 4  ;;  %p4221_p8 = pnand %p4237_p9, %p101_p11  ;;  %s672_s13 = int_to_ptr.vmem [resolvable:$true] %s671_s13 }
  0x5c   : > { %s660_s0 = scalar_lea.sflag [#allocation8], %s659_s14 }
  0x5e   : > { %683 = sbr.rel (%p5074_p3) target bundleno = 1965 (0x7ad), region = 92 }
  0x60   : > { %s668_s27 = scalar_lea.hbm %s7434_s23, %s4085_s7 }
  0x61   : > { %s669_s18 = sshll.u32 %s668_s27, 4  ;;  %s670_s18 = int_to_ptr.hbm [resolvable:$true] %s669_s18 }
  0x62   : > { %4223 = dma.hbm_to_vmem [thread:$0]  (!%p4221_p8), %s670_s18, 2048, %s672_s13, %s660_s0, %s7432_s29, %s7432_s29, %s7431_s9  }
  0x63   : > { %s5215_s10 = sand.u32 1, %s4872_s1  }
  0x64   : > { %s4032_s8 = sshll.u32 %s5215_s10, 6  ;;  %s686_s11 = scalar_lea.sflag [#allocation5], %s5215_s10 }
  0x65   : > { %s5219_s16 = scalar_lea.vmem [#allocation4], %s4032_s8 }
  0x66   : > { %4823 = dma.done.wait (%p5153_p13), %s686_s11, 1024  }
  0x67   : > { %4825 = vsyncadd (%p5153_p13), %s686_s11, 4294966272  ;;  %s695_s19 = sand.u32 1, %s5066_s26   ;;  %s697_s9 = sand.u32 1, %s4860_s30  }
  0x68   : > { %s4033_s29 = sshll.u32 %s697_s9, 7  ;;  %s696_s14 = scalar_lea.sflag [#allocation8], %s695_s19 }
  0x69   : > { %s5227_s7 = scalar_lea.vmem [#allocation7], %s4033_s29 }
  0x6a   : > { %4827 = dma.done.wait (%p5198_p2), %s696_s14, 2048  }
  0x6b   : > { %4829 = vsyncadd (%p5198_p2), %s696_s14, 4294965248 }
  0x6c   : > { %4831 = dma.done.wait (%p80_p1), [#allocation8], 2048  }
  0x6d   : > { %4833 = vsyncadd (%p80_p1), [#allocation8], 4294965248 }
  0x6e   : > { %4835 = dma.done.wait (%p80_p1), [#allocation11], 4096  }
  0x6f   : > { %4837 = vsyncadd (%p80_p1), [#allocation11], 4294963200 }
  0x70   : > { %4839 = dma.done.wait (%p80_p1), [#allocation14], 10240  }
  0x71   : > { %4841 = vsyncadd (%p80_p1), [#allocation14], 4294957056 }
  0x72   : > { %4843 = dma.done.wait (%p80_p1), [#allocation17], 8192  }
  0x73   : > { %4845 = vsyncadd (%p80_p1), [#allocation17], 4294959104  ;;  %s5249_s28 = scalar_lea.vmem [#allocation18], %s4032_s8  ;;  %s5251_s5 = scalar_lea.vmem [#allocation19], %s4032_s8 }
  0x74   : > { %p4042_p3 = scmp.ne.s32.totalorder %s4880_s2, 0 }
  0x75   : > { %s7435_s24 = sld [smem:[#allocation101_spill]] (!%p4042_p3) }
  0x76   : > { %801 = sbr.rel (%p4042_p3) target bundleno = 347 (0x15b), region = 128  ;;  %s7436_s18 = sld [smem:[#allocation102_spill]] (!%p4042_p3) }
  0x7b   : > { %v833_v0 = vld [vmem:[#allocation10 + $0x78] sm:$0xff]  ;;  %v832_v2 = vld [vmem:[#allocation10 + $0x70] sm:$0xff]  ;;  %v831_v4 = vld [vmem:[#allocation10 + $0x68] sm:$0xff] }
  0x7c   : > { %v918_v1 = vld [vmem:[#allocation12 + $0x78] sm:$0xff]  ;;  %4086 = vmatpush.msra.mxu2 %v833_v0  ;;  %v917_v3 = vld [vmem:[#allocation12 + $0x70] sm:$0xff]  ;;  %v916_v5 = vld [vmem:[#allocation12 + $0x68] sm:$0xff]  ;;  %838 = vmatpush.msra.mxu0 %v833_v0 }
  0x7d   : > { %4102 = vmatpush.msra.mxu3 %v918_v1  ;;  %923 = vmatpush.msra.mxu1 %v918_v1  ;;  %v830_v6 = vld [vmem:[#allocation10 + $0x60] sm:$0xff]  ;;  %v829_v8 = vld [vmem:[#allocation10 + $0x58] sm:$0xff]  ;;  %v828_v10 = vld [vmem:[#allocation10 + $0x50] sm:$0xff] }
  0x7e   : > { %4087 = vmatpush.msra.mxu2 %v832_v2  ;;  %v915_v7 = vld [vmem:[#allocation12 + $0x60] sm:$0xff]  ;;  %839 = vmatpush.msra.mxu0 %v832_v2  ;;  %v914_v9 = vld [vmem:[#allocation12 + $0x58] sm:$0xff]  ;;  %v913_v11 = vld [vmem:[#allocation12 + $0x50] sm:$0xff] }
  0x7f   : > { %4103 = vmatpush.msra.mxu3 %v917_v3  ;;  %924 = vmatpush.msra.mxu1 %v917_v3  ;;  %v827_v12 = vld [vmem:[#allocation10 + $0x48] sm:$0xff]  ;;  %v826_v14 = vld [vmem:[#allocation10 + $0x40] sm:$0xff]  ;;  %v825_v16 = vld [vmem:[#allocation10 + $0x38] sm:$0xff] }
  0x80   : > { %4088 = vmatpush.msra.mxu2 %v831_v4  ;;  %840 = vmatpush.msra.mxu0 %v831_v4  ;;  %v912_v13 = vld [vmem:[#allocation12 + $0x48] sm:$0xff]  ;;  %v911_v15 = vld [vmem:[#allocation12 + $0x40] sm:$0xff]  ;;  %v910_v17 = vld [vmem:[#allocation12 + $0x38] sm:$0xff] }
  0x81   : > { %4104 = vmatpush.msra.mxu3 %v916_v5  ;;  %925 = vmatpush.msra.mxu1 %v916_v5  ;;  %v824_v18 = vld [vmem:[#allocation10 + $0x30] sm:$0xff]  ;;  %v823_v20 = vld [vmem:[#allocation10 + $0x28] sm:$0xff]  ;;  %v822_v22 = vld [vmem:[#allocation10 + $0x20] sm:$0xff] }
  0x82   : > { %4089 = vmatpush.msra.mxu2 %v830_v6  ;;  %841 = vmatpush.msra.mxu0 %v830_v6  ;;  %v909_v19 = vld [vmem:[#allocation12 + $0x30] sm:$0xff]  ;;  %v908_v21 = vld [vmem:[#allocation12 + $0x28] sm:$0xff]  ;;  %v907_v23 = vld [vmem:[#allocation12 + $0x20] sm:$0xff] }
  0x83   : > { %4105 = vmatpush.msra.mxu3 %v915_v7  ;;  %926 = vmatpush.msra.mxu1 %v915_v7  ;;  %v821_v24 = vld [vmem:[#allocation10 + $0x18] sm:$0xff]  ;;  %v820_v26 = vld [vmem:[#allocation10 + $0x10] sm:$0xff]  ;;  %v819_v28 = vld [vmem:[#allocation10 + $0x8] sm:$0xff] }
  0x84   : > { %4090 = vmatpush.msra.mxu2 %v829_v8  ;;  %842 = vmatpush.msra.mxu0 %v829_v8  ;;  %v906_v25 = vld [vmem:[#allocation12 + $0x18] sm:$0xff]  ;;  %v905_v27 = vld [vmem:[#allocation12 + $0x10] sm:$0xff]  ;;  %v904_v29 = vld [vmem:[#allocation12 + $0x8] sm:$0xff] }
  0x85   : > { %4106 = vmatpush.msra.mxu3 %v914_v9  ;;  %927 = vmatpush.msra.mxu1 %v914_v9  ;;  %v818_v30 = vld [vmem:[#allocation10] sm:$0xff]  ;;  %v811_v34 = vld [vmem:[%s5227_s7 + $0x48] sm:$0xff]  ;;  %v812_v36 = vld [vmem:[%s5227_s7 + $0x50] sm:$0xff] }
  0x86   : > { %4091 = vmatpush.msra.mxu2 %v828_v10  ;;  %843 = vmatpush.msra.mxu0 %v828_v10  ;;  %v903_v31 = vld [vmem:[#allocation12] sm:$0xff]  ;;  %v803_v35 = vld [vmem:[%s5227_s7 + $0x8] sm:$0xff]  ;;  %v804_v37 = vld [vmem:[%s5227_s7 + $0x10] sm:$0xff] }
  0x87   : > { %4107 = vmatpush.msra.mxu3 %v913_v11  ;;  %928 = vmatpush.msra.mxu1 %v913_v11  ;;  %v810_v32 = vld [vmem:[%s5227_s7 + $0x40] sm:$0xff]  ;;  %v813_v38 = vld [vmem:[%s5227_s7 + $0x58] sm:$0xff]  ;;  %v815_v42 = vld [vmem:[%s5227_s7 + $0x68] sm:$0xff] }
  0x88   : > { %4092 = vmatpush.msra.mxu2 %v827_v12  ;;  %844 = vmatpush.msra.mxu0 %v827_v12  ;;  %v802_v33 = vld [vmem:[%s5227_s7] sm:$0xff]  ;;  %v805_v39 = vld [vmem:[%s5227_s7 + $0x18] sm:$0xff]  ;;  %v807_v43 = vld [vmem:[%s5227_s7 + $0x28] sm:$0xff] }
  0x89   : > { %4108 = vmatpush.msra.mxu3 %v912_v13  ;;  %929 = vmatpush.msra.mxu1 %v912_v13  ;;  %v814_v40 = vld [vmem:[%s5227_s7 + $0x60] sm:$0xff]  ;;  %v816_v44 = vld [vmem:[%s5227_s7 + $0x70] sm:$0xff]  ;;  %v817_v46 = vld [vmem:[%s5227_s7 + $0x78] sm:$0xff] }
  0x8a   : > { %4093 = vmatpush.msra.mxu2 %v826_v14  ;;  %845 = vmatpush.msra.mxu0 %v826_v14  ;;  %v806_v41 = vld [vmem:[%s5227_s7 + $0x20] sm:$0xff]  ;;  %v808_v45 = vld [vmem:[%s5227_s7 + $0x30] sm:$0xff]  ;;  %v809_v47 = vld [vmem:[%s5227_s7 + $0x38] sm:$0xff] }
  0x8b   : > { %4109 = vmatpush.msra.mxu3 %v911_v15  ;;  %930 = vmatpush.msra.mxu1 %v911_v15  ;;  %v5273_v48 = vld [vmem:[%s7435_s24] ss:$0 sm:$0xff] }
  0x8c   : > { %4094 = vmatpush.msra.mxu2 %v825_v16  ;;  %846 = vmatpush.msra.mxu0 %v825_v16  ;;  %v5278_v49 = vld [vmem:[%s7436_s18] ss:$0 sm:$0xff] }
  0x8d   : > { %4110 = vmatpush.msra.mxu3 %v910_v17  ;;  %931 = vmatpush.msra.mxu1 %v910_v17 }
  0x8e   : > { %4095 = vmatpush.msra.mxu2 %v824_v18  ;;  %847 = vmatpush.msra.mxu0 %v824_v18 }
  0x8f   : > { %4111 = vmatpush.msra.mxu3 %v909_v19  ;;  %932 = vmatpush.msra.mxu1 %v909_v19 }
  0x90   : > { %4096 = vmatpush.msra.mxu2 %v823_v20  ;;  %848 = vmatpush.msra.mxu0 %v823_v20 }
  0x91   : > { %4112 = vmatpush.msra.mxu3 %v908_v21  ;;  %933 = vmatpush.msra.mxu1 %v908_v21 }
  0x92   : > { %4097 = vmatpush.msra.mxu2 %v822_v22  ;;  %849 = vmatpush.msra.mxu0 %v822_v22 }
  0x93   : > { %4113 = vmatpush.msra.mxu3 %v907_v23  ;;  %934 = vmatpush.msra.mxu1 %v907_v23 }
  0x94   : > { %4098 = vmatpush.msra.mxu2 %v821_v24  ;;  %850 = vmatpush.msra.mxu0 %v821_v24 }
  0x95   : > { %4114 = vmatpush.msra.mxu3 %v906_v25  ;;  %935 = vmatpush.msra.mxu1 %v906_v25 }
  0x96   : > { %4099 = vmatpush.msra.mxu2 %v820_v26  ;;  %851 = vmatpush.msra.mxu0 %v820_v26 }
  0x97   : > { %4115 = vmatpush.msra.mxu3 %v905_v27  ;;  %936 = vmatpush.msra.mxu1 %v905_v27 }
  0x98   : > { %4100 = vmatpush.msra.mxu2 %v819_v28  ;;  %852 = vmatpush.msra.mxu0 %v819_v28 }
  0x99   : > { %4116 = vmatpush.msra.mxu3 %v904_v29  ;;  %937 = vmatpush.msra.mxu1 %v904_v29 }
  0x9a   : > { %4101 = vmatpush.msra.mxu2 %v818_v30  ;;  %853 = vmatpush.msra.mxu0 %v818_v30 }
  0x9b   : > { %4117 = vmatpush.msra.mxu3 %v903_v31  ;;  %878 = vmatmul.f32.vlgmr.msra.gmra.mxu2 %v810_v32 }
  0x9c   : > { %963 = vmatmul.f32.vlgmr.msra.gmra.mxu3 %v810_v32  ;;  %938 = vmatpush.msra.mxu1 %v903_v31 }
  0x9d   : > { %854 = vmatmul.f32.vlgmr.msra.gmra.mxu0 %v802_v33  ;;  %939 = vmatmul.f32.vlgmr.msra.gmra.mxu1 %v802_v33 }
  0xa3   : > { %881 = vmatmul.f32.gmra.mxu2 %v811_v34 }
  0xa4   : > { %966 = vmatmul.f32.gmra.mxu3 %v811_v34 }
  0xa5   : > { %857 = vmatmul.f32.gmra.mxu0 %v803_v35  ;;  %942 = vmatmul.f32.gmra.mxu1 %v803_v35 }
  0xab   : > { %884 = vmatmul.f32.gmra.mxu2 %v812_v36 }
  0xac   : > { %969 = vmatmul.f32.gmra.mxu3 %v812_v36 }
  0xad   : > { %860 = vmatmul.f32.gmra.mxu0 %v804_v37  ;;  %945 = vmatmul.f32.gmra.mxu1 %v804_v37 }
  0xb3   : > { %887 = vmatmul.f32.gmra.mxu2 %v813_v38 }
  0xb4   : > { %972 = vmatmul.f32.gmra.mxu3 %v813_v38 }
  0xb5   : > { %863 = vmatmul.f32.gmra.mxu0 %v805_v39  ;;  %948 = vmatmul.f32.gmra.mxu1 %v805_v39 }
  0xbb   : > { %890 = vmatmul.f32.gmra.mxu2 %v814_v40 }
  0xbc   : > { %975 = vmatmul.f32.gmra.mxu3 %v814_v40 }
  0xbd   : > { %866 = vmatmul.f32.gmra.mxu0 %v806_v41  ;;  %951 = vmatmul.f32.gmra.mxu1 %v806_v41 }
  0xc3   : > { %893 = vmatmul.f32.gmra.mxu2 %v815_v42 }
  0xc4   : > { %978 = vmatmul.f32.gmra.mxu3 %v815_v42 }
  0xc5   : > { %869 = vmatmul.f32.gmra.mxu0 %v807_v43  ;;  %954 = vmatmul.f32.gmra.mxu1 %v807_v43 }
  0xcb   : > { %896 = vmatmul.f32.gmra.mxu2 %v816_v44 }
  0xcc   : > { %981 = vmatmul.f32.gmra.mxu3 %v816_v44 }
  0xcd   : > { %872 = vmatmul.f32.gmra.mxu0 %v808_v45  ;;  %957 = vmatmul.f32.gmra.mxu1 %v808_v45 }
  0xd3   : > { %899 = vmatmul.f32.gmra.mxu2 %v817_v46 }
  0xd4   : > { %984 = vmatmul.f32.gmra.mxu3 %v817_v46 }
  0xd5   : > { %875 = vmatmul.f32.gmra.mxu0 %v809_v47  ;;  %960 = vmatmul.f32.gmra.mxu1 %v809_v47 }
 0x11a   : > { %v855_v50 = vpop.f32.mrf.mxu0  ;;  %v940_v51 = vpop.f32.mrf.mxu1 }
 0x11b   : > { %v856_v52 = vadd.f32 %v5273_v48, %v855_v50  ;;  %v941_v53 = vadd.f32 %v5278_v49, %v940_v51 }
 0x11d   : > { %988 = vst [vmem:[#allocation2 + $0x30] sm:$0xff] %v856_v52 }
 0x11e   : > { %v879_v54 = vpop.f32.mrf.mxu2  ;;  %1004 = vst [vmem:[#allocation3 + $0x28] sm:$0xff] %v941_v53 }
 0x11f   : > { %v964_v55 = vpop.f32.mrf.mxu3  ;;  %v880_v56 = vadd.f32 %v5273_v48, %v879_v54 }
 0x120   : > { %v965_v57 = vadd.f32 %v5278_v49, %v964_v55 }
 0x121   : > { %996 = vst [vmem:[#allocation2 + $0x40] sm:$0xff] %v880_v56 }
 0x122   : > { %1012 = vst [vmem:[#allocation3 + $0x20] sm:$0xff] %v965_v57  ;;  %v858_v58 = vpop.f32.mrf.mxu0  ;;  %v943_v59 = vpop.f32.mrf.mxu1 }
 0x123   : > { %v859_v60 = vadd.f32 %v5273_v48, %v858_v58  ;;  %v944_v61 = vadd.f32 %v5278_v49, %v943_v59 }
 0x125   : > { %989 = vst [vmem:[#allocation2] sm:$0xff] %v859_v60 }
 0x126   : > { %v882_v62 = vpop.f32.mrf.mxu2  ;;  %1005 = vst [vmem:[#allocation3 + $0x68] sm:$0xff] %v944_v61 }
 0x127   : > { %v967_v63 = vpop.f32.mrf.mxu3  ;;  %v883_v0 = vadd.f32 %v5273_v48, %v882_v62 }
 0x128   : > { %v968_v1 = vadd.f32 %v5278_v49, %v967_v63 }
 0x129   : > { %997 = vst [vmem:[#allocation2 + $0x20] sm:$0xff] %v883_v0 }
 0x12a   : > { %1013 = vst [vmem:[#allocation3 + $0x78] sm:$0xff] %v968_v1  ;;  %v861_v2 = vpop.f32.mrf.mxu0  ;;  %v946_v3 = vpop.f32.mrf.mxu1 }
 0x12b   : > { %v862_v4 = vadd.f32 %v5273_v48, %v861_v2  ;;  %v947_v5 = vadd.f32 %v5278_v49, %v946_v3 }
 0x12d   : > { %990 = vst [vmem:[#allocation2 + $0x58] sm:$0xff] %v862_v4 }
 0x12e   : > { %v885_v6 = vpop.f32.mrf.mxu2  ;;  %1006 = vst [vmem:[#allocation3 + $0x10] sm:$0xff] %v947_v5 }
 0x12f   : > { %v970_v7 = vpop.f32.mrf.mxu3  ;;  %v886_v8 = vadd.f32 %v5273_v48, %v885_v6 }
 0x130   : > { %v971_v9 = vadd.f32 %v5278_v49, %v970_v7 }
 0x131   : > { %998 = vst [vmem:[#allocation2 + $0x10] sm:$0xff] %v886_v8 }
 0x132   : > { %1014 = vst [vmem:[#allocation3 + $0x18] sm:$0xff] %v971_v9  ;;  %v864_v10 = vpop.f32.mrf.mxu0  ;;  %v949_v11 = vpop.f32.mrf.mxu1 }
 0x133   : > { %v865_v12 = vadd.f32 %v5273_v48, %v864_v10  ;;  %v950_v13 = vadd.f32 %v5278_v49, %v949_v11 }
 0x135   : > { %991 = vst [vmem:[#allocation2 + $0x18] sm:$0xff] %v865_v12 }
 0x136   : > { %v888_v14 = vpop.f32.mrf.mxu2  ;;  %1007 = vst [vmem:[#allocation3 + $0x40] sm:$0xff] %v950_v13 }
 0x137   : > { %v973_v15 = vpop.f32.mrf.mxu3  ;;  %v889_v16 = vadd.f32 %v5273_v48, %v888_v14 }
 0x138   : > { %v974_v17 = vadd.f32 %v5278_v49, %v973_v15 }
 0x139   : > { %999 = vst [vmem:[#allocation2 + $0x38] sm:$0xff] %v889_v16 }
 0x13a   : > { %1015 = vst [vmem:[#allocation3 + $0x58] sm:$0xff] %v974_v17  ;;  %v867_v18 = vpop.f32.mrf.mxu0  ;;  %v952_v19 = vpop.f32.mrf.mxu1 }
 0x13b   : > { %v868_v20 = vadd.f32 %v5273_v48, %v867_v18  ;;  %v953_v21 = vadd.f32 %v5278_v49, %v952_v19 }
 0x13d   : > { %992 = vst [vmem:[#allocation2 + $0x50] sm:$0xff] %v868_v20 }
 0x13e   : > { %v891_v22 = vpop.f32.mrf.mxu2  ;;  %1008 = vst [vmem:[#allocation3 + $0x48] sm:$0xff] %v953_v21 }
 0x13f   : > { %v976_v23 = vpop.f32.mrf.mxu3  ;;  %v892_v24 = vadd.f32 %v5273_v48, %v891_v22 }
 0x140   : > { %v977_v25 = vadd.f32 %v5278_v49, %v976_v23 }
 0x141   : > { %1000 = vst [vmem:[#allocation2 + $0x60] sm:$0xff] %v892_v24 }
 0x142   : > { %1016 = vst [vmem:[#allocation3] sm:$0xff] %v977_v25  ;;  %v870_v26 = vpop.f32.mrf.mxu0  ;;  %v955_v27 = vpop.f32.mrf.mxu1 }
 0x143   : > { %v871_v28 = vadd.f32 %v5273_v48, %v870_v26  ;;  %v956_v29 = vadd.f32 %v5278_v49, %v955_v27 }
 0x145   : > { %993 = vst [vmem:[#allocation2 + $0x68] sm:$0xff] %v871_v28 }
 0x146   : > { %v894_v30 = vpop.f32.mrf.mxu2  ;;  %1009 = vst [vmem:[#allocation3 + $0x30] sm:$0xff] %v956_v29 }
 0x147   : > { %v979_v31 = vpop.f32.mrf.mxu3  ;;  %v895_v32 = vadd.f32 %v5273_v48, %v894_v30 }
 0x148   : > { %v980_v33 = vadd.f32 %v5278_v49, %v979_v31 }
 0x149   : > { %1001 = vst [vmem:[#allocation2 + $0x70] sm:$0xff] %v895_v32 }
 0x14a   : > { %1017 = vst [vmem:[#allocation3 + $0x8] sm:$0xff] %v980_v33  ;;  %v873_v34 = vpop.f32.mrf.mxu0  ;;  %v958_v35 = vpop.f32.mrf.mxu1 }
 0x14b   : > { %v874_v36 = vadd.f32 %v5273_v48, %v873_v34  ;;  %v959_v37 = vadd.f32 %v5278_v49, %v958_v35 }
 0x14d   : > { %994 = vst [vmem:[#allocation2 + $0x8] sm:$0xff] %v874_v36 }
 0x14e   : > { %v897_v38 = vpop.f32.mrf.mxu2  ;;  %1010 = vst [vmem:[#allocation3 + $0x70] sm:$0xff] %v959_v37 }
 0x14f   : > { %v982_v39 = vpop.f32.mrf.mxu3  ;;  %v898_v40 = vadd.f32 %v5273_v48, %v897_v38 }
 0x150   : > { %v983_v41 = vadd.f32 %v5278_v49, %v982_v39 }
 0x151   : > { %1002 = vst [vmem:[#allocation2 + $0x78] sm:$0xff] %v898_v40 }
 0x152   : > { %1018 = vst [vmem:[#allocation3 + $0x60] sm:$0xff] %v983_v41  ;;  %v876_v42 = vpop.f32.mrf.mxu0  ;;  %v961_v43 = vpop.f32.mrf.mxu1 }
 0x153   : > { %v877_v44 = vadd.f32 %v5273_v48, %v876_v42  ;;  %v962_v45 = vadd.f32 %v5278_v49, %v961_v43 }
 0x155   : > { %995 = vst [vmem:[#allocation2 + $0x48] sm:$0xff] %v877_v44 }
 0x156   : > { %v900_v46 = vpop.f32.mrf.mxu2  ;;  %1011 = vst [vmem:[#allocation3 + $0x38] sm:$0xff] %v962_v45 }
 0x157   : > { %v985_v47 = vpop.f32.mrf.mxu3  ;;  %v901_v50 = vadd.f32 %v5273_v48, %v900_v46 }
 0x158   : > { %v986_v51 = vadd.f32 %v5278_v49, %v985_v47 }
 0x159   : > { %1003 = vst [vmem:[#allocation2 + $0x28] sm:$0xff] %v901_v50 }
 0x15a   : > { %1019 = vst [vmem:[#allocation3 + $0x50] sm:$0xff] %v986_v51 }
 0x15b PF: > { %v1043_v52 = vld [vmem:[#allocation9 + $0x78] sm:$0xff]  ;;  %v1042_v53 = vld [vmem:[#allocation9 + $0x70] sm:$0xff]  ;;  %v1041_v54 = vld [vmem:[#allocation9 + $0x68] sm:$0xff]  ;;  %s7437_s0 = sld [smem:[#allocation100_spill]] }
 0x15c   : > { %1048 = vmatpush.msra.mxu0 %v1043_v52  ;;  %v1040_v55 = vld [vmem:[#allocation9 + $0x60] sm:$0xff]  ;;  %v1039_v56 = vld [vmem:[#allocation9 + $0x58] sm:$0xff]  ;;  %v1038_v57 = vld [vmem:[#allocation9 + $0x50] sm:$0xff]  ;;  %s7439_s29 = sld [smem:[#allocation104_spill]] }
 0x15d   : > { %v1037_v58 = vld [vmem:[#allocation9 + $0x48] sm:$0xff]  ;;  %v1036_v59 = vld [vmem:[#allocation9 + $0x40] sm:$0xff]  ;;  %v1035_v48 = vld [vmem:[#allocation9 + $0x38] sm:$0xff]  ;;  %s7440_s26 = sld [smem:[#allocation105_spill]] }
 0x15e   : > { %1049 = vmatpush.msra.mxu0 %v1042_v53  ;;  %v1034_v49 = vld [vmem:[#allocation9 + $0x30] sm:$0xff]  ;;  %v1033_v60 = vld [vmem:[#allocation9 + $0x28] sm:$0xff]  ;;  %v1032_v61 = vld [vmem:[#allocation9 + $0x20] sm:$0xff]  ;;  %s7449_s23 = sld [smem:[#allocation109_spill]] }
 0x15f   : > { %v1031_v62 = vld [vmem:[#allocation9 + $0x18] sm:$0xff]  ;;  %v1030_v63 = vld [vmem:[#allocation9 + $0x10] sm:$0xff]  ;;  %v1029_v0 = vld [vmem:[#allocation9 + $0x8] sm:$0xff]  ;;  %s7625_s17 = sld [smem:[#allocation111_spill]] }
 0x160   : > { %1050 = vmatpush.msra.mxu0 %v1041_v54  ;;  %v1028_v1 = vld [vmem:[#allocation9] sm:$0xff]  ;;  %v5317_v3 = vld [vmem:[%s5219_s16 + $0x8] sm:$0xff]  ;;  %v5321_v4 = vld [vmem:[%s5219_s16 + $0x10] sm:$0xff]  ;;  %s7649_s8 = sld [smem:[#allocation106_spill]] }
 0x161   : > { %v5313_v2 = vld [vmem:[%s5219_s16] sm:$0xff]  ;;  %v5325_v5 = vld [vmem:[%s5219_s16 + $0x18] sm:$0xff]  ;;  %v1112_v6 = vld [vmem:[#allocation2 + $0x28] sm:$0xff]  ;;  %s7650_s19 = sld [smem:[#allocation107_spill]] }
 0x162   : > { %1051 = vmatpush.msra.mxu0 %v1040_v55  ;;  %1113 = vmatpush.xpose.msra.mxu1 %v1112_v6  ;;  %v1111_v7 = vld [vmem:[#allocation2 + $0x78] sm:$0xff]  ;;  %v5329_v8 = vld [vmem:[%s5219_s16 + $0x20] sm:$0xff]  ;;  %v1110_v9 = vld [vmem:[#allocation2 + $0x70] sm:$0xff]  ;;  %s7651_s9 = sld [smem:[#allocation29_spill]] }
 0x163   : > { %v1109_v10 = vld [vmem:[#allocation2 + $0x60] sm:$0xff]  ;;  %v5333_v11 = vld [vmem:[%s5219_s16 + $0x28] sm:$0xff]  ;;  %v1108_v12 = vld [vmem:[#allocation2 + $0x38] sm:$0xff] }
 0x164   : > { %1052 = vmatpush.msra.mxu0 %v1039_v56  ;;  %v1107_v13 = vld [vmem:[#allocation2 + $0x10] sm:$0xff]  ;;  %v1106_v15 = vld [vmem:[#allocation2 + $0x20] sm:$0xff]  ;;  %v5341_v17 = vld [vmem:[%s5219_s16 + $0x38] sm:$0xff] }
 0x165   : > { %v5337_v14 = vld [vmem:[%s5219_s16 + $0x30] sm:$0xff]  ;;  %v1105_v16 = vld [vmem:[#allocation2 + $0x40] sm:$0xff]  ;;  %v1104_v18 = vld [vmem:[#allocation2 + $0x48] sm:$0xff]  ;;  %s7438_s16 = sld [smem:[#allocation103_spill]] }
 0x166   : > { %1053 = vmatpush.msra.mxu0 %v1038_v57  ;;  %1114 = vmatpush.xpose.msra.mxu1 %v1111_v7  ;;  %v1103_v19 = vld [vmem:[#allocation2 + $0x8] sm:$0xff]  ;;  %v1101_v21 = vld [vmem:[#allocation2 + $0x50] sm:$0xff]  ;;  %v1100_v22 = vld [vmem:[#allocation2 + $0x18] sm:$0xff] }
 0x167   : > { %v1102_v20 = vld [vmem:[#allocation2 + $0x68] sm:$0xff]  ;;  %v1099_v23 = vld [vmem:[#allocation2 + $0x58] sm:$0xff]  ;;  %v1098_v24 = vld [vmem:[#allocation2] sm:$0xff] }
 0x168   : > { %1054 = vmatpush.msra.mxu0 %v1037_v58  ;;  %v1097_v25 = vld [vmem:[#allocation2 + $0x30] sm:$0xff]  ;;  %v4347_v26 = vld [vmem:[%s7437_s0] ss:$0 sm:$0xff]  ;;  %s4078_s14 = sshll.u32 %s7651_s9, 4 }
 0x169   : > { %v1337_v57 = vld [vmem:[#allocation3 + $0x50] sm:$0xff]  ;;  %v1336_v58 = vld [vmem:[#allocation3 + $0x60] sm:$0xff] }
 0x16a   : > { %1055 = vmatpush.msra.mxu0 %v1036_v59  ;;  %1115 = vmatpush.xpose.msra.mxu1 %v1110_v9  ;;  %v1335_v59 = vld [vmem:[#allocation3 + $0x8] sm:$0xff]  ;;  %v1328_v6 = vld [vmem:[#allocation3 + $0x70] sm:$0xff] }
 0x16b   : > { %1338 = vmatpush.msra.mxu2 %v1337_v57 }
 0x16c   : > { %1056 = vmatpush.msra.mxu0 %v1035_v48  ;;  %v1334_v48 = vld [vmem:[#allocation3] sm:$0xff] }
 0x16d   : > { %1339 = vmatpush.msra.mxu2 %v1336_v58 }
 0x16e   : > { %1057 = vmatpush.msra.mxu0 %v1034_v49  ;;  %1116 = vmatpush.xpose.msra.mxu1 %v1109_v10  ;;  %v1333_v49 = vld [vmem:[#allocation3 + $0x58] sm:$0xff]  ;;  %v1327_v10 = vld [vmem:[#allocation3 + $0x30] sm:$0xff] }
 0x16f   : > { %1340 = vmatpush.msra.mxu2 %v1335_v59  ;;  %v1396_v59 = vld [vmem:[#allocation13 + $0x48] sm:$0xff] }
 0x170   : > { %1058 = vmatpush.msra.mxu0 %v1033_v60 }
 0x171   : > { %1341 = vmatpush.msra.mxu2 %v1334_v48  ;;  %v1395_v48 = vld [vmem:[#allocation13 + $0x40] sm:$0xff] }
 0x172   : > { %1059 = vmatpush.msra.mxu0 %v1032_v61  ;;  %1117 = vmatpush.xpose.msra.mxu1 %v1108_v12  ;;  %v1332_v61 = vld [vmem:[#allocation3 + $0x18] sm:$0xff]  ;;  %v1326_v12 = vld [vmem:[#allocation3 + $0x48] sm:$0xff] }
 0x173   : > { %1342 = vmatpush.msra.mxu2 %v1333_v49  ;;  %v1394_v49 = vld [vmem:[#allocation13 + $0x38] sm:$0xff] }
 0x174   : > { %1060 = vmatpush.msra.mxu0 %v1031_v62  ;;  %v1331_v62 = vld [vmem:[#allocation3 + $0x78] sm:$0xff] }
 0x175   : > { %1343 = vmatpush.msra.mxu2 %v1332_v61  ;;  %v1392_v61 = vld [vmem:[#allocation13 + $0x28] sm:$0xff] }
 0x176   : > { %1061 = vmatpush.msra.mxu0 %v1030_v63  ;;  %1118 = vmatpush.xpose.msra.mxu1 %v1107_v13  ;;  %v1330_v63 = vld [vmem:[#allocation3 + $0x20] sm:$0xff] }
 0x177   : > { %1344 = vmatpush.msra.mxu2 %v1331_v62  ;;  %v1325_v13 = vld [vmem:[#allocation3 + $0x40] sm:$0xff] }
 0x178   : > { %1062 = vmatpush.msra.mxu0 %v1029_v0  ;;  %v1329_v0 = vld [vmem:[#allocation3 + $0x38] sm:$0xff]  ;;  %v1391_v62 = vld [vmem:[#allocation13 + $0x20] sm:$0xff] }
 0x179   : > { %1345 = vmatpush.msra.mxu2 %v1330_v63  ;;  %v1390_v63 = vld [vmem:[#allocation13 + $0x18] sm:$0xff] }
 0x17a   : > { %1063 = vmatpush.msra.mxu0 %v1028_v1  ;;  %1119 = vmatpush.xpose.msra.mxu1 %v1106_v15  ;;  %v1324_v15 = vld [vmem:[#allocation3 + $0x10] sm:$0xff] }
 0x17b   : > { %1064 = vmatmul.f32.vlgmr.msra.gmra.mxu0 %v5313_v2  ;;  %1346 = vmatpush.msra.mxu2 %v1329_v0  ;;  %v1389_v0 = vld [vmem:[#allocation13 + $0x10] sm:$0xff] }
 0x17d   : > { %1347 = vmatpush.msra.mxu2 %v1328_v6  ;;  %v1387_v6 = vld [vmem:[#allocation13] sm:$0xff] }
 0x17e   : > { %1120 = vmatpush.xpose.msra.mxu1 %v1105_v16  ;;  %v1323_v16 = vld [vmem:[#allocation3 + $0x68] sm:$0xff] }
 0x17f   : > { %1348 = vmatpush.msra.mxu2 %v1327_v10 }
 0x181   : > { %1349 = vmatpush.msra.mxu2 %v1326_v12 }
 0x182   : > { %1121 = vmatpush.xpose.msra.mxu1 %v1104_v18  ;;  %v1322_v18 = vld [vmem:[#allocation3 + $0x28] sm:$0xff] }
 0x183   : > { %1067 = vmatmul.f32.gmra.mxu0 %v5317_v3  ;;  %1350 = vmatpush.msra.mxu2 %v1325_v13 }
 0x185   : > { %1351 = vmatpush.msra.mxu2 %v1324_v15 }
 0x186   : > { %1122 = vmatpush.xpose.msra.mxu1 %v1103_v19 }
 0x187   : > { %1352 = vmatpush.msra.mxu2 %v1323_v16 }
 0x189   : > { %1353 = vmatpush.msra.mxu2 %v1322_v18 }
 0x18a   : > { %1123 = vmatpush.xpose.msra.mxu1 %v1102_v20 }
 0x18b   : > { %1070 = vmatmul.f32.gmra.mxu0 %v5321_v4 }
 0x18e   : > { %1124 = vmatpush.xpose.msra.mxu1 %v1101_v21 }
 0x192   : > { %1125 = vmatpush.xpose.msra.mxu1 %v1100_v22 }
 0x193   : > { %1073 = vmatmul.f32.gmra.mxu0 %v5325_v5 }
 0x196   : > { %1126 = vmatpush.xpose.msra.mxu1 %v1099_v23 }
 0x19a   : > { %1127 = vmatpush.xpose.msra.mxu1 %v1098_v24 }
 0x19b   : > { %1076 = vmatmul.f32.gmra.mxu0 %v5329_v8 }
 0x19e   : > { %1128 = vmatpush.xpose.msra.mxu1 %v1097_v25 }
 0x1a3   : > { %1079 = vmatmul.f32.gmra.mxu0 %v5333_v11 }
 0x1ab   : > { %1082 = vmatmul.f32.gmra.mxu0 %v5337_v14 }
 0x1b3   : > { %1085 = vmatmul.f32.gmra.mxu0 %v5341_v17 }
 0x1f8   : > { %v1065_v27 = vpop.f32.mrf.mxu0 }
 0x1f9   : > { %v1066_v28 = vadd.f32 %v4347_v26, %v1065_v27 }
 0x1fb   : > { %v1089_v29 = vmul.f32 0.088388346, %v1066_v28 }
 0x1fd   : > { %1129 = vmatmul.f32.vlgmr.msra.gmra.mxu1 %v1089_v29 }
 0x200   : > { %v1068_v30 = vpop.f32.mrf.mxu0 }
 0x201   : > { %v1069_v31 = vadd.f32 %v4347_v26, %v1068_v30 }
 0x203   : > { %v1090_v32 = vmul.f32 0.088388346, %v1069_v31 }
 0x205   : > { %1132 = vmatmul.f32.gmra.mxu1 %v1090_v32 }
 0x208   : > { %v1071_v33 = vpop.f32.mrf.mxu0 }
 0x209   : > { %v1072_v34 = vadd.f32 %v4347_v26, %v1071_v33 }
 0x20b   : > { %v1091_v35 = vmul.f32 0.088388346, %v1072_v34 }
 0x20d   : > { %1135 = vmatmul.f32.gmra.mxu1 %v1091_v35 }
 0x210   : > { %v1074_v36 = vpop.f32.mrf.mxu0 }
 0x211   : > { %v1075_v37 = vadd.f32 %v4347_v26, %v1074_v36 }
 0x213   : > { %v1092_v38 = vmul.f32 0.088388346, %v1075_v37 }
 0x215   : > { %1138 = vmatmul.f32.gmra.mxu1 %v1092_v38  ;;  %v1402_v38 = vld [vmem:[#allocation13 + $0x78] sm:$0xff] }
 0x216   : > { %1407 = vmatpush.msra.mxu3 %v1402_v38 }
 0x218   : > { %v1077_v39 = vpop.f32.mrf.mxu0 }
 0x219   : > { %v1078_v40 = vadd.f32 %v4347_v26, %v1077_v39  ;;  %v1401_v39 = vld [vmem:[#allocation13 + $0x70] sm:$0xff] }
 0x21a   : > { %1408 = vmatpush.msra.mxu3 %v1401_v39 }
 0x21b   : > { %v1093_v41 = vmul.f32 0.088388346, %v1078_v40  ;;  %v1400_v40 = vld [vmem:[#allocation13 + $0x68] sm:$0xff] }
 0x21c   : > { %1409 = vmatpush.msra.mxu3 %v1400_v40 }
 0x21d   : > { %1141 = vmatmul.f32.gmra.mxu1 %v1093_v41 }
 0x220   : > { %v1080_v42 = vpop.f32.mrf.mxu0 }
 0x221   : > { %v1081_v43 = vadd.f32 %v4347_v26, %v1080_v42  ;;  %v1399_v42 = vld [vmem:[#allocation13 + $0x60] sm:$0xff] }
 0x222   : > { %1410 = vmatpush.msra.mxu3 %v1399_v42 }
 0x223   : > { %v1094_v44 = vmul.f32 0.088388346, %v1081_v43 }
 0x225   : > { %1144 = vmatmul.f32.gmra.mxu1 %v1094_v44  ;;  %v1398_v44 = vld [vmem:[#allocation13 + $0x58] sm:$0xff] }
 0x226   : > { %1411 = vmatpush.msra.mxu3 %v1398_v44 }
 0x228   : > { %v1083_v45 = vpop.f32.mrf.mxu0 }
 0x229   : > { %v1084_v46 = vadd.f32 %v4347_v26, %v1083_v45 }
 0x22b   : > { %v1095_v47 = vmul.f32 0.088388346, %v1084_v46 }
 0x22d   : > { %1147 = vmatmul.f32.gmra.mxu1 %v1095_v47  ;;  %v1397_v47 = vld [vmem:[#allocation13 + $0x50] sm:$0xff] }
 0x22e   : > { %1412 = vmatpush.msra.mxu3 %v1397_v47 }
 0x230   : > { %v1086_v50 = vpop.f32.mrf.mxu0  ;;  %1413 = vmatpush.msra.mxu3 %v1396_v59 }
 0x231   : > { %v1087_v51 = vadd.f32 %v4347_v26, %v1086_v50 }
 0x232   : > { %1414 = vmatpush.msra.mxu3 %v1395_v48 }
 0x233   : > { %v1096_v52 = vmul.f32 0.088388346, %v1087_v51 }
 0x234   : > { %1415 = vmatpush.msra.mxu3 %v1394_v49 }
 0x235   : > { %1150 = vmatmul.f32.gmra.mxu1 %v1096_v52 }
 0x27a   : > { %v1130_v53 = vpop.f32.mrf.mxu1 }
 0x27b   : > { %1154 = vmax.xlane.f32.xlu0 %v1130_v53 }
 0x282   : > { %v1133_v54 = vpop.f32.mrf.mxu1 }
 0x283   : > { %1156 = vmax.xlane.f32.xlu0 %v1133_v54 }
 0x28a   : > { %v1136_v55 = vpop.f32.mrf.mxu1 }
 0x28b   : > { %1158 = vmax.xlane.f32.xlu1 %v1136_v55 }
 0x292   : > { %v5347_v56 = vpop.f32.mrf.mxu1 }
 0x293   : > { %1160 = vmax.xlane.f32.xlu1 %v5347_v56 }
 0x29a   : > { %v1142_v60 = vpop.f32.mrf.mxu1 }
 0x29b   : > { %1162 = vmax.xlane.f32.xlu2 %v1142_v60 }
 0x2a2   : > { %v5350_v1 = vpop.f32.mrf.mxu1 }
 0x2a3   : > { %1164 = vmax.xlane.f32.xlu2 %v5350_v1 }
 0x2aa   : > { %v5353_v7 = vpop.f32.mrf.mxu1 }
 0x2ab   : > { %1166 = vmax.xlane.f32.xlu0 %v5353_v7 }
 0x2b2   : > { %v5356_v9 = vpop.f32.mrf.mxu1 }
 0x2b3   : > { %1168 = vmax.xlane.f32.xlu1 %v5356_v9 }
 0x2ee   : > { %v1155_v19 = vpop.xlane.xlu0 %1154 }
 0x2ef   : > { %v1170_v20 = vsub.f32 %v1130_v53, %v1155_v19 }
 0x2f1   : > { %v1178_v21 = vmul.f32 1.442695, %v1170_v20 }
 0x2f3   : > { %4354 = vpow2.f32 %v1178_v21 }
 0x2f6   : > { %v1157_v22 = vpop.xlane.xlu0 %1156 }
 0x2f7   : > { %v1171_v23 = vsub.f32 %v1133_v54, %v1157_v22 }
 0x2f9   : > { %v5359_v24 = vpop.eup %4354  ;;  %v1180_v25 = vmul.f32 1.442695, %v1171_v23 }
 0x2fa   : > { %1354 = vmatmul.f32.vlgmr.msra.gmra.mxu2 %v5359_v24  ;;  %1194 = vadd.xlane.f32.xlu2 %v5359_v24 }
 0x2fb   : > { %4356 = vpow2.f32 %v1180_v25 }
 0x2fe   : > { %v1159_v26 = vpop.xlane.xlu1 %1158 }
 0x2ff   : > { %v1172_v27 = vsub.f32 %v1136_v55, %v1159_v26 }
 0x301   : > { %v5363_v28 = vpop.eup %4356  ;;  %v1182_v29 = vmul.f32 1.442695, %v1172_v27 }
 0x302   : > { %1357 = vmatmul.f32.gmra.mxu2 %v5363_v28  ;;  %1196 = vadd.xlane.f32.xlu0 %v5363_v28 }
 0x303   : > { %4358 = vpow2.f32 %v1182_v29 }
 0x306   : > { %v1161_v30 = vpop.xlane.xlu1 %1160 }
 0x307   : > { %v1173_v31 = vsub.f32 %v5347_v56, %v1161_v30 }
 0x309   : > { %v5368_v32 = vpop.eup %4358  ;;  %v1184_v33 = vmul.f32 1.442695, %v1173_v31 }
 0x30a   : > { %1360 = vmatmul.f32.gmra.mxu2 %v5368_v32  ;;  %1198 = vadd.xlane.f32.xlu1 %v5368_v32 }
 0x30b   : > { %4360 = vpow2.f32 %v1184_v33 }
 0x30e   : > { %v1163_v34 = vpop.xlane.xlu2 %1162 }
 0x30f   : > { %v1174_v35 = vsub.f32 %v1142_v60, %v1163_v34  ;;  %v1393_v60 = vld [vmem:[#allocation13 + $0x30] sm:$0xff] }
 0x310   : > { %1416 = vmatpush.msra.mxu3 %v1393_v60 }
 0x311   : > { %v5372_v36 = vpop.eup %4360  ;;  %v1186_v37 = vmul.f32 1.442695, %v1174_v35 }
 0x312   : > { %1363 = vmatmul.f32.gmra.mxu2 %v5372_v36  ;;  %1200 = vadd.xlane.f32.xlu2 %v5372_v36 }
 0x313   : > { %4362 = vpow2.f32 %v1186_v37  ;;  %1417 = vmatpush.msra.mxu3 %v1392_v61 }
 0x315   : > { %1418 = vmatpush.msra.mxu3 %v1391_v62 }
 0x316   : > { %v1165_v41 = vpop.xlane.xlu2 %1164 }
 0x317   : > { %v1175_v43 = vsub.f32 %v5350_v1, %v1165_v41  ;;  %1419 = vmatpush.msra.mxu3 %v1390_v63  ;;  %v1388_v1 = vld [vmem:[#allocation13 + $0x8] sm:$0xff] }
 0x319   : > { %v5377_v45 = vpop.eup %4362  ;;  %v1188_v46 = vmul.f32 1.442695, %v1175_v43  ;;  %1420 = vmatpush.msra.mxu3 %v1389_v0 }
 0x31a   : > { %1366 = vmatmul.f32.gmra.mxu2 %v5377_v45  ;;  %1202 = vadd.xlane.f32.xlu0 %v5377_v45 }
 0x31b   : > { %4364 = vpow2.f32 %v1188_v46  ;;  %1421 = vmatpush.msra.mxu3 %v1388_v1 }
 0x31d   : > { %1422 = vmatpush.msra.mxu3 %v1387_v6 }
 0x31e   : > { %v1167_v50 = vpop.xlane.xlu0 %1166 }
 0x31f   : > { %v1176_v51 = vsub.f32 %v5353_v7, %v1167_v50 }
 0x321   : > { %v5382_v52 = vpop.eup %4364  ;;  %v1190_v53 = vmul.f32 1.442695, %v1176_v51 }
 0x322   : > { %1369 = vmatmul.f32.gmra.mxu2 %v5382_v52  ;;  %1204 = vadd.xlane.f32.xlu1 %v5382_v52 }
 0x323   : > { %4366 = vpow2.f32 %v1190_v53 }
 0x326   : > { %v1169_v54 = vpop.xlane.xlu1 %1168 }
 0x327   : > { %v1177_v55 = vsub.f32 %v5356_v9, %v1169_v54 }
 0x329   : > { %v5387_v56 = vpop.eup %4366  ;;  %v1192_v57 = vmul.f32 1.442695, %v1177_v55 }
 0x32a   : > { %1206 = vadd.xlane.f32.xlu2 %v5387_v56  ;;  %1372 = vmatmul.f32.gmra.mxu2 %v5387_v56 }
 0x32b   : > { %4368 = vpow2.f32 %v1192_v57 }
 0x331   : > { %v5391_v58 = vpop.eup %4368 }
 0x332   : > { %1208 = vadd.xlane.f32.xlu0 %v5391_v58  ;;  %1375 = vmatmul.f32.gmra.mxu2 %v5391_v58 }
 0x36d   : > { %v1195_v7 = vpop.xlane.xlu2 %1194 }
 0x36e   : > { %4370 = vrcp.f32 %v1195_v7  ;;  %v1221_v15 = vand.u32 2147483648, %v1195_v7  ;;  %v1219_v18 = vand.u32 2147483647, %v1195_v7  ;;  %vm1215_vm1 = vweird.f32 %v1195_v7 }
 0x370   : > { %v1222_v21 = vor.u32 1.1754944e-38, %v1221_v15  ;;  %vm1220_vm3 = vcmp.eq.f32.partialorder %v1219_v18, 8.507059e+37 }
 0x374   : > { %v4371_v9 = vpop.eup %4370 }
 0x375   : > { %v1211_v10 = vmul.f32 %v4371_v9, %v1195_v7  ;;  %v1197_v12 = vpop.xlane.xlu0 %1196  ;;  %vm1216_vm0 = vweird.f32 %v4371_v9 }
 0x376   : > { %4372 = vrcp.f32 %v1197_v12  ;;  %vm1217_vm2 = vmor %vm1215_vm1, %vm1216_vm0  ;;  %v1235_v33 = vand.u32 2147483648, %v1197_v12  ;;  %v1233_v35 = vand.u32 2147483647, %v1197_v12  ;;  %vm1229_vm5 = vweird.f32 %v1197_v12 }
 0x377   : > { %v1212_v13 = vsub.f32 1.0, %v1211_v10 }
 0x378   : > { %v1236_v39 = vor.u32 1.1754944e-38, %v1235_v33  ;;  %vm1234_vm7 = vcmp.eq.f32.partialorder %v1233_v35, 8.507059e+37 }
 0x379   : > { %v1213_v16 = vmul.f32 %v4371_v9, %v1212_v13 }
 0x37b   : > { %v1214_v19 = vadd.f32 %v4371_v9, %v1213_v16 }
 0x37c   : > { %v4373_v20 = vpop.eup %4372 }
 0x37d   : > { %v1225_v22 = vmul.f32 %v4373_v20, %v1197_v12  ;;  %v1355_v23 = vpop.f32.mrf.mxu2  ;;  %v1199_v25 = vpop.xlane.xlu1 %1198  ;;  %v1218_v26 = vsel %vm1217_vm2, %v4371_v9, %v1214_v19  ;;  %vm1230_vm4 = vweird.f32 %v4373_v20 }
 0x37e   : > { %4374 = vrcp.f32 %v1199_v25  ;;  %v1223_v27 = vsel %vm1220_vm3, %v1222_v21, %v1218_v26  ;;  %vm1231_vm6 = vmor %vm1229_vm5, %vm1230_vm4  ;;  %v1249_v50 = vand.u32 2147483648, %v1199_v25  ;;  %v1247_v53 = vand.u32 2147483647, %v1199_v25 }
 0x37f   : > { %v1226_v29 = vsub.f32 1.0, %v1225_v22  ;;  %v1379_v30 = vmul.f32 %v1355_v23, %v1223_v27  ;;  %v3750_v31 = vmul.f32 %v5359_v24, %v1223_v27  ;;  %vm1243_vm9 = vweird.f32 %v1199_v25 }
 0x380   : > { %v1250_v57 = vor.u32 1.1754944e-38, %v1249_v50  ;;  %vm1248_vm11 = vcmp.eq.f32.partialorder %v1247_v53, 8.507059e+37 }
 0x381   : > { %1423 = vmatmul.f32.vlgmr.msra.gmra.mxu3 %v1379_v30  ;;  %3758 = vst [vmem:[%s5251_s5] sm:$0xff] %v3750_v31  ;;  %v1227_v34 = vmul.f32 %v4373_v20, %v1226_v29 }
 0x383   : > { %v1228_v37 = vadd.f32 %v4373_v20, %v1227_v34 }
 0x384   : > { %v4375_v38 = vpop.eup %4374 }
 0x385   : > { %v1239_v40 = vmul.f32 %v4375_v38, %v1199_v25  ;;  %v1232_v41 = vsel %vm1231_vm6, %v4373_v20, %v1228_v37  ;;  %v1358_v42 = vpop.f32.mrf.mxu2  ;;  %v1201_v43 = vpop.xlane.xlu2 %1200  ;;  %vm1244_vm8 = vweird.f32 %v4375_v38 }
 0x386   : > { %v1237_v44 = vsel %vm1234_vm7, %v1236_v39, %v1232_v41  ;;  %4376 = vrcp.f32 %v1201_v43  ;;  %vm1245_vm10 = vmor %vm1243_vm9, %vm1244_vm8  ;;  %v1263_v0 = vand.u32 2147483648, %v1201_v43  ;;  %v1261_v6 = vand.u32 2147483647, %v1201_v43 }
 0x387   : > { %v1240_v24 = vsub.f32 1.0, %v1239_v40  ;;  %v1380_v46 = vmul.f32 %v1358_v42, %v1237_v44  ;;  %v3751_v47 = vmul.f32 %v5363_v28, %v1237_v44  ;;  %vm1257_vm13 = vweird.f32 %v1201_v43 }
 0x388   : > { %v1264_v10 = vor.u32 1.1754944e-38, %v1263_v0  ;;  %vm1262_vm15 = vcmp.eq.f32.partialorder %v1261_v6, 8.507059e+37 }
 0x389   : > { %3759 = vst [vmem:[%s5251_s5 + $0x8] sm:$0xff] %v3751_v47  ;;  %1426 = vmatmul.f32.gmra.mxu3 %v1380_v46  ;;  %v1241_v51 = vmul.f32 %v4375_v38, %v1240_v24 }
 0x38b   : > { %v1242_v54 = vadd.f32 %v4375_v38, %v1241_v51 }
 0x38c   : > { %v4377_v55 = vpop.eup %4376 }
 0x38d   : > { %v1253_v59 = vmul.f32 %v4377_v55, %v1201_v43  ;;  %v1246_v48 = vsel %vm1245_vm10, %v4375_v38, %v1242_v54  ;;  %v1361_v49 = vpop.f32.mrf.mxu2  ;;  %v1203_v60 = vpop.xlane.xlu0 %1202  ;;  %vm1258_vm12 = vweird.f32 %v4377_v55 }
 0x38e   : > { %v1251_v61 = vsel %vm1248_vm11, %v1250_v57, %v1246_v48  ;;  %4378 = vrcp.f32 %v1203_v60  ;;  %vm1259_vm14 = vmor %vm1257_vm13, %vm1258_vm12  ;;  %v1277_v21 = vand.u32 2147483648, %v1203_v60  ;;  %v1275_v23 = vand.u32 2147483647, %v1203_v60 }
 0x38f   : > { %v1254_v28 = vsub.f32 1.0, %v1253_v59  ;;  %v1381_v62 = vmul.f32 %v1361_v49, %v1251_v61  ;;  %v3752_v63 = vmul.f32 %v5368_v32, %v1251_v61  ;;  %vm1271_vm1 = vweird.f32 %v1203_v60 }
 0x390   : > { %v1278_v27 = vor.u32 1.1754944e-38, %v1277_v21  ;;  %vm1276_vm3 = vcmp.eq.f32.partialorder %v1275_v23, 8.507059e+37 }
 0x391   : > { %3760 = vst [vmem:[%s5251_s5 + $0x10] sm:$0xff] %v3752_v63  ;;  %1429 = vmatmul.f32.gmra.mxu3 %v1381_v62  ;;  %v1255_v1 = vmul.f32 %v4377_v55, %v1254_v28 }
 0x393   : > { %v1256_v7 = vadd.f32 %v4377_v55, %v1255_v1 }
 0x394   : > { %v4379_v9 = vpop.eup %4378 }
 0x395   : > { %v1267_v12 = vmul.f32 %v4379_v9, %v1203_v60  ;;  %v1260_v13 = vsel %vm1259_vm14, %v4377_v55, %v1256_v7  ;;  %v1364_v15 = vpop.f32.mrf.mxu2  ;;  %v1205_v16 = vpop.xlane.xlu1 %1204  ;;  %vm1272_vm0 = vweird.f32 %v4379_v9 }
 0x396   : > { %v1265_v18 = vsel %vm1262_vm15, %v1264_v10, %v1260_v13  ;;  %4380 = vrcp.f32 %v1205_v16  ;;  %vm1273_vm2 = vmor %vm1271_vm1, %vm1272_vm0  ;;  %v1291_v38 = vand.u32 2147483648, %v1205_v16  ;;  %v1289_v40 = vand.u32 2147483647, %v1205_v16 }
 0x397   : > { %v1268_v32 = vsub.f32 1.0, %v1267_v12  ;;  %v1382_v19 = vmul.f32 %v1364_v15, %v1265_v18  ;;  %v3753_v20 = vmul.f32 %v5372_v36, %v1265_v18  ;;  %vm1285_vm5 = vweird.f32 %v1205_v16 }
 0x398   : > { %v1292_v43 = vor.u32 1.1754944e-38, %v1291_v38  ;;  %vm1290_vm7 = vcmp.eq.f32.partialorder %v1289_v40, 8.507059e+37  ;;  %v1714_v38 = vld [vmem:[#allocation15 + $0x1d0] sm:$0xff] }
 0x399   : > { %3761 = vst [vmem:[%s5251_s5 + $0x18] sm:$0xff] %v3753_v20  ;;  %1432 = vmatmul.f32.gmra.mxu3 %v1382_v19  ;;  %v1269_v22 = vmul.f32 %v4379_v9, %v1268_v32 }
 0x39b   : > { %v1270_v25 = vadd.f32 %v4379_v9, %v1269_v22 }
 0x39c   : > { %v4381_v26 = vpop.eup %4380 }
 0x39d   : > { %v1281_v29 = vmul.f32 %v4381_v26, %v1205_v16  ;;  %v1274_v30 = vsel %vm1273_vm2, %v4379_v9, %v1270_v25  ;;  %v1367_v31 = vpop.f32.mrf.mxu2  ;;  %v1207_v33 = vpop.xlane.xlu2 %1206  ;;  %vm1286_vm4 = vweird.f32 %v4381_v26 }
 0x39e   : > { %v1279_v34 = vsel %vm1276_vm3, %v1278_v27, %v1274_v30  ;;  %4382 = vrcp.f32 %v1207_v33  ;;  %vm1287_vm6 = vmor %vm1285_vm5, %vm1286_vm4  ;;  %v1305_v54 = vand.u32 2147483648, %v1207_v33  ;;  %v1303_v57 = vand.u32 2147483647, %v1207_v33 }
 0x39f   : > { %v1282_v36 = vsub.f32 1.0, %v1281_v29  ;;  %v1383_v35 = vmul.f32 %v1367_v31, %v1279_v34  ;;  %v3754_v37 = vmul.f32 %v5377_v45, %v1279_v34  ;;  %vm1299_vm9 = vweird.f32 %v1207_v33  ;;  %v1718_v34 = vld [vmem:[#allocation15 + $0x1f0] sm:$0xff] }
 0x3a0   : > { %v1306_v49 = vor.u32 1.1754944e-38, %v1305_v54  ;;  %vm1304_vm11 = vcmp.eq.f32.partialorder %v1303_v57, 8.507059e+37  ;;  %1812 = vmatpush.msrb.mxu3 %v1718_v34  ;;  %v1697_v54 = vld [vmem:[#allocation15 + $0x148] sm:$0xff]  ;;  %v1674_v34 = vld [vmem:[#allocation15 + $0x90] sm:$0xff] }
 0x3a1   : > { %3762 = vst [vmem:[%s5251_s5 + $0x20] sm:$0xff] %v3754_v37  ;;  %1435 = vmatmul.f32.gmra.mxu3 %v1383_v35  ;;  %v1283_v39 = vmul.f32 %v4381_v26, %v1282_v36  ;;  %v1716_v36 = vld [vmem:[#allocation15 + $0x1e0] sm:$0xff]  ;;  %v1713_v37 = vld [vmem:[#allocation15 + $0x1c8] sm:$0xff] }
 0x3a2   : > { %1730 = vmatpush.msrb.mxu0 %v1716_v36  ;;  %1813 = vmatpush.msrb.mxu3 %v1714_v38  ;;  %v1672_v36 = vld [vmem:[#allocation15 + $0x80] sm:$0xff]  ;;  %v1670_v38 = vld [vmem:[#allocation15 + $0x70] sm:$0xff] }
 0x3a3   : > { %v1284_v41 = vadd.f32 %v4381_v26, %v1283_v39  ;;  %v1712_v39 = vld [vmem:[#allocation15 + $0x1c0] sm:$0xff] }
 0x3a4   : > { %v4383_v42 = vpop.eup %4382  ;;  %1731 = vmatpush.msrb.mxu0 %v1712_v39  ;;  %v1668_v39 = vld [vmem:[#allocation15 + $0x60] sm:$0xff] }
 0x3a5   : > { %v1295_v44 = vmul.f32 %v4383_v42, %v1207_v33  ;;  %v1288_v24 = vsel %vm1287_vm6, %v4381_v26, %v1284_v41  ;;  %v1370_v46 = vpop.f32.mrf.mxu2  ;;  %v1209_v47 = vpop.xlane.xlu0 %1208  ;;  %vm1300_vm8 = vweird.f32 %v4383_v42  ;;  %v1710_v41 = vld [vmem:[#allocation15 + $0x1b0] sm:$0xff] }
 0x3a6   : > { %v1293_v50 = vsel %vm1290_vm7, %v1292_v43, %v1288_v24  ;;  %4384 = vrcp.f32 %v1209_v47  ;;  %vm1301_vm10 = vmor %vm1299_vm9, %vm1300_vm8  ;;  %v1319_v1 = vand.u32 2147483648, %v1209_v47  ;;  %v1317_v7 = vand.u32 2147483647, %v1209_v47  ;;  %v1719_v43 = vld [vmem:[#allocation15 + $0x1f8] sm:$0xff]  ;;  %v1705_v24 = vld [vmem:[#allocation15 + $0x188] sm:$0xff]  ;;  %1814 = vmatpush.msrb.mxu3 %v1710_v41 }
 0x3a7   : > { %v1296_v45 = vsub.f32 1.0, %v1295_v44  ;;  %v1384_v51 = vmul.f32 %v1370_v46, %v1293_v50  ;;  %v3755_v53 = vmul.f32 %v5382_v52, %v1293_v50  ;;  %vm1313_vm13 = vweird.f32 %v1209_v47  ;;  %v1706_v46 = vld [vmem:[#allocation15 + $0x190] sm:$0xff]  ;;  %1853 = vmatpush.msrb.mxu1 %v1719_v43  ;;  %v1667_v43 = vld [vmem:[#allocation15 + $0x58] sm:$0xff] }
 0x3a8   : > { %v1320_v10 = vor.u32 1.1754944e-38, %v1319_v1  ;;  %vm1318_vm15 = vcmp.eq.f32.partialorder %v1317_v7, 8.507059e+37  ;;  %1815 = vmatpush.msrb.mxu3 %v1706_v46  ;;  %v1666_v41 = vld [vmem:[#allocation15 + $0x50] sm:$0xff] }
 0x3a9   : > { %3763 = vst [vmem:[%s5251_s5 + $0x28] sm:$0xff] %v3755_v53  ;;  %1438 = vmatmul.f32.gmra.mxu3 %v1384_v51  ;;  %v1297_v55 = vmul.f32 %v4383_v42, %v1296_v45  ;;  %v1701_v45 = vld [vmem:[#allocation15 + $0x168] sm:$0xff]  ;;  %v1702_v51 = vld [vmem:[#allocation15 + $0x170] sm:$0xff]  ;;  %v1715_v53 = vld [vmem:[#allocation15 + $0x1d8] sm:$0xff] }
 0x3aa   : > { %1816 = vmatpush.msrb.mxu3 %v1702_v51  ;;  %1854 = vmatpush.msrb.mxu1 %v1715_v53  ;;  %v1662_v46 = vld [vmem:[#allocation15 + $0x30] sm:$0xff]  ;;  %v1657_v51 = vld [vmem:[#allocation15 + $0x8] sm:$0xff] }
 0x3ab   : > { %v1298_v59 = vadd.f32 %v4383_v42, %v1297_v55  ;;  %v1698_v55 = vld [vmem:[#allocation15 + $0x150] sm:$0xff] }
 0x3ac   : > { %v4385_v48 = vpop.eup %4384  ;;  %1817 = vmatpush.msrb.mxu3 %v1698_v55  ;;  %v1658_v53 = vld [vmem:[#allocation15 + $0x10] sm:$0xff]  ;;  %v1659_v55 = vld [vmem:[#allocation15 + $0x18] sm:$0xff] }
 0x3ad   : > { %v1309_v60 = vmul.f32 %v4385_v48, %v1209_v47  ;;  %v1302_v61 = vsel %vm1301_vm10, %v4383_v42, %v1298_v59  ;;  %v1373_v28 = vpop.f32.mrf.mxu2  ;;  %vm1314_vm12 = vweird.f32 %v4385_v48  ;;  %v1708_v42 = vld [vmem:[#allocation15 + $0x1a0] sm:$0xff]  ;;  %v1711_v59 = vld [vmem:[#allocation15 + $0x1b8] sm:$0xff] }
 0x3ae   : > { %v1307_v62 = vsel %vm1304_vm11, %v1306_v49, %v1302_v61  ;;  %vm1315_vm14 = vmor %vm1313_vm13, %vm1314_vm12  ;;  %v1704_v47 = vld [vmem:[#allocation15 + $0x180] sm:$0xff]  ;;  %1732 = vmatpush.msrb.mxu0 %v1708_v42  ;;  %v1694_v61 = vld [vmem:[#allocation15 + $0x130] sm:$0xff]  ;;  %1855 = vmatpush.msrb.mxu1 %v1711_v59 }
 0x3af   : > { %v1310_v63 = vsub.f32 1.0, %v1309_v60  ;;  %v1385_v0 = vmul.f32 %v1373_v28, %v1307_v62  ;;  %v3756_v52 = vmul.f32 %v5387_v56, %v1307_v62  ;;  %v5414_v56 = vld [vmem:[%s7438_s16] ss:$0 sm:$0xff]  ;;  %v1693_v60 = vld [vmem:[#allocation15 + $0x128] sm:$0xff]  ;;  %v1707_v28 = vld [vmem:[#allocation15 + $0x198] sm:$0xff]  ;;  %1818 = vmatpush.msrb.mxu3 %v1694_v61 }
 0x3b0   : > { %1733 = vmatpush.msrb.mxu0 %v1704_v47  ;;  %1856 = vmatpush.msrb.mxu1 %v1707_v28  ;;  %v1664_v42 = vld [vmem:[#allocation15 + $0x40] sm:$0xff] }
 0x3b1   : > { %3764 = vst [vmem:[%s5251_s5 + $0x30] sm:$0xff] %v3756_v52  ;;  %1441 = vmatmul.f32.gmra.mxu3 %v1385_v0  ;;  %v1311_v6 = vmul.f32 %v4385_v48, %v1310_v63  ;;  %v1692_v63 = vld [vmem:[#allocation15 + $0x120] sm:$0xff]  ;;  %v1689_v0 = vld [vmem:[#allocation15 + $0x108] sm:$0xff]  ;;  %v1690_v52 = vld [vmem:[#allocation15 + $0x110] sm:$0xff] }
 0x3b2   : > { %1819 = vmatpush.msrb.mxu3 %v1690_v52  ;;  %v1660_v47 = vld [vmem:[#allocation15 + $0x20] sm:$0xff] }
 0x3b3   : > { %v1312_v9 = vadd.f32 %v4385_v48, %v1311_v6  ;;  %v1703_v6 = vld [vmem:[#allocation15 + $0x178] sm:$0xff] }
 0x3b4   : > { %1857 = vmatpush.msrb.mxu1 %v1703_v6 }
 0x3b5   : > { %v1316_v12 = vsel %vm1315_vm14, %v4385_v48, %v1312_v9  ;;  %v1376_v13 = vpop.f32.mrf.mxu2  ;;  %v1696_v48 = vld [vmem:[#allocation15 + $0x140] sm:$0xff] }
 0x3b6   : > { %v1321_v15 = vsel %vm1318_vm15, %v1320_v10, %v1316_v12 }
 0x3b7   : > { %v1386_v16 = vmul.f32 %v1376_v13, %v1321_v15  ;;  %v3757_v18 = vmul.f32 %v5391_v58, %v1321_v15 }
 0x3b9   : > { %3765 = vst [vmem:[%s5251_s5 + $0x38] sm:$0xff] %v3757_v18  ;;  %1444 = vmatmul.f32.gmra.mxu3 %v1386_v16  ;;  %v1685_v18 = vld [vmem:[#allocation15 + $0xe8] sm:$0xff] }
 0x404   : > { %v1424_v32 = vpop.f32.mrf.mxu3 }
 0x405   : > { %v1425_v19 = vadd.f32 %v5414_v56, %v1424_v32  ;;  %v1686_v32 = vld [vmem:[#allocation15 + $0xf0] sm:$0xff] }
 0x406   : > { %1820 = vmatpush.msrb.mxu3 %v1686_v32 }
 0x407   : > { %v5418_v20 = vadd.f32 %v1425_v19, %v5313_v2  ;;  %v1699_v19 = vld [vmem:[#allocation15 + $0x158] sm:$0xff] }
 0x408   : > { %1858 = vmatpush.msrb.mxu1 %v1699_v19 }
 0x409   : > { %1458 = vadd.xlane.f32.xlu1 %v5418_v20  ;;  %v1474_v21 = vmul.f32 %v5418_v20, %v5418_v20 }
 0x40b   : > { %1482 = vadd.xlane.f32.xlu2 %v1474_v21  ;;  %v1695_v21 = vld [vmem:[#allocation15 + $0x138] sm:$0xff] }
 0x40c   : > { %v1427_v58 = vpop.f32.mrf.mxu3  ;;  %1859 = vmatpush.msrb.mxu1 %v1695_v21 }
 0x40d   : > { %v1428_v22 = vadd.f32 %v5414_v56, %v1427_v58  ;;  %v1687_v58 = vld [vmem:[#allocation15 + $0xf8] sm:$0xff] }
 0x40f   : > { %v5425_v23 = vadd.f32 %v1428_v22, %v5317_v3  ;;  %v1681_v22 = vld [vmem:[#allocation15 + $0xc8] sm:$0xff] }
 0x411   : > { %1460 = vadd.xlane.f32.xlu0 %v5425_v23  ;;  %v1475_v25 = vmul.f32 %v5425_v23, %v5425_v23 }
 0x413   : > { %1484 = vadd.xlane.f32.xlu1 %v1475_v25  ;;  %v1682_v25 = vld [vmem:[#allocation15 + $0xd0] sm:$0xff] }
 0x414   : > { %v1430_v2 = vpop.f32.mrf.mxu3  ;;  %1821 = vmatpush.msrb.mxu3 %v1682_v25 }
 0x415   : > { %v1431_v26 = vadd.f32 %v5414_v56, %v1430_v2  ;;  %v1680_v2 = vld [vmem:[#allocation15 + $0xc0] sm:$0xff] }
 0x417   : > { %v5432_v27 = vadd.f32 %v1431_v26, %v5321_v4  ;;  %v1717_v4 = vld [vmem:[#allocation15 + $0x1e8] sm:$0xff]  ;;  %v1683_v26 = vld [vmem:[#allocation15 + $0xd8] sm:$0xff] }
 0x418   : > { %1771 = vmatpush.msrb.mxu2 %v1717_v4  ;;  %v1673_v4 = vld [vmem:[#allocation15 + $0x88] sm:$0xff] }
 0x419   : > { %1462 = vadd.xlane.f32.xlu2 %v5432_v27  ;;  %v1476_v29 = vmul.f32 %v5432_v27, %v5432_v27 }
 0x41a   : > { %1772 = vmatpush.msrb.mxu2 %v1713_v37  ;;  %v1669_v37 = vld [vmem:[#allocation15 + $0x68] sm:$0xff] }
 0x41b   : > { %1486 = vadd.xlane.f32.xlu0 %v1476_v29  ;;  %v1677_v29 = vld [vmem:[#allocation15 + $0xa8] sm:$0xff] }
 0x41c   : > { %v1433_v3 = vpop.f32.mrf.mxu3 }
 0x41d   : > { %v1434_v30 = vadd.f32 %v5414_v56, %v1433_v3  ;;  %v1678_v3 = vld [vmem:[#allocation15 + $0xb0] sm:$0xff] }
 0x41e   : > { %1822 = vmatpush.msrb.mxu3 %v1678_v3 }
 0x41f   : > { %v5439_v31 = vadd.f32 %v1434_v30, %v5325_v5  ;;  %v1709_v5 = vld [vmem:[#allocation15 + $0x1a8] sm:$0xff]  ;;  %v1676_v30 = vld [vmem:[#allocation15 + $0xa0] sm:$0xff] }
 0x420   : > { %1773 = vmatpush.msrb.mxu2 %v1709_v5  ;;  %1823 = vmatpush.msrb.mxu3 %v1674_v34  ;;  %v1665_v5 = vld [vmem:[#allocation15 + $0x48] sm:$0xff] }
 0x421   : > { %1464 = vadd.xlane.f32.xlu1 %v5439_v31  ;;  %v1477_v33 = vmul.f32 %v5439_v31, %v5439_v31 }
 0x422   : > { %1774 = vmatpush.msrb.mxu2 %v1705_v24  ;;  %1824 = vmatpush.msrb.mxu3 %v1670_v38  ;;  %v1661_v24 = vld [vmem:[#allocation15 + $0x28] sm:$0xff] }
 0x423   : > { %1488 = vadd.xlane.f32.xlu2 %v1477_v33  ;;  %v1679_v33 = vld [vmem:[#allocation15 + $0xb8] sm:$0xff] }
 0x424   : > { %v1436_v35 = vpop.f32.mrf.mxu3  ;;  %1775 = vmatpush.msrb.mxu2 %v1701_v45  ;;  %1825 = vmatpush.msrb.mxu3 %v1666_v41 }
 0x425   : > { %v1437_v40 = vadd.f32 %v5414_v56, %v1436_v35  ;;  %v1675_v35 = vld [vmem:[#allocation15 + $0x98] sm:$0xff] }
 0x426   : > { %1776 = vmatpush.msrb.mxu2 %v1697_v54  ;;  %1826 = vmatpush.msrb.mxu3 %v1662_v46 }
 0x427   : > { %v5446_v44 = vadd.f32 %v1437_v40, %v5329_v8  ;;  %v1700_v8 = vld [vmem:[#allocation15 + $0x160] sm:$0xff]  ;;  %v1671_v40 = vld [vmem:[#allocation15 + $0x78] sm:$0xff] }
 0x428   : > { %1734 = vmatpush.msrb.mxu0 %v1700_v8  ;;  %1777 = vmatpush.msrb.mxu2 %v1693_v60  ;;  %v1656_v8 = vld [vmem:[#allocation15] sm:$0xff] }
 0x429   : > { %1466 = vadd.xlane.f32.xlu0 %v5446_v44  ;;  %v1478_v50 = vmul.f32 %v5446_v44, %v5446_v44  ;;  %1827 = vmatpush.msrb.mxu3 %v1658_v53 }
 0x42a   : > { %1735 = vmatpush.msrb.mxu0 %v1696_v48  ;;  %1778 = vmatpush.msrb.mxu2 %v1689_v0 }
 0x42b   : > { %1490 = vadd.xlane.f32.xlu1 %v1478_v50  ;;  %v1663_v50 = vld [vmem:[#allocation15 + $0x38] sm:$0xff] }
 0x42c   : > { %v1439_v57 = vpop.f32.mrf.mxu3  ;;  %1736 = vmatpush.msrb.mxu0 %v1692_v63  ;;  %1779 = vmatpush.msrb.mxu2 %v1685_v18 }
 0x42d   : > { %v1440_v49 = vadd.f32 %v5414_v56, %v1439_v57 }
 0x42e   : > { %1780 = vmatpush.msrb.mxu2 %v1681_v22 }
 0x42f   : > { %v5453_v62 = vadd.f32 %v1440_v49, %v5333_v11 }
 0x430   : > { %1781 = vmatpush.msrb.mxu2 %v1677_v29 }
 0x431   : > { %1468 = vadd.xlane.f32.xlu2 %v5453_v62  ;;  %v1479_v1 = vmul.f32 %v5453_v62, %v5453_v62 }
 0x432   : > { %1782 = vmatpush.msrb.mxu2 %v1673_v4 }
 0x433   : > { %1492 = vadd.xlane.f32.xlu0 %v1479_v1 }
 0x434   : > { %v1442_v11 = vpop.f32.mrf.mxu3  ;;  %1783 = vmatpush.msrb.mxu2 %v1669_v37 }
 0x435   : > { %v1443_v7 = vadd.f32 %v5414_v56, %v1442_v11 }
 0x436   : > { %1784 = vmatpush.msrb.mxu2 %v1665_v5 }
 0x437   : > { %v5460_v9 = vadd.f32 %v1443_v7, %v5337_v14  ;;  %v1688_v14 = vld [vmem:[#allocation15 + $0x100] sm:$0xff] }
 0x438   : > { %1737 = vmatpush.msrb.mxu0 %v1688_v14  ;;  %1785 = vmatpush.msrb.mxu2 %v1661_v24 }
 0x439   : > { %1470 = vadd.xlane.f32.xlu1 %v5460_v9  ;;  %v1480_v10 = vmul.f32 %v5460_v9, %v5460_v9 }
 0x43a   : > { %1786 = vmatpush.msrb.mxu2 %v1657_v51 }
 0x43b   : > { %1494 = vadd.xlane.f32.xlu2 %v1480_v10 }
 0x43c   : > { %v1445_v12 = vpop.f32.mrf.mxu3 }
 0x43d   : > { %v1446_v13 = vadd.f32 %v5414_v56, %v1445_v12  ;;  %v1691_v56 = vld [vmem:[#allocation15 + $0x118] sm:$0xff] }
 0x43e   : > { %1860 = vmatpush.msrb.mxu1 %v1691_v56 }
 0x43f   : > { %v5467_v15 = vadd.f32 %v1446_v13, %v5341_v17  ;;  %v1684_v17 = vld [vmem:[#allocation15 + $0xe0] sm:$0xff] }
 0x440   : > { %1738 = vmatpush.msrb.mxu0 %v1684_v17  ;;  %1861 = vmatpush.msrb.mxu1 %v1687_v58 }
 0x441   : > { %1472 = vadd.xlane.f32.xlu0 %v5467_v15  ;;  %v1481_v16 = vmul.f32 %v5467_v15, %v5467_v15 }
 0x442   : > { %1739 = vmatpush.msrb.mxu0 %v1680_v2  ;;  %1862 = vmatpush.msrb.mxu1 %v1683_v26  ;;  %v5480_v26 = vld [vmem:[%s7439_s29] ss:$0 sm:$0xff]  ;;  %s4077_s29 = sshll.u32 %s4880_s2, 3  ;;  %s3772_s2 = scalar_lea.sflag [#allocation20], %s5215_s10 }
 0x443   : > { %1496 = vadd.xlane.f32.xlu1 %v1481_v16  ;;  %s7214_s7 = sadd.s32 %s4078_s14, %s4077_s29 }
 0x444   : > { %1740 = vmatpush.msrb.mxu0 %v1676_v30  ;;  %1863 = vmatpush.msrb.mxu1 %v1679_v33 }
 0x446   : > { %1741 = vmatpush.msrb.mxu0 %v1672_v36  ;;  %1864 = vmatpush.msrb.mxu1 %v1675_v35 }
 0x448   : > { %1742 = vmatpush.msrb.mxu0 %v1668_v39  ;;  %1865 = vmatpush.msrb.mxu1 %v1671_v40 }
 0x44a   : > { %1743 = vmatpush.msrb.mxu0 %v1664_v42  ;;  %1866 = vmatpush.msrb.mxu1 %v1667_v43 }
 0x44c   : > { %1744 = vmatpush.msrb.mxu0 %v1660_v47  ;;  %1867 = vmatpush.msrb.mxu1 %v1663_v50 }
 0x44e   : > { %1745 = vmatpush.msrb.mxu0 %v1656_v8  ;;  %1868 = vmatpush.msrb.mxu1 %v1659_v55 }
 0x47c   : > { %v1459_v45 = vpop.xlane.xlu1 %1458 }
 0x47d   : > { %v1498_v54 = vmul.f32 0.0078125, %v1459_v45 }
 0x47e   : > { %v1483_v57 = vpop.xlane.xlu2 %1482 }
 0x47f   : > { %v1514_v59 = vmul.f32 %v1498_v54, %v1498_v54  ;;  %v1506_v48 = vmul.f32 0.0078125, %v1483_v57  ;;  %v1530_v2 = vsub.f32 %v5418_v20, %v1498_v54  ;;  %v5489_v20 = vld [vmem:[%s7440_s26] ss:$0 sm:$0xff]  ;;  %s4079_s26 = sshll.u32 %s7214_s7, 3 }
 0x481   : > { %v1522_v49 = vsub.f32 %v1506_v48, %v1514_v59 }
 0x483   : > { %v1538_v60 = vadd.f32 1e-05, %v1522_v49 }
 0x484   : > { %v1461_v61 = vpop.xlane.xlu0 %1460 }
 0x485   : > { %4386 = vrsqrt.f32 %v1538_v60  ;;  %v1499_v28 = vmul.f32 0.0078125, %v1461_v61  ;;  %vm1552_vm1 = vweird.f32 %v1538_v60 }
 0x486   : > { %v1485_v63 = vpop.xlane.xlu1 %1484 }
 0x487   : > { %v1515_v0 = vmul.f32 %v1499_v28, %v1499_v28  ;;  %v1507_v52 = vmul.f32 0.0078125, %v1485_v63  ;;  %v1531_v46 = vsub.f32 %v5425_v23, %v1499_v28 }
 0x489   : > { %v1523_v1 = vsub.f32 %v1507_v52, %v1515_v0 }
 0x48b   : > { %v4387_v6 = vpop.eup %4386  ;;  %v1539_v11 = vadd.f32 1e-05, %v1523_v1 }
 0x48c   : > { %v1547_v7 = vmul.f32 %v4387_v6, %v1538_v60  ;;  %v1463_v10 = vpop.xlane.xlu2 %1462  ;;  %vm1553_vm0 = vweird.f32 %v4387_v6 }
 0x48d   : > { %4388 = vrsqrt.f32 %v1539_v11  ;;  %v5472_v12 = vmul.f32 0.0078125, %v1463_v10  ;;  %vm1554_vm2 = vmor %vm1552_vm1, %vm1553_vm0  ;;  %vm1562_vm4 = vweird.f32 %v1539_v11 }
 0x48e   : > { %v1548_v13 = vmul.f32 %v4387_v6, %v1547_v7  ;;  %v1487_v16 = vpop.xlane.xlu0 %1486 }
 0x48f   : > { %v1516_v14 = vmul.f32 %v5472_v12, %v5472_v12  ;;  %v1508_v18 = vmul.f32 0.0078125, %v1487_v16  ;;  %v1532_v0 = vsub.f32 %v5432_v27, %v5472_v12 }
 0x490   : > { %v1549_v32 = vmul.f32 0.5, %v1548_v13 }
 0x491   : > { %v1524_v19 = vsub.f32 %v1508_v18, %v1516_v14 }
 0x492   : > { %v1550_v21 = vsub.f32 1.5, %v1549_v32 }
 0x493   : > { %v4389_v56 = vpop.eup %4388  ;;  %v1540_v17 = vadd.f32 1e-05, %v1524_v19 }
 0x494   : > { %v1551_v58 = vmul.f32 %v4387_v6, %v1550_v21  ;;  %v1557_v22 = vmul.f32 %v4389_v56, %v1539_v11  ;;  %v1465_v25 = vpop.xlane.xlu1 %1464  ;;  %vm1563_vm3 = vweird.f32 %v4389_v56 }
 0x495   : > { %4390 = vrsqrt.f32 %v1540_v17  ;;  %v5482_v29 = vmul.f32 0.0078125, %v1465_v25  ;;  %vm1564_vm5 = vmor %vm1562_vm4, %vm1563_vm3  ;;  %vm1572_vm7 = vweird.f32 %v1540_v17 }
 0x496   : > { %v1555_v3 = vsel %vm1554_vm2, %v4387_v6, %v1551_v58  ;;  %v1558_v30 = vmul.f32 %v4389_v56, %v1557_v22  ;;  %v1489_v33 = vpop.xlane.xlu2 %1488 }
 0x497   : > { %v1626_v4 = vmul.f32 %v1555_v3, %v1530_v2  ;;  %v1517_v34 = vmul.f32 %v5482_v29, %v5482_v29  ;;  %v1509_v36 = vmul.f32 0.0078125, %v1489_v33  ;;  %v1533_v58 = vsub.f32 %v5439_v31, %v5482_v29 }
 0x498   : > { %v1559_v35 = vmul.f32 0.5, %v1558_v30 }
 0x499   : > { %v1637_v37 = vmul.f32 %v5480_v26, %v1626_v4  ;;  %v1525_v38 = vsub.f32 %v1509_v36, %v1517_v34 }
 0x49a   : > { %v1560_v39 = vsub.f32 1.5, %v1559_v35 }
 0x49b   : > { %v4391_v40 = vpop.eup %4390  ;;  %v1541_v5 = vadd.f32 1e-05, %v1525_v38  ;;  %v5493_v41 = vadd.f32 %v5489_v20, %v1637_v37 }
 0x49c   : > { %v1561_v42 = vmul.f32 %v4389_v56, %v1560_v39  ;;  %v1567_v43 = vmul.f32 %v4391_v40, %v1540_v17  ;;  %v1467_v24 = vpop.xlane.xlu0 %1466  ;;  %vm1573_vm6 = vweird.f32 %v4391_v40 }
 0x49d   : > { %7441 = vst [vmem:[#allocation34_spill] sm:$0xff] %v5493_v41  ;;  %4392 = vrsqrt.f32 %v1541_v5  ;;  %v5496_v47 = vmul.f32 0.0078125, %v1467_v24  ;;  %1746 = vmatmul.f32.vlgmr.msrb.gmra.mxu0 %v5493_v41  ;;  %1787 = vmatmul.f32.vlgmr.msrb.gmra.mxu2 %v5493_v41  ;;  %vm1574_vm8 = vmor %vm1572_vm7, %vm1573_vm6  ;;  %vm1582_vm10 = vweird.f32 %v1541_v5 }
 0x49e   : > { %v1565_v50 = vsel %vm1564_vm5, %v4389_v56, %v1561_v42  ;;  %v1568_v45 = vmul.f32 %v4391_v40, %v1567_v43  ;;  %1828 = vmatmul.f32.vlgmr.msrb.gmra.mxu3 %v5493_v41  ;;  %1869 = vmatmul.f32.vlgmr.msrb.gmra.mxu1 %v5493_v41  ;;  %v1491_v51 = vpop.xlane.xlu1 %1490 }
 0x49f   : > { %v1627_v53 = vmul.f32 %v1565_v50, %v1531_v46  ;;  %v1518_v8 = vmul.f32 %v5496_v47, %v5496_v47  ;;  %v1510_v23 = vmul.f32 0.0078125, %v1491_v51  ;;  %v1534_v42 = vsub.f32 %v5446_v44, %v5496_v47  ;;  %v3333_v51 = vld [vmem:[#allocation16 + $0xf8] sm:$0xff] }
 0x4a0   : > { %v1569_v54 = vmul.f32 0.5, %v1568_v45  ;;  %v3317_v45 = vld [vmem:[#allocation16 + $0x78] sm:$0xff]  ;;  %3411 = vmatpush.msra.mxu2 %v3333_v51 }
 0x4a1   : > { %v1638_v55 = vmul.f32 %v5480_v26, %v1627_v53  ;;  %v1526_v57 = vsub.f32 %v1510_v23, %v1518_v8  ;;  %v3349_v53 = vld [vmem:[#allocation16 + $0x178] sm:$0xff]  ;;  %3370 = vmatpush.msra.mxu0 %v3317_v45  ;;  %v3316_v23 = vld [vmem:[#allocation16 + $0x70] sm:$0xff] }
 0x4a2   : > { %v1570_v59 = vsub.f32 1.5, %v1569_v54  ;;  %3452 = vmatpush.msra.mxu3 %v3349_v53 }
 0x4a3   : > { %v4393_v48 = vpop.eup %4392  ;;  %v1542_v49 = vadd.f32 1e-05, %v1526_v57  ;;  %v5506_v60 = vadd.f32 %v5489_v20, %v1638_v55  ;;  %3371 = vmatpush.msra.mxu0 %v3316_v23  ;;  %v3314_v23 = vld [vmem:[#allocation16 + $0x60] sm:$0xff] }
 0x4a4   : > { %v1571_v61 = vmul.f32 %v4391_v40, %v1570_v59  ;;  %v1577_v28 = vmul.f32 %v4393_v48, %v1541_v5  ;;  %v1469_v63 = vpop.xlane.xlu2 %1468  ;;  %vm1583_vm9 = vweird.f32 %v4393_v48 }
 0x4a5   : > { %7442 = vst [vmem:[#allocation35_spill] sm:$0xff] %v5506_v60  ;;  %4394 = vrsqrt.f32 %v1542_v49  ;;  %v5510_v52 = vmul.f32 0.0078125, %v1469_v63  ;;  %1749 = vmatmul.f32.gmra.mxu0 %v5506_v60  ;;  %1790 = vmatmul.f32.gmra.mxu2 %v5506_v60  ;;  %vm1584_vm11 = vmor %vm1582_vm10, %vm1583_vm9  ;;  %vm1592_vm13 = vweird.f32 %v1542_v49 }
 0x4a6   : > { %v1575_v1 = vsel %vm1574_vm8, %v4391_v40, %v1571_v61  ;;  %v1578_v6 = vmul.f32 %v4393_v48, %v1577_v28  ;;  %1831 = vmatmul.f32.gmra.mxu3 %v5506_v60  ;;  %1872 = vmatmul.f32.gmra.mxu1 %v5506_v60  ;;  %v1493_v11 = vpop.xlane.xlu0 %1492 }
 0x4a7   : > { %v1628_v7 = vmul.f32 %v1575_v1, %v1532_v0  ;;  %v1519_v10 = vmul.f32 %v5510_v52, %v5510_v52  ;;  %v1511_v27 = vmul.f32 0.0078125, %v1493_v11  ;;  %v1535_v0 = vsub.f32 %v5453_v62, %v5510_v52 }
 0x4a8   : > { %v1579_v12 = vmul.f32 0.5, %v1578_v6 }
 0x4a9   : > { %v1639_v13 = vmul.f32 %v5480_v26, %v1628_v7  ;;  %v1527_v16 = vsub.f32 %v1511_v27, %v1519_v10 }
 0x4aa   : > { %v1580_v14 = vsub.f32 1.5, %v1579_v12 }
 0x4ab   : > { %v4395_v18 = vpop.eup %4394  ;;  %v5519_v32 = vadd.f32 1e-05, %v1527_v16  ;;  %v5522_v19 = vadd.f32 %v5489_v20, %v1639_v13 }
 0x4ac   : > { %v1581_v21 = vmul.f32 %v4393_v48, %v1580_v14  ;;  %v1587_v56 = vmul.f32 %v4395_v18, %v1542_v49  ;;  %v1471_v17 = vpop.xlane.xlu1 %1470  ;;  %vm1593_vm12 = vweird.f32 %v4395_v18 }
 0x4ad   : > { %7443 = vst [vmem:[#allocation36_spill] sm:$0xff] %v5522_v19  ;;  %4396 = vrsqrt.f32 %v5519_v32  ;;  %v5527_v22 = vmul.f32 0.0078125, %v1471_v17  ;;  %1752 = vmatmul.f32.gmra.mxu0 %v5522_v19  ;;  %1793 = vmatmul.f32.gmra.mxu2 %v5522_v19  ;;  %vm1594_vm14 = vmor %vm1592_vm13, %vm1593_vm12  ;;  %vm1602_vm0 = vweird.f32 %v5519_v32 }
 0x4ae   : > { %v1585_v25 = vsel %vm1584_vm11, %v4393_v48, %v1581_v21  ;;  %v1588_v2 = vmul.f32 %v4395_v18, %v1587_v56  ;;  %1834 = vmatmul.f32.gmra.mxu3 %v5522_v19  ;;  %1875 = vmatmul.f32.gmra.mxu1 %v5522_v19  ;;  %v1495_v3 = vpop.xlane.xlu2 %1494  ;;  %v5841_v19 = vld [vmem:[#allocation16 + $0x1e8] sm:$0xff] }
 0x4af   : > { %v1629_v30 = vmul.f32 %v1585_v25, %v1533_v58  ;;  %v1520_v31 = vmul.f32 %v5527_v22, %v5527_v22  ;;  %v1512_v29 = vmul.f32 0.0078125, %v1495_v3  ;;  %v1536_v16 = vsub.f32 %v5460_v9, %v5527_v22 }
 0x4b0   : > { %v1589_v33 = vmul.f32 0.5, %v1588_v2 }
 0x4b1   : > { %v1640_v4 = vmul.f32 %v5480_v26, %v1629_v30  ;;  %v1528_v34 = vsub.f32 %v1512_v29, %v1520_v31  ;;  %v3315_v31 = vld [vmem:[#allocation16 + $0x68] sm:$0xff] }
 0x4b2   : > { %v1590_v36 = vsub.f32 1.5, %v1589_v33  ;;  %3372 = vmatpush.msra.mxu0 %v3315_v31  ;;  %v3332_v33 = vld [vmem:[#allocation16 + $0xf0] sm:$0xff] }
 0x4b3   : > { %v4397_v35 = vpop.eup %4396  ;;  %v1544_v37 = vadd.f32 1e-05, %v1528_v34  ;;  %v5537_v38 = vadd.f32 %v5489_v20, %v1640_v4  ;;  %v3348_v4 = vld [vmem:[#allocation16 + $0x170] sm:$0xff]  ;;  %3412 = vmatpush.msra.mxu2 %v3332_v33 }
 0x4b4   : > { %v1591_v39 = vmul.f32 %v4395_v18, %v1590_v36  ;;  %v1597_v40 = vmul.f32 %v4397_v35, %v5519_v32  ;;  %v1473_v5 = vpop.xlane.xlu0 %1472  ;;  %vm1603_vm15 = vweird.f32 %v4397_v35  ;;  %3453 = vmatpush.msra.mxu3 %v3348_v4  ;;  %3373 = vmatpush.msra.mxu0 %v3314_v23 }
 0x4b5   : > { %7444 = vst [vmem:[#allocation37_spill] sm:$0xff] %v5537_v38  ;;  %4398 = vrsqrt.f32 %v1544_v37  ;;  %v5542_v43 = vmul.f32 0.0078125, %v1473_v5  ;;  %1755 = vmatmul.f32.gmra.mxu0 %v5537_v38  ;;  %1796 = vmatmul.f32.gmra.mxu2 %v5537_v38  ;;  %vm1604_vm1 = vmor %vm1602_vm0, %vm1603_vm15  ;;  %vm1612_vm3 = vweird.f32 %v1544_v37 }
 0x4b6   : > { %v1595_v24 = vsel %vm1594_vm14, %v4395_v18, %v1591_v39  ;;  %v1598_v46 = vmul.f32 %v4397_v35, %v1597_v40  ;;  %1837 = vmatmul.f32.gmra.mxu3 %v5537_v38  ;;  %1878 = vmatmul.f32.gmra.mxu1 %v5537_v38  ;;  %v1497_v50 = vpop.xlane.xlu1 %1496  ;;  %v3347_v39 = vld [vmem:[#allocation16 + $0x168] sm:$0xff]  ;;  %v3341_v38 = vld [vmem:[#allocation16 + $0x138] sm:$0xff] }
 0x4b7   : > { %v1630_v8 = vmul.f32 %v1595_v24, %v1534_v42  ;;  %v1521_v44 = vmul.f32 %v5542_v43, %v5542_v43  ;;  %v1513_v47 = vmul.f32 0.0078125, %v1497_v50  ;;  %v1537_v22 = vsub.f32 %v5467_v15, %v5542_v43  ;;  %v1720_v15 = vld [vmem:[%s7449_s23] sm:$0xf]  ;;  %3454 = vmatpush.msra.mxu3 %v3347_v39  ;;  %s7652_s23 = sld [smem:[#allocation113_spill]] }
 0x4b8   : > { %v1599_v54 = vmul.f32 0.5, %v1598_v46  ;;  %v5592_v29 = vperm.slane %v1720_v15, 0  ;;  %v5605_v5 = vperm.slane %v1720_v15, 1  ;;  %v5610_v43 = vperm.slane %v1720_v15, 2 }
 0x4b9   : > { %v1641_v55 = vmul.f32 %v5480_v26, %v1630_v8  ;;  %v1529_v57 = vsub.f32 %v1513_v47, %v1521_v44 }
 0x4ba   : > { %v1600_v59 = vsub.f32 1.5, %v1599_v54 }
 0x4bb   : > { %v4399_v48 = vpop.eup %4398  ;;  %v1545_v49 = vadd.f32 1e-05, %v1529_v57  ;;  %v5552_v61 = vadd.f32 %v5489_v20, %v1641_v55 }
 0x4bc   : > { %v1601_v28 = vmul.f32 %v4397_v35, %v1600_v59  ;;  %v1607_v63 = vmul.f32 %v4399_v48, %v1544_v37  ;;  %vm1613_vm2 = vweird.f32 %v4399_v48  ;;  %v3331_v37 = vld [vmem:[#allocation16 + $0xe8] sm:$0xff] }
 0x4bd   : > { %7445 = vst [vmem:[#allocation38_spill] sm:$0xff] %v5552_v61  ;;  %4400 = vrsqrt.f32 %v1545_v49  ;;  %1758 = vmatmul.f32.gmra.mxu0 %v5552_v61  ;;  %1799 = vmatmul.f32.gmra.mxu2 %v5552_v61  ;;  %vm1614_vm4 = vmor %vm1612_vm3, %vm1613_vm2  ;;  %vm1622_vm6 = vweird.f32 %v1545_v49  ;;  %s7653_s27 = smov %s7652_s23  ;;  %s3804_s18 = scalar_lea.hbm %s7652_s23, %s4079_s26 }
 0x4be   : > { %v1605_v1 = vsel %vm1604_vm1, %v4397_v35, %v1601_v28  ;;  %v1608_v6 = vmul.f32 %v4399_v48, %v1607_v63  ;;  %1840 = vmatmul.f32.gmra.mxu3 %v5552_v61  ;;  %1881 = vmatmul.f32.gmra.mxu1 %v5552_v61  ;;  %s3807_s13 = sshll.u32 %s3804_s18, 4  ;;  %s3808_s13 = int_to_ptr.hbm [resolvable:$true] %s3807_s13 }
 0x4bf   : > { %v1631_v11 = vmul.f32 %v1605_v1, %v1535_v0  ;;  %3413 = vmatpush.msra.mxu2 %v3331_v37  ;;  %s4736_s0 = sshra.s32 %s3808_s13, 4  ;;  %s4737_s0 = int_to_ptr.hbm [resolvable:$true] %s4736_s0 }
 0x4c0   : > { %v1609_v7 = vmul.f32 0.5, %v1608_v6  ;;  %p4743_p5 = scmp.lt.s32.totalorder %s4737_s0, %s7653_s27 }
 0x4c1   : > { %v1642_v10 = vmul.f32 %v5480_v26, %v1631_v11 }
 0x4c2   : > { %v1610_v27 = vsub.f32 1.5, %v1609_v7 }
 0x4c3   : > { %v4401_v12 = vpop.eup %4400  ;;  %v5563_v62 = vadd.f32 %v5489_v20, %v1642_v10 }
 0x4c4   : > { %v1611_v52 = vmul.f32 %v4399_v48, %v1610_v27  ;;  %v1617_v13 = vmul.f32 %v4401_v12, %v1545_v49  ;;  %vm1623_vm5 = vweird.f32 %v4401_v12 }
 0x4c5   : > { %7446 = vst [vmem:[#allocation39_spill] sm:$0xff] %v5563_v62  ;;  %1761 = vmatmul.f32.gmra.mxu0 %v5563_v62  ;;  %1802 = vmatmul.f32.gmra.mxu2 %v5563_v62  ;;  %vm1624_vm7 = vmor %vm1622_vm6, %vm1623_vm5 }
 0x4c6   : > { %v1615_v14 = vsel %vm1614_vm4, %v4399_v48, %v1611_v52  ;;  %v1618_v18 = vmul.f32 %v4401_v12, %v1617_v13  ;;  %1843 = vmatmul.f32.gmra.mxu3 %v5563_v62  ;;  %1884 = vmatmul.f32.gmra.mxu1 %v5563_v62 }
 0x4c7   : > { %v1632_v32 = vmul.f32 %v1615_v14, %v1536_v16 }
 0x4c8   : > { %v1619_v21 = vmul.f32 0.5, %v1618_v18 }
 0x4c9   : > { %v1643_v56 = vmul.f32 %v5480_v26, %v1632_v32 }
 0x4ca   : > { %v1620_v17 = vsub.f32 1.5, %v1619_v21 }
 0x4cb   : > { %v5573_v58 = vadd.f32 %v5489_v20, %v1643_v56 }
 0x4cc   : > { %v1621_v9 = vmul.f32 %v4401_v12, %v1620_v17 }
 0x4cd   : > { %7447 = vst [vmem:[#allocation40_spill] sm:$0xff] %v5573_v58  ;;  %1764 = vmatmul.f32.gmra.mxu0 %v5573_v58  ;;  %1805 = vmatmul.f32.gmra.mxu2 %v5573_v58 }
 0x4ce   : > { %v1625_v25 = vsel %vm1624_vm7, %v4401_v12, %v1621_v9  ;;  %1846 = vmatmul.f32.gmra.mxu3 %v5573_v58  ;;  %1887 = vmatmul.f32.gmra.mxu1 %v5573_v58 }
 0x4cf   : > { %v1633_v2 = vmul.f32 %v1625_v25, %v1537_v22 }
 0x4d1   : > { %v1644_v3 = vmul.f32 %v5480_v26, %v1633_v2  ;;  %v5594_v26 = vperm.slane %v1720_v15, 3 }
 0x4d3   : > { %v5583_v30 = vadd.f32 %v5489_v20, %v1644_v3 }
 0x4d5   : > { %7448 = vst [vmem:[#allocation41_spill] sm:$0xff] %v5583_v30  ;;  %1767 = vmatmul.f32.gmra.mxu0 %v5583_v30  ;;  %1808 = vmatmul.f32.gmra.mxu2 %v5583_v30 }
 0x4d6   : > { %1849 = vmatmul.f32.gmra.mxu3 %v5583_v30  ;;  %1890 = vmatmul.f32.gmra.mxu1 %v5583_v30 }
 0x51a   : > { %v1747_v20 = vpop.f32.mrf.mxu0 }
 0x51b   : > { %v5597_v34 = vadd.f32 %v1747_v20, %v5592_v29  ;;  %v1870_v36 = vpop.f32.mrf.mxu1 }
 0x51c   : > { %v5600_v35 = vadd.f32 %v1870_v36, %v5594_v26 }
 0x51d   : > { %v5603_v40 = vmul.f32 0.70710677, %v5597_v34 }
 0x51e   : > { %v5608_v42 = vmul.f32 0.70710677, %v5600_v35 }
 0x51f   : > { %v1958_v24 = vmul.f32 %v5603_v40, %v5603_v40 }
 0x520   : > { %v2078_v46 = vmul.f32 %v5608_v42, %v5608_v42  ;;  %v1788_v50 = vpop.f32.mrf.mxu2 }
 0x521   : > { %v5616_v45 = vmin.f32 %v1958_v24, 16.0  ;;  %v5619_v51 = vadd.f32 %v1788_v50, %v5605_v5  ;;  %v1829_v53 = vpop.f32.mrf.mxu3  ;;  %v3313_v50 = vld [vmem:[#allocation16 + $0x58] sm:$0xff] }
 0x522   : > { %v5621_v8 = vmin.f32 %v2078_v46, 16.0  ;;  %v5624_v44 = vadd.f32 %v1829_v53, %v5610_v43  ;;  %3374 = vmatpush.msra.mxu0 %v3313_v50 }
 0x523   : > { %v1971_v47 = vmul.f32 3.8918573e-05, %v5616_v45  ;;  %v5629_v55 = vmul.f32 0.70710677, %v5619_v51  ;;  %v1960_v59 = vmul.f32 2.1237322e-06, %v5616_v45  ;;  %v1873_v3 = vpop.f32.mrf.mxu1 }
 0x524   : > { %v2091_v54 = vmul.f32 3.8918573e-05, %v5621_v8  ;;  %v5635_v28 = vmul.f32 0.70710677, %v5624_v44  ;;  %v2080_v0 = vmul.f32 2.1237322e-06, %v5621_v8  ;;  %v5657_v37 = vadd.f32 %v1873_v3, %v5594_v26 }
 0x525   : > { %v1972_v57 = vadd.f32 0.001143296, %v1971_v47  ;;  %v1998_v49 = vmul.f32 %v5629_v55, %v5629_v55  ;;  %v1961_v10 = vadd.f32 0.00028619796, %v1960_v59  ;;  %v1750_v59 = vpop.f32.mrf.mxu0 }
 0x526   : > { %v2092_v48 = vadd.f32 0.001143296, %v2091_v54  ;;  %v2038_v11 = vmul.f32 %v5635_v28, %v5635_v28  ;;  %v2081_v52 = vadd.f32 0.00028619796, %v2080_v0 }
 0x527   : > { %v1973_v63 = vmul.f32 %v1972_v57, %v5616_v45  ;;  %v5640_v6 = vmin.f32 %v1998_v49, 16.0  ;;  %v1962_v21 = vmul.f32 %v1961_v10, %v5616_v45 }
 0x528   : > { %v2093_v1 = vmul.f32 %v2092_v48, %v5621_v8  ;;  %v5646_v16 = vmin.f32 %v2038_v11, 16.0  ;;  %v2082_v56 = vmul.f32 %v2081_v52, %v5621_v8  ;;  %v5666_v48 = vmul.f32 0.70710677, %v5657_v37 }
 0x529   : > { %v1974_v7 = vadd.f32 0.014752088, %v1973_v63  ;;  %v2011_v13 = vmul.f32 3.8918573e-05, %v5640_v6  ;;  %v1963_v15 = vadd.f32 0.0036580483, %v1962_v21 }
 0x52a   : > { %v2094_v27 = vadd.f32 0.014752088, %v2093_v1  ;;  %v2051_v22 = vmul.f32 3.8918573e-05, %v5646_v16  ;;  %v2083_v31 = vadd.f32 0.0036580483, %v2082_v56 }
 0x52b   : > { %v1975_v12 = vmul.f32 %v1974_v7, %v5616_v45  ;;  %v2012_v32 = vadd.f32 0.001143296, %v2011_v13  ;;  %v2000_v33 = vmul.f32 2.1237322e-06, %v5640_v6  ;;  %v1964_v24 = vmul.f32 %v1963_v15, %v5616_v45  ;;  %v3330_v1 = vld [vmem:[#allocation16 + $0xe0] sm:$0xff]  ;;  %v3345_v21 = vld [vmem:[#allocation16 + $0x158] sm:$0xff] }
 0x52c   : > { %v2095_v14 = vmul.f32 %v2094_v27, %v5621_v8  ;;  %v2052_v4 = vadd.f32 0.001143296, %v2051_v22  ;;  %v2084_v53 = vmul.f32 %v2083_v31, %v5621_v8  ;;  %v2040_v57 = vmul.f32 2.1237322e-06, %v5646_v16  ;;  %3414 = vmatpush.msra.mxu2 %v3330_v1  ;;  %v1832_v1 = vpop.f32.mrf.mxu3 }
 0x52d   : > { %v1976_v18 = vadd.f32 0.112945676, %v1975_v12  ;;  %v2013_v9 = vmul.f32 %v2012_v32, %v5640_v6  ;;  %v2001_v23 = vadd.f32 0.00028619796, %v2000_v33  ;;  %v1965_v63 = vadd.f32 0.05243302, %v1964_v24 }
 0x52e   : > { %v2096_v17 = vadd.f32 0.112945676, %v2095_v14  ;;  %v2053_v46 = vmul.f32 %v2052_v4, %v5646_v16  ;;  %v2085_v11 = vadd.f32 0.05243302, %v2084_v53  ;;  %v1751_v27 = vadd.f32 %v1750_v59, %v5592_v29  ;;  %v3346_v12 = vld [vmem:[#allocation16 + $0x160] sm:$0xff]  ;;  %v3329_v32 = vld [vmem:[#allocation16 + $0xd8] sm:$0xff] }
 0x52f   : > { %v1977_v25 = vmul.f32 %v1976_v18, %v5616_v45  ;;  %v2014_v2 = vadd.f32 0.014752088, %v2013_v9  ;;  %v2002_v10 = vmul.f32 %v2001_v23, %v5640_v6  ;;  %v2041_v13 = vadd.f32 0.00028619796, %v2040_v57  ;;  %3455 = vmatpush.msra.mxu3 %v3346_v12  ;;  %3415 = vmatpush.msra.mxu2 %v3329_v32  ;;  %v3312_v9 = vld [vmem:[#allocation16 + $0x50] sm:$0xff]  ;;  %v1791_v57 = vpop.f32.mrf.mxu2 }
 0x530   : > { %v2097_v20 = vmul.f32 %v2096_v17, %v5621_v8  ;;  %v2054_v0 = vadd.f32 0.014752088, %v2053_v46  ;;  %v2238_v18 = vmul.f32 %v5666_v48, %v5666_v48  ;;  %v1966_v17 = vmul.f32 %v1965_v63, %v5616_v45  ;;  %3375 = vmatpush.msra.mxu0 %v3312_v9 }
 0x531   : > { %v1978_v36 = vadd.f32 0.4994258, %v1977_v25  ;;  %v2015_v39 = vmul.f32 %v2014_v2, %v5640_v6  ;;  %3456 = vmatpush.msra.mxu3 %v3345_v21  ;;  %v2086_v22 = vmul.f32 %v2085_v11, %v5621_v8  ;;  %v2003_v2 = vadd.f32 0.0036580483, %v2002_v10 }
 0x532   : > { %v2098_v47 = vadd.f32 0.4994258, %v2097_v20  ;;  %v2055_v14 = vmul.f32 %v2054_v0, %v5646_v16  ;;  %v2042_v15 = vmul.f32 %v2041_v13, %v5646_v16  ;;  %v5683_v31 = vmul.f32 0.70710677, %v1751_v27 }
 0x533   : > { %v1979_v54 = vmul.f32 %v1978_v36, %v5616_v45  ;;  %v2016_v49 = vadd.f32 0.112945676, %v2015_v39  ;;  %v5685_v20 = vmin.f32 %v2238_v18, 16.0  ;;  %v1967_v36 = vadd.f32 0.18741608, %v1966_v17 }
 0x534   : > { %v2099_v7 = vmul.f32 %v2098_v47, %v5621_v8  ;;  %v2056_v3 = vadd.f32 0.112945676, %v2055_v14  ;;  %v2087_v39 = vadd.f32 0.18741608, %v2086_v22  ;;  %v2004_v24 = vmul.f32 %v2003_v2, %v5640_v6  ;;  %v3311_v2 = vld [vmem:[#allocation16 + $0x48] sm:$0xff] }
 0x535   : > { %v5671_v52 = vadd.f32 1.0, %v1979_v54  ;;  %v2017_v56 = vmul.f32 %v2016_v49, %v5640_v6  ;;  %v2043_v46 = vadd.f32 0.0036580483, %v2042_v15  ;;  %v2118_v50 = vmul.f32 %v5683_v31, %v5683_v31  ;;  %3376 = vmatpush.msra.mxu0 %v3311_v2 }
 0x536   : > { %v5679_v25 = vadd.f32 1.0, %v2099_v7  ;;  %v2057_v4 = vmul.f32 %v2056_v3, %v5646_v16  ;;  %v2251_v53 = vmul.f32 3.8918573e-05, %v5685_v20  ;;  %v5697_v59 = vmul.f32 0.5, %v5597_v34 }
 0x537   : > { %4402 = vrcp.f32 %v5671_v52  ;;  %v2018_v33 = vadd.f32 0.4994258, %v2017_v56  ;;  %v1968_v49 = vmul.f32 %v1967_v36, %v5616_v45  ;;  %v2088_v63 = vmul.f32 %v2087_v39, %v5621_v8  ;;  %v3310_v39 = vld [vmem:[#allocation16 + $0x40] sm:$0xff] }
 0x538   : > { %4404 = vrcp.f32 %v5679_v25  ;;  %v2058_v23 = vadd.f32 0.4994258, %v2057_v4  ;;  %v2005_v0 = vadd.f32 0.05243302, %v2004_v24  ;;  %v5702_v11 = vmul.f32 0.5, %v5600_v35  ;;  %v5745_v24 = vld [vmem:[#allocation16 + $0x1f8] sm:$0xff]  ;;  %3377 = vmatpush.msra.mxu0 %v3310_v39 }
 0x539   : > { %v2019_v47 = vmul.f32 %v2018_v33, %v5640_v6  ;;  %v2044_v7 = vmul.f32 %v2043_v46, %v5646_v16  ;;  %v5705_v10 = vmin.f32 %v2118_v50, 16.0  ;;  %v2252_v12 = vadd.f32 0.001143296, %v2251_v53  ;;  %4118 = vmatpush.msra.mxu1 %v5745_v24 }
 0x53a   : > { %7450 = vst [vmem:[#allocation42_spill] sm:$0xff] %v5702_v11  ;;  %v2059_v45 = vmul.f32 %v2058_v23, %v5646_v16  ;;  %v5715_v8 = vadd.f32 %v1791_v57, %v5605_v5  ;;  %v5718_v35 = vmul.f32 0.5, %v5619_v51  ;;  %v5721_v18 = vmul.f32 0.5, %v5624_v44  ;;  %v3344_v23 = vld [vmem:[#allocation16 + $0x150] sm:$0xff] }
 0x53b   : > { %7451 = vst [vmem:[#allocation43_spill] sm:$0xff] %v5705_v10  ;;  %v5711_v14 = vadd.f32 1.0, %v2019_v47  ;;  %v5723_v32 = vmul.f32 0.5, %v1751_v27  ;;  %v5726_v21 = vadd.f32 %v1832_v1, %v5610_v43  ;;  %v1969_v56 = vadd.f32 1.1283791, %v1968_v49  ;;  %v3328_v47 = vld [vmem:[#allocation16 + $0xd0] sm:$0xff]  ;;  %3457 = vmatpush.msra.mxu3 %v3344_v23 }
 0x53c   : > { %v2089_v17 = vadd.f32 1.1283791, %v2088_v63  ;;  %v2006_v9 = vmul.f32 %v2005_v0, %v5640_v6  ;;  %v5730_v22 = vmul.f32 0.5, %v5657_v37  ;;  %v2045_v3 = vadd.f32 0.05243302, %v2044_v7  ;;  %3416 = vmatpush.msra.mxu2 %v3328_v47  ;;  %v5754_v1 = vld [vmem:[#allocation16 + $0x1f0] sm:$0xff] }
 0x53d   : > { %v5694_v54 = vpop.eup %4402  ;;  %7452 = vst [vmem:[#allocation44_spill] sm:$0xff] %v5723_v32  ;;  %v2120_v44 = vmul.f32 2.1237322e-06, %v5705_v10  ;;  %v2253_v27 = vmul.f32 %v2252_v12, %v5685_v20  ;;  %4406 = vrcp.f32 %v5711_v14  ;;  %v5737_v33 = vadd.f32 1.0, %v2059_v45  ;;  %v3343_v45 = vld [vmem:[#allocation16 + $0x148] sm:$0xff]  ;;  %4121 = vmatpush.msra.mxu1 %v5754_v1 }
 0x53e   : > { %v5707_v13 = vpop.eup %4404  ;;  %v1982_v34 = vmul.f32 %v5694_v54, %v5671_v52  ;;  %7453 = vst [vmem:[#allocation45_spill] sm:$0xff] %v5730_v22  ;;  %v5740_v4 = vmul.f32 0.70710677, %v5715_v8  ;;  %v5743_v36 = vmul.f32 0.70710677, %v5726_v21  ;;  %v5748_v46 = vmul.f32 %v1969_v56, %v5603_v40  ;;  %3458 = vmatpush.msra.mxu3 %v3343_v45 }
 0x53f   : > { %v2102_v51 = vmul.f32 %v5707_v13, %v5679_v25  ;;  %v2254_v37 = vadd.f32 0.014752088, %v2253_v27  ;;  %v2007_v50 = vadd.f32 0.18741608, %v2006_v9  ;;  %v2240_v53 = vmul.f32 2.1237322e-06, %v5685_v20  ;;  %4124 = vmatpush.msra.mxu1 %v5841_v19 }
 0x540   : > { %v1983_v15 = vsub.f32 1.0, %v1982_v34  ;;  %v1990_v57 = vand.u32 2147483647, %v5671_v52  ;;  %v2046_v49 = vmul.f32 %v2045_v3, %v5646_v16  ;;  %v2121_v63 = vadd.f32 0.00028619796, %v2120_v44  ;;  %v3327_v34 = vld [vmem:[#allocation16 + $0xc8] sm:$0xff]  ;;  %v1753_v3 = vpop.f32.mrf.mxu0 }
 0x541   : > { %v2255_v0 = vmul.f32 %v2254_v37, %v5685_v20  ;;  %vm1986_vm8 = vweird.f32 %v5671_v52  ;;  %v1992_v40 = vand.u32 2147483648, %v5671_v52  ;;  %v2103_v7 = vsub.f32 1.0, %v2102_v51  ;;  %3417 = vmatpush.msra.mxu2 %v3327_v34 }
 0x542   : > { %v2158_v12 = vmul.f32 %v5740_v4, %v5740_v4  ;;  %v1984_v56 = vmul.f32 %v5694_v54, %v1983_v15  ;;  %4408 = vrcp.f32 %v5737_v33  ;;  %v2198_v2 = vmul.f32 %v5743_v36, %v5743_v36 }
 0x543   : > { %v2256_v9 = vadd.f32 0.112945676, %v2255_v0  ;;  %v5765_v44 = vpop.eup %4406  ;;  %v5768_v51 = vmul.f32 %v2089_v17, %v5608_v42  ;;  %v2112_v27 = vand.u32 2147483648, %v5679_v25  ;;  %v2008_v37 = vmul.f32 %v2007_v50, %v5640_v6 }
 0x544   : > { %v2241_v39 = vadd.f32 0.00028619796, %v2240_v53  ;;  %vm5773_vm9 = vcmp.eq.f32.partialorder %v1990_v57, 8.507059e+37  ;;  %vm2106_vm10 = vweird.f32 %v5679_v25  ;;  %v2110_v47 = vand.u32 2147483647, %v5679_v25 }
 0x545   : > { %v2047_v23 = vadd.f32 0.18741608, %v2046_v49  ;;  %v2122_v0 = vmul.f32 %v2121_v63, %v5705_v10  ;;  %v2257_v42 = vmul.f32 %v2256_v9, %v5685_v20  ;;  %v1993_v17 = vor.u32 1.1754944e-38, %v1992_v40  ;;  %v3309_v63 = vld [vmem:[#allocation16 + $0x38] sm:$0xff]  ;;  %v1876_v9 = vpop.f32.mrf.mxu1 }
 0x546   : > { %v2104_v34 = vmul.f32 %v5707_v13, %v2103_v7  ;;  %v5782_v6 = vmin.f32 %v2158_v12, 16.0  ;;  %v5785_v50 = vadd.f32 %v1753_v3, %v5592_v29  ;;  %v1985_v53 = vadd.f32 %v5694_v54, %v1984_v56  ;;  %3378 = vmatpush.msra.mxu0 %v3309_v63 }
 0x547   : > { %vm1987_vm11 = vweird.f32 %v5694_v54  ;;  %v2022_v57 = vmul.f32 %v5765_v44, %v5711_v14  ;;  %v5791_v49 = vmin.f32 %v2198_v2, 16.0  ;;  %v5793_v45 = vor.u32 1.1754944e-38, %v2112_v27 }
 0x548   : > { %7456 = vst [vmem:[#allocation46_spill] sm:$0xff] %v5782_v6  ;;  %v5795_v40 = vadd.f32 1.1283791, %v2008_v37  ;;  %v2242_v7 = vmul.f32 %v2241_v39, %v5685_v20  ;;  %v2258_v12 = vadd.f32 0.4994258, %v2257_v42  ;;  %v5798_v3 = vpop.eup %4408  ;;  %vm5800_vm12 = vcmp.eq.f32.partialorder %v2110_v47, 8.507059e+37  ;;  %vm5815_vm13 = vmor %vm1986_vm8, %vm1987_vm11 }
 0x549   : > { %7457 = vst [vmem:[#allocation47_spill] sm:$0xff] %v5791_v49  ;;  %v2048_v30 = vmul.f32 %v2047_v23, %v5646_v16  ;;  %v2123_v2 = vadd.f32 0.0036580483, %v2122_v0  ;;  %v5806_v58 = vmul.f32 0.5, %v5715_v8  ;;  %v5809_v27 = vmul.f32 0.5, %v5726_v21  ;;  %v1794_v0 = vpop.f32.mrf.mxu2  ;;  %v3326_v42 = vld [vmem:[#allocation16 + $0xc0] sm:$0xff] }
 0x54a   : > { %v2105_v39 = vadd.f32 %v5707_v13, %v2104_v34  ;;  %vm2107_vm14 = vweird.f32 %v5707_v13  ;;  %v2160_v16 = vmul.f32 2.1237322e-06, %v5782_v6  ;;  %v5823_v8 = vmul.f32 0.70710677, %v5785_v50  ;;  %v3342_v34 = vld [vmem:[#allocation16 + $0x140] sm:$0xff]  ;;  %3418 = vmatpush.msra.mxu2 %v3326_v42  ;;  %v3325_v37 = vld [vmem:[#allocation16 + $0xb8] sm:$0xff] }
 0x54b   : > { %7460 = vst [vmem:[#allocation48_spill] sm:$0xff] %v5806_v58  ;;  %v1989_v21 = vsel %vm5815_vm13, %v5694_v54, %v1985_v53  ;;  %v2023_v47 = vsub.f32 1.0, %v2022_v57  ;;  %v2200_v52 = vmul.f32 2.1237322e-06, %v5791_v49  ;;  %v5830_v23 = vadd.f32 %v1876_v9, %v5594_v26  ;;  %3459 = vmatpush.msra.mxu3 %v3342_v34  ;;  %v1835_v9 = vpop.f32.mrf.mxu3  ;;  %vm5849_vm0 = vmor %vm2106_vm10, %vm2107_vm14  ;;  %v3308_v34 = vld [vmem:[#allocation16 + $0x30] sm:$0xff] }
 0x54c   : > { %7461 = vst [vmem:[#allocation49_spill] sm:$0xff] %v5809_v27  ;;  %v2030_v63 = vand.u32 2147483647, %v5711_v14  ;;  %v2062_v41 = vmul.f32 %v5798_v3, %v5737_v33  ;;  %v2243_v62 = vadd.f32 0.0036580483, %v2242_v7  ;;  %v2259_v61 = vmul.f32 %v2258_v12, %v5685_v20  ;;  %3419 = vmatpush.msra.mxu2 %v3325_v37  ;;  %3379 = vmatpush.msra.mxu0 %v3308_v34  ;;  %v5932_v58 = vld [vmem:[#allocation16 + $0x1d0] sm:$0xff] }
 0x54d   : > { %7464 = vst [vmem:[#allocation50_spill] sm:$0xff] %v5823_v8  ;;  %vm2026_vm15 = vweird.f32 %v5711_v14  ;;  %v2032_v54 = vand.u32 2147483648, %v5711_v14  ;;  %v5838_v53 = vadd.f32 1.1283791, %v2048_v30  ;;  %v2124_v57 = vmul.f32 %v2123_v2, %v5705_v10  ;;  %3460 = vmatpush.msra.mxu3 %v3341_v38 }
 0x54e   : > { %v1994_v7 = vsel %vm5773_vm9, %v1993_v17, %v1989_v21  ;;  %v2161_v30 = vadd.f32 0.00028619796, %v2160_v16  ;;  %v2278_v2 = vmul.f32 %v5823_v8, %v5823_v8  ;;  %v5856_v42 = vadd.f32 %v1794_v0, %v5605_v5  ;;  %v5866_v16 = vld [vmem:[#allocation16 + $0x1e0] sm:$0xff]  ;;  %7476 = vst [vmem:[#allocation56_spill] sm:$0xff] %v5932_v58  ;;  %v3323_v8 = vld [vmem:[#allocation16 + $0xa8] sm:$0xff] }
 0x54f   : > { %v2109_v15 = vsel %vm5849_vm0, %v5707_v13, %v2105_v39  ;;  %v2024_v25 = vmul.f32 %v5765_v44, %v2023_v47  ;;  %v2201_v17 = vadd.f32 0.00028619796, %v2200_v52  ;;  %v5863_v21 = vmul.f32 0.70710677, %v5830_v23  ;;  %4127 = vmatpush.msra.mxu1 %v5866_v16 }
 0x550   : > { %v2063_v0 = vsub.f32 1.0, %v2062_v41  ;;  %v2244_v37 = vmul.f32 %v2243_v62, %v5685_v20  ;;  %v5869_v38 = vadd.f32 1.0, %v2259_v61  ;;  %v5872_v60 = vadd.f32 %v1835_v9, %v5610_v43 }
 0x551   : > { %7467 = vst [vmem:[#allocation51_spill] sm:$0xff] %v5863_v21  ;;  %v1995_v13 = vmul.f32 %v1994_v7, %v5748_v46  ;;  %vm5875_vm1 = vcmp.eq.f32.partialorder %v2030_v63, 8.507059e+37  ;;  %v2033_v47 = vor.u32 1.1754944e-38, %v2032_v54  ;;  %v2125_v52 = vadd.f32 0.05243302, %v2124_v57  ;;  %v1756_v46 = vpop.f32.mrf.mxu0  ;;  %v5894_v7 = vld [vmem:[#allocation16 + $0x1d8] sm:$0xff] }
 0x552   : > { %v2114_v41 = vsel %vm5800_vm12, %v5793_v45, %v2109_v15  ;;  %vm2027_vm2 = vweird.f32 %v5765_v44  ;;  %v5884_v61 = vmin.f32 %v2278_v2, 16.0  ;;  %v5887_v62 = vmul.f32 0.70710677, %v5856_v42  ;;  %4130 = vmatpush.msra.mxu1 %v5894_v7 }
 0x553   : > { %v2025_v63 = vadd.f32 %v5765_v44, %v2024_v25  ;;  %v2162_v9 = vmul.f32 %v2161_v30, %v5782_v6  ;;  %v2202_v54 = vmul.f32 %v2201_v17, %v5791_v49  ;;  %v2398_v57 = vmul.f32 %v5863_v21, %v5863_v21  ;;  %v3307_v25 = vld [vmem:[#allocation16 + $0x28] sm:$0xff]  ;;  %vm5913_vm3 = vmor %vm2026_vm15, %vm2027_vm2 }
 0x554   : > { %7470 = vst [vmem:[#allocation52_spill] sm:$0xff] %v5884_v61  ;;  %v2064_v45 = vmul.f32 %v5798_v3, %v2063_v0  ;;  %v2245_v56 = vadd.f32 0.05243302, %v2244_v37  ;;  %4410 = vrcp.f32 %v5869_v38  ;;  %v5899_v12 = vmul.f32 0.70710677, %v5872_v60  ;;  %3380 = vmatpush.msra.mxu0 %v3307_v25  ;;  %4133 = vmatpush.msra.mxu1 %v5932_v58 }
 0x555   : > { %7471 = vst [vmem:[#allocation53_spill] sm:$0xff] %v5887_v62  ;;  %v4043_v2 = vclamps-f32 %v1995_v13, 1.0  ;;  %v5903_v30 = vmul.f32 %v2114_v41, %v5768_v51  ;;  %v2126_v34 = vmul.f32 %v2125_v52, %v5705_v10  ;;  %v5907_v15 = vadd.f32 %v1756_v46, %v5592_v29 }
 0x556   : > { %7472 = vst [vmem:[#allocation54_spill] sm:$0xff] %v5899_v12  ;;  %vm2066_vm4 = vweird.f32 %v5737_v33  ;;  %vm2067_vm5 = vweird.f32 %v5798_v3  ;;  %v2280_v51 = vmul.f32 2.1237322e-06, %v5884_v61  ;;  %v2318_v0 = vmul.f32 %v5887_v62, %v5887_v62 }
 0x557   : > { %v2029_v37 = vsel %vm5913_vm3, %v5765_v44, %v2025_v63  ;;  %v2163_v13 = vadd.f32 0.0036580483, %v2162_v9  ;;  %v2203_v14 = vadd.f32 0.0036580483, %v2202_v54  ;;  %v5925_v52 = vmin.f32 %v2398_v57, 16.0  ;;  %vm5937_vm6 = vmor %vm2066_vm4, %vm2067_vm5  ;;  %v1879_v57 = vpop.f32.mrf.mxu1 }
 0x558   : > { %v2065_v41 = vadd.f32 %v5798_v3, %v2064_v45  ;;  %v2070_v46 = vand.u32 2147483647, %v5737_v33  ;;  %v2246_v11 = vmul.f32 %v2245_v56, %v5685_v20  ;;  %v2358_v27 = vmul.f32 %v5899_v12, %v5899_v12  ;;  %v3324_v12 = vld [vmem:[#allocation16 + $0xb0] sm:$0xff] }
 0x559   : > { %7475 = vst [vmem:[#allocation55_spill] sm:$0xff] %v5925_v52  ;;  %v4046_v25 = vclamps-f32 %v5903_v30, 1.0  ;;  %v2072_v63 = vand.u32 2147483648, %v5737_v33  ;;  %v2127_v9 = vadd.f32 0.18741608, %v2126_v34  ;;  %v2010_v56 = vmul.f32 %v5795_v40, %v5629_v55  ;;  %v3340_v33 = vld [vmem:[#allocation16 + $0x130] sm:$0xff]  ;;  %3420 = vmatpush.msra.mxu2 %v3324_v12 }
 0x55a   : > { %v5943_v54 = vmul.f32 0.70710677, %v5907_v15  ;;  %v5946_v45 = vpop.eup %4410  ;;  %v2034_v30 = vsel %vm5875_vm1, %v2033_v47, %v2029_v37  ;;  %v2281_v17 = vadd.f32 0.00028619796, %v2280_v51  ;;  %v5952_v32 = vmin.f32 %v2318_v0, 16.0  ;;  %v3306_v34 = vld [vmem:[#allocation16 + $0x20] sm:$0xff]  ;;  %3461 = vmatpush.msra.mxu3 %v3340_v33 }
 0x55b   : > { %v3238_v62 = vadd.f32 1.0, %v4043_v2  ;;  %v2164_v21 = vmul.f32 %v2163_v13, %v5782_v6  ;;  %v2204_v22 = vmul.f32 %v2203_v14, %v5791_v49  ;;  %v2400_v58 = vmul.f32 2.1237322e-06, %v5925_v52  ;;  %v3339_v55 = vld [vmem:[#allocation16 + $0x128] sm:$0xff]  ;;  %3381 = vmatpush.msra.mxu0 %v3306_v34  ;;  %v5968_v0 = vld [vmem:[#allocation16 + $0x1c0] sm:$0xff]  ;;  %3421 = vmatpush.msra.mxu2 %v3323_v8 }
 0x55c   : > { %7479 = vst [vmem:[#allocation57_spill] sm:$0xff] %v5952_v32  ;;  %v5957_v40 = vld [vmem:[#allocation16 + $0x1c8] sm:$0xff]  ;;  %v2069_v39 = vsel %vm5937_vm6, %v5798_v3, %v2065_v41  ;;  %v2247_v47 = vadd.f32 0.18741608, %v2246_v11  ;;  %v5962_v51 = vmin.f32 %v2358_v27, 16.0  ;;  %v5965_v2 = vadd.f32 %v1879_v57, %v5594_v26  ;;  %3462 = vmatpush.msra.mxu3 %v3339_v55  ;;  %v3305_v41 = vld [vmem:[#allocation16 + $0x18] sm:$0xff] }
 0x55d   : > { %4136 = vmatpush.msra.mxu1 %v5957_v40  ;;  %v2035_v12 = vmul.f32 %v2034_v30, %v2010_v56  ;;  %v2073_v37 = vor.u32 1.1754944e-38, %v2072_v63  ;;  %v2262_v13 = vmul.f32 %v5946_v45, %v5869_v38  ;;  %v2438_v14 = vmul.f32 %v5943_v54, %v5943_v54  ;;  %3382 = vmatpush.msra.mxu0 %v3305_v41 }
 0x55e   : > { %7480 = vst [vmem:[#allocation58_spill] sm:$0xff] %v5962_v51  ;;  %vm2071_vm7 = vcmp.eq.f32.partialorder %v2070_v46, 8.507059e+37  ;;  %v2128_v11 = vmul.f32 %v2127_v9, %v5705_v10  ;;  %v2282_v3 = vmul.f32 %v2281_v17, %v5884_v61  ;;  %v2320_v27 = vmul.f32 2.1237322e-06, %v5952_v32 }
 0x55f   : > { %4139 = vmatpush.msra.mxu1 %v5968_v0  ;;  %v2074_v44 = vsel %vm2071_vm7, %v2073_v37, %v2069_v39  ;;  %v2165_v63 = vadd.f32 0.05243302, %v2164_v21  ;;  %v2205_v57 = vadd.f32 0.05243302, %v2204_v22  ;;  %v2401_v56 = vadd.f32 0.00028619796, %v2400_v58  ;;  %v1797_v21 = vpop.f32.mrf.mxu2 }
 0x560   : > { %v2050_v30 = vmul.f32 %v5838_v53, %v5635_v28  ;;  %v2248_v8 = vmul.f32 %v2247_v47, %v5685_v20  ;;  %v2360_v46 = vmul.f32 2.1237322e-06, %v5962_v51  ;;  %v5983_v9 = vmul.f32 0.70710677, %v5965_v2  ;;  %v3322_v53 = vld [vmem:[#allocation16 + $0xa0] sm:$0xff] }
 0x561   : > { %v5985_v17 = vadd.f32 1.0, %v4046_v25  ;;  %v4044_v33 = vclamps-f32 %v2035_v12, 1.0  ;;  %v2263_v34 = vsub.f32 1.0, %v2262_v13  ;;  %v5987_v55 = vmin.f32 %v2438_v14, 16.0  ;;  %v3338_v20 = vld [vmem:[#allocation16 + $0x120] sm:$0xff]  ;;  %3422 = vmatpush.msra.mxu2 %v3322_v53 }
 0x562   : > { %v5990_v58 = vmul.f32 %v3238_v62, %v5697_v59  ;;  %v2075_v22 = vmul.f32 %v2074_v44, %v2050_v30  ;;  %v2283_v39 = vadd.f32 0.0036580483, %v2282_v3  ;;  %v2321_v28 = vadd.f32 0.00028619796, %v2320_v27  ;;  %3463 = vmatpush.msra.mxu3 %v3338_v20  ;;  %v3321_v44 = vld [vmem:[#allocation16 + $0x98] sm:$0xff] }
 0x563   : > { %7481 = vst [vmem:[#allocation59_spill] sm:$0xff] %v5985_v17  ;;  %v2129_v47 = vadd.f32 1.1283791, %v2128_v11  ;;  %v2166_v37 = vmul.f32 %v2165_v63, %v5782_v6  ;;  %v2206_v41 = vmul.f32 %v2205_v57, %v5791_v49  ;;  %v2402_v25 = vmul.f32 %v2401_v56, %v5925_v52  ;;  %3423 = vmatpush.msra.mxu2 %v3321_v44  ;;  %v6064_v17 = vld [vmem:[#allocation16 + $0x1a8] sm:$0xff] }
 0x564   : > { %7482 = vst [vmem:[#allocation60_spill] sm:$0xff] %v5987_v55  ;;  %v2249_v12 = vadd.f32 1.1283791, %v2248_v8  ;;  %v2361_v13 = vadd.f32 0.00028619796, %v2360_v46  ;;  %v2558_v59 = vmul.f32 %v5983_v9, %v5983_v9  ;;  %v5998_v62 = vadd.f32 %v1797_v21, %v5605_v5  ;;  %v1838_v8 = vpop.f32.mrf.mxu3  ;;  %v3337_v46 = vld [vmem:[#allocation16 + $0x118] sm:$0xff] }
 0x565   : > { %v6000_v14 = vadd.f32 1.0, %v4044_v33  ;;  %v2264_v11 = vmul.f32 %v5946_v45, %v2263_v34  ;;  %v6004_v3 = vmul.f32 0.5, %v5785_v50  ;;  %v2440_v27 = vmul.f32 2.1237322e-06, %v5987_v55  ;;  %v3304_v33 = vld [vmem:[#allocation16 + $0x10] sm:$0xff]  ;;  %v6012_v21 = vld [vmem:[#allocation16 + $0x1b8] sm:$0xff]  ;;  %3464 = vmatpush.msra.mxu3 %v3337_v46 }
 0x566   : > { %v4045_v63 = vclamps-f32 %v2075_v22, 1.0  ;;  %v2284_v57 = vmul.f32 %v2283_v39, %v5884_v61  ;;  %v6009_v56 = vmul.f32 0.5, %v5830_v23  ;;  %v2322_v30 = vmul.f32 %v2321_v28, %v5952_v32  ;;  %3383 = vmatpush.msra.mxu0 %v3304_v33  ;;  %4142 = vmatpush.msra.mxu1 %v6012_v21 }
 0x567   : > { %7483 = vst [vmem:[#allocation61_spill] sm:$0xff] %v6004_v3  ;;  %v6015_v50 = vmul.f32 %v2129_v47, %v5683_v31  ;;  %v2167_v34 = vadd.f32 0.18741608, %v2166_v37  ;;  %v2207_v53 = vadd.f32 0.18741608, %v2206_v41  ;;  %v2362_v23 = vmul.f32 %v2361_v13, %v5962_v51  ;;  %v1759_v13 = vpop.f32.mrf.mxu0 }
 0x568   : > { %7484 = vst [vmem:[#allocation62_spill] sm:$0xff] %v6009_v56  ;;  %v2403_v20 = vadd.f32 0.0036580483, %v2402_v25  ;;  %v2270_v22 = vand.u32 2147483647, %v5869_v38  ;;  %v6019_v39 = vmin.f32 %v2558_v59, 16.0  ;;  %v2265_v44 = vadd.f32 %v5946_v45, %v2264_v11 }
 0x569   : > { %7485 = vst [vmem:[#allocation63_spill] sm:$0xff] %v6015_v50  ;;  %v6022_v28 = vmul.f32 0.70710677, %v5998_v62  ;;  %vm2267_vm8 = vweird.f32 %v5946_v45  ;;  %v2441_v31 = vadd.f32 0.00028619796, %v2440_v27  ;;  %v6028_v47 = vadd.f32 %v1838_v8, %v5610_v43 }
 0x56a   : > { %vm2266_vm9 = vweird.f32 %v5869_v38  ;;  %v2272_v37 = vand.u32 2147483648, %v5869_v38  ;;  %v2285_v41 = vadd.f32 0.05243302, %v2284_v57  ;;  %v2323_v25 = vadd.f32 0.0036580483, %v2322_v30  ;;  %v1882_v57 = vpop.f32.mrf.mxu1 }
 0x56b   : > { %v3240_v59 = vadd.f32 1.0, %v4045_v63  ;;  %v2168_v46 = vmul.f32 %v2167_v34, %v5782_v6  ;;  %v2208_v33 = vmul.f32 %v2207_v53, %v5791_v49  ;;  %v2404_v11 = vmul.f32 %v2403_v20, %v5925_v52  ;;  %vm6035_vm10 = vmor %vm2266_vm9, %vm2267_vm8 }
 0x56c   : > { %vm6039_vm11 = vcmp.eq.f32.partialorder %v2270_v22, 8.507059e+37  ;;  %v2363_v8 = vadd.f32 0.0036580483, %v2362_v23  ;;  %v2560_v38 = vmul.f32 2.1237322e-06, %v6019_v39  ;;  %v2478_v63 = vmul.f32 %v6022_v28, %v6022_v28  ;;  %v6056_v22 = vld [vmem:[#allocation16 + $0x1b0] sm:$0xff] }
 0x56d   : > { %v2269_v30 = vsel %vm6035_vm10, %v5946_v45, %v2265_v44  ;;  %v2442_v34 = vmul.f32 %v2441_v31, %v5987_v55  ;;  %v6051_v53 = vmul.f32 0.70710677, %v6028_v47  ;;  %v6054_v20 = vadd.f32 %v1759_v13, %v5592_v29  ;;  %4145 = vmatpush.msra.mxu1 %v6056_v22  ;;  %v3303_v45 = vld [vmem:[#allocation16 + $0x8] sm:$0xff] }
 0x56e   : > { %v2273_v23 = vor.u32 1.1754944e-38, %v2272_v37  ;;  %v2286_v56 = vmul.f32 %v2285_v41, %v5884_v61  ;;  %v6060_v3 = vmul.f32 0.5, %v5856_v42  ;;  %v2324_v50 = vmul.f32 %v2323_v25, %v5952_v32  ;;  %3384 = vmatpush.msra.mxu0 %v3303_v45  ;;  %v1841_v45 = vpop.f32.mrf.mxu3 }
 0x56f   : > { %v2250_v44 = vmul.f32 %v2249_v12, %v5666_v48  ;;  %v2169_v31 = vadd.f32 1.1283791, %v2168_v46  ;;  %v2209_v13 = vadd.f32 1.1283791, %v2208_v33  ;;  %v2405_v49 = vadd.f32 0.05243302, %v2404_v11  ;;  %4148 = vmatpush.msra.mxu1 %v6064_v17 }
 0x570   : > { %7490 = vst [vmem:[#allocation64_spill] sm:$0xff] %v6060_v3  ;;  %v2274_v37 = vsel %vm6039_vm11, %v2273_v23, %v2269_v30  ;;  %v2364_v41 = vmul.f32 %v2363_v8, %v5962_v51  ;;  %v2561_v42 = vadd.f32 0.00028619796, %v2560_v38  ;;  %v6070_v3 = vmin.f32 %v2478_v63, 16.0  ;;  %v3302_v46 = vld [vmem:[#allocation16] sm:$0xff] }
 0x571   : > { %v6075_v25 = vmul.f32 %v6000_v14, %v5718_v35  ;;  %v2443_v6 = vadd.f32 0.0036580483, %v2442_v34  ;;  %v2518_v48 = vmul.f32 %v6051_v53, %v6051_v53  ;;  %v6080_v12 = vmul.f32 0.70710677, %v6054_v20  ;;  %v6082_v33 = vld [vmem:[#allocation16 + $0x1a0] sm:$0xff]  ;;  %v3320_v35 = vld [vmem:[#allocation16 + $0x90] sm:$0xff]  ;;  %3385 = vmatpush.msra.mxu0 %v3302_v46 }
 0x572   : > { %v6085_v11 = vmul.f32 %v3240_v59, %v5721_v18  ;;  %v2287_v27 = vadd.f32 0.18741608, %v2286_v56  ;;  %v2325_v8 = vadd.f32 0.05243302, %v2324_v50  ;;  %v6088_v38 = vadd.f32 %v1882_v57, %v5594_v26  ;;  %v3336_v14 = vld [vmem:[#allocation16 + $0x110] sm:$0xff]  ;;  %4151 = vmatpush.msra.mxu1 %v6082_v33  ;;  %v1800_v18 = vpop.f32.mrf.mxu2  ;;  %3424 = vmatpush.msra.mxu2 %v3320_v35 }
 0x573   : > { %v2275_v63 = vmul.f32 %v2274_v37, %v2250_v44  ;;  %v2406_v30 = vmul.f32 %v2405_v49, %v5925_v52  ;;  %v6093_v34 = vmul.f32 0.5, %v5872_v60  ;;  %v6096_v23 = vmul.f32 0.5, %v5907_v15  ;;  %3465 = vmatpush.msra.mxu3 %v3336_v14  ;;  %v1762_v44 = vpop.f32.mrf.mxu0  ;;  %v3319_v49 = vld [vmem:[#allocation16 + $0x88] sm:$0xff]  ;;  %3386 = vmatmul.f32.vlgmr.msra.gmra.mxu0 %v5990_v58 }
 0x574   : > { %v6099_v56 = vmul.f32 %v2169_v31, %v5740_v4  ;;  %v2365_v50 = vadd.f32 0.05243302, %v2364_v41  ;;  %v2562_v59 = vmul.f32 %v2561_v42, %v6019_v39  ;;  %v2480_v57 = vmul.f32 2.1237322e-06, %v6070_v3  ;;  %3425 = vmatpush.msra.mxu2 %v3319_v49  ;;  %v3335_v31 = vld [vmem:[#allocation16 + $0x108] sm:$0xff]  ;;  %v6112_v41 = vld [vmem:[#allocation16 + $0x198] sm:$0xff]  ;;  %3493 = vmatpush.msrb.mxu0 %v5745_v24 }
 0x575   : > { %7491 = vst [vmem:[#allocation65_spill] sm:$0xff] %v6093_v34  ;;  %v6105_v60 = vmul.f32 %v2209_v13, %v5743_v36  ;;  %v2444_v15 = vmul.f32 %v2443_v6, %v5987_v55  ;;  %v6108_v37 = vmin.f32 %v2518_v48, 16.0  ;;  %v2598_v4 = vmul.f32 %v6080_v12, %v6080_v12  ;;  %v1885_v13 = vpop.f32.mrf.mxu1  ;;  %3466 = vmatpush.msra.mxu3 %v3335_v31 }
 0x576   : > { %7492 = vst [vmem:[#allocation66_spill] sm:$0xff] %v6096_v23  ;;  %v2288_v42 = vmul.f32 %v2287_v27, %v5884_v61  ;;  %v2326_v58 = vmul.f32 %v2325_v8, %v5952_v32  ;;  %v6118_v36 = vmul.f32 0.70710677, %v6088_v38  ;;  %v6121_v6 = vadd.f32 %v1800_v18, %v5605_v5  ;;  %4154 = vmatpush.msra.mxu1 %v6112_v41 }
 0x577   : > { %7493 = vst [vmem:[#allocation67_spill] sm:$0xff] %v6099_v56  ;;  %v4050_v48 = vclamps-f32 %v2275_v63, 1.0  ;;  %v2407_v46 = vadd.f32 0.18741608, %v2406_v30  ;;  %v6125_v35 = vadd.f32 %v1841_v45, %v5610_v43  ;;  %v6128_v14 = vadd.f32 %v1762_v44, %v5592_v29  ;;  %3494 = vmatpush.msrb.mxu0 %v5754_v1  ;;  %v7501_v56 = vld [vmem:[#allocation50_spill] sm:$0xff] }
 0x578   : > { %7494 = vst [vmem:[#allocation68_spill] sm:$0xff] %v6105_v60  ;;  %v2366_v27 = vmul.f32 %v2365_v50, %v5962_v51  ;;  %v6133_v8 = vmul.f32 0.5, %v5965_v2  ;;  %v2563_v18 = vadd.f32 0.0036580483, %v2562_v59  ;;  %v2481_v49 = vadd.f32 0.00028619796, %v2480_v57 }
 0x579   : > { %7495 = vst [vmem:[#allocation69_spill] sm:$0xff] %v6118_v36  ;;  %v2445_v31 = vadd.f32 0.05243302, %v2444_v15  ;;  %v2520_v23 = vmul.f32 2.1237322e-06, %v6108_v37  ;;  %v6136_v63 = vmin.f32 %v2598_v4, 16.0  ;;  %v6139_v30 = vadd.f32 %v1885_v13, %v5594_v26  ;;  %3495 = vmatpush.msrb.mxu0 %v5841_v19 }
 0x57a   : > { %7496 = vst [vmem:[#allocation70_spill] sm:$0xff] %v6133_v8  ;;  %v2289_v45 = vadd.f32 1.1283791, %v2288_v42  ;;  %v2327_v44 = vadd.f32 0.18741608, %v2326_v58  ;;  %v2718_v50 = vmul.f32 %v6118_v36, %v6118_v36  ;;  %v3245_v59 = vadd.f32 1.0, %v4050_v48  ;;  %v1803_v10 = vpop.f32.mrf.mxu2 }
 0x57b   : > { %v6145_v2 = vmul.f32 0.70710677, %v6121_v6  ;;  %v2408_v57 = vmul.f32 %v2407_v46, %v5925_v52  ;;  %v6149_v15 = vmul.f32 0.70710677, %v6125_v35  ;;  %v6152_v4 = vmul.f32 0.70710677, %v6128_v14  ;;  %3496 = vmatpush.msrb.mxu0 %v5866_v16 }
 0x57c   : > { %v2367_v13 = vadd.f32 0.18741608, %v2366_v27  ;;  %v2564_v42 = vmul.f32 %v2563_v18, %v6019_v39  ;;  %v6157_v58 = vmul.f32 0.5, %v5998_v62  ;;  %v2482_v8 = vmul.f32 %v2481_v49, %v6070_v3  ;;  %v7503_v49 = vld [vmem:[#allocation45_spill] sm:$0xff]  ;;  %v7504_v36 = vld [vmem:[#allocation56_spill] sm:$0xff] }
 0x57d   : > { %7497 = vst [vmem:[#allocation71_spill] sm:$0xff] %v6145_v2  ;;  %v2446_v48 = vmul.f32 %v2445_v31, %v5987_v55  ;;  %v2521_v34 = vadd.f32 0.00028619796, %v2520_v23  ;;  %v2600_v46 = vmul.f32 2.1237322e-06, %v6136_v63  ;;  %3497 = vmatpush.msrb.mxu0 %v5894_v7  ;;  %v6167_v52 = vmul.f32 %v2289_v45, %v7501_v56 }
 0x57e   : > { %7498 = vst [vmem:[#allocation72_spill] sm:$0xff] %v6149_v15  ;;  %v6163_v60 = vmul.f32 0.70710677, %v6139_v30  ;;  %v2328_v27 = vmul.f32 %v2327_v44, %v5952_v32  ;;  %v6170_v18 = vmin.f32 %v2718_v50, 16.0  ;;  %v2638_v62 = vmul.f32 %v6145_v2, %v6145_v2  ;;  %v6184_v32 = vld [vmem:[#allocation16 + $0x190] sm:$0xff]  ;;  %v3334_v2 = vld [vmem:[#allocation16 + $0x100] sm:$0xff] }
 0x57f   : > { %7499 = vst [vmem:[#allocation73_spill] sm:$0xff] %v6152_v4  ;;  %v3277_v31 = vmul.f32 %v3245_v59, %v7503_v49  ;;  %v2409_v23 = vadd.f32 1.1283791, %v2408_v57  ;;  %v2758_v61 = vmul.f32 %v6152_v4, %v6152_v4  ;;  %3498 = vmatpush.msrb.mxu0 %v7504_v36  ;;  %v2368_v56 = vmul.f32 %v2367_v13, %v5962_v51 }
 0x580   : > { %7500 = vst [vmem:[#allocation74_spill] sm:$0xff] %v6157_v58  ;;  %v2678_v58 = vmul.f32 %v6149_v15, %v6149_v15  ;;  %v2565_v45 = vadd.f32 0.05243302, %v2564_v42  ;;  %v2483_v44 = vadd.f32 0.0036580483, %v2482_v8  ;;  %v6182_v50 = vmul.f32 0.5, %v6028_v47  ;;  %4157 = vmatpush.msra.mxu1 %v6184_v32  ;;  %3467 = vmatpush.msra.mxu3 %v3334_v2 }
 0x581   : > { %7502 = vst [vmem:[#allocation50_spill] sm:$0xff] %v6167_v52  ;;  %v1844_v52 = vpop.f32.mrf.mxu3  ;;  %v2447_v59 = vadd.f32 0.18741608, %v2446_v48  ;;  %v2522_v57 = vmul.f32 %v2521_v34, %v6108_v37  ;;  %v2601_v49 = vadd.f32 0.00028619796, %v2600_v46  ;;  %v2878_v4 = vmul.f32 %v6163_v60, %v6163_v60  ;;  %v3318_v15 = vld [vmem:[#allocation16 + $0x80] sm:$0xff]  ;;  %3499 = vmatpush.msrb.mxu0 %v5957_v40  ;;  %3468 = vmatmul.f32.vlgmr.msra.gmra.mxu3 %v6085_v11 }
 0x582   : > { %7505 = vst [vmem:[#allocation45_spill] sm:$0xff] %v6182_v50  ;;  %v2329_v8 = vadd.f32 1.1283791, %v2328_v27  ;;  %v2720_v47 = vmul.f32 2.1237322e-06, %v6170_v18  ;;  %v6192_v13 = vmin.f32 %v2638_v62, 16.0  ;;  %v6195_v42 = vadd.f32 %v1803_v10, %v5605_v5  ;;  %3426 = vmatpush.msra.mxu2 %v3318_v15  ;;  %4120 = vmatpush.msrb.mxu3 %v5745_v24 }
 0x583   : > { %v6197_v34 = vld [vmem:[#allocation16 + $0x188] sm:$0xff]  ;;  %v6202_v50 = vmin.f32 %v2678_v58, 16.0  ;;  %v6204_v51 = vmin.f32 %v2758_v61, 16.0  ;;  %v6207_v27 = vadd.f32 %v1844_v52, %v5610_v43  ;;  %3427 = vmatmul.f32.vlgmr.msra.gmra.mxu2 %v6075_v25  ;;  %v6211_v10 = vld [vmem:[#allocation16 + $0x180] sm:$0xff]  ;;  %v2369_v15 = vadd.f32 1.1283791, %v2368_v56  ;;  %v1765_v58 = vpop.f32.mrf.mxu0  ;;  %3500 = vmatpush.msrb.mxu0 %v5968_v0 }
 0x584   : > { %v7506_v48 = vld [vmem:[#allocation51_spill] sm:$0xff]  ;;  %4160 = vmatpush.msra.mxu1 %v6197_v34  ;;  %v2566_v2 = vmul.f32 %v2565_v45, %v6019_v39  ;;  %v2484_v62 = vmul.f32 %v2483_v44, %v6070_v3  ;;  %4119 = vmatpush.msrb.mxu2 %v5745_v24  ;;  %v2448_v61 = vmul.f32 %v2447_v59, %v5987_v55  ;;  %v2523_v52 = vadd.f32 0.0036580483, %v2522_v57  ;;  %v7509_v56 = vld [vmem:[#allocation53_spill] sm:$0xff] }
 0x585   : > { %v6200_v46 = vmul.f32 %v2409_v23, %v7506_v48  ;;  %v6216_v23 = vmul.f32 0.5, %v6054_v20  ;;  %v2602_v25 = vmul.f32 %v2601_v49, %v6136_v63  ;;  %v6222_v48 = vmin.f32 %v2878_v4, 16.0  ;;  %4123 = vmatpush.msrb.mxu3 %v5754_v1  ;;  %v7511_v49 = vld [vmem:[#allocation54_spill] sm:$0xff]  ;;  %3501 = vmatpush.msrb.mxu0 %v6012_v21 }
 0x586   : > { %4163 = vmatpush.msra.mxu1 %v6211_v10  ;;  %v6227_v45 = vmul.f32 %v2329_v8, %v7509_v56  ;;  %v2721_v20 = vadd.f32 0.00028619796, %v2720_v47  ;;  %v2640_v44 = vmul.f32 2.1237322e-06, %v6192_v13  ;;  %v6231_v11 = vmul.f32 0.70710677, %v6195_v42  ;;  %4122 = vmatpush.msrb.mxu2 %v5754_v1 }
 0x587   : > { %7507 = vst [vmem:[#allocation56_spill] sm:$0xff] %v6200_v46  ;;  %3512 = vmatmul.f32.vlgmr.msra.gmra.mxu1 %v3277_v31  ;;  %v2680_v59 = vmul.f32 2.1237322e-06, %v6202_v50  ;;  %v2760_v4 = vmul.f32 2.1237322e-06, %v6204_v51  ;;  %v6240_v57 = vadd.f32 %v1765_v58, %v5592_v29  ;;  %v6245_v8 = vmul.f32 %v2369_v15, %v7511_v49  ;;  %4126 = vmatpush.msrb.mxu3 %v5841_v19 }
 0x588   : > { %7508 = vst [vmem:[#allocation51_spill] sm:$0xff] %v6216_v23  ;;  %v6237_v24 = vmul.f32 0.70710677, %v6207_v27  ;;  %v2567_v31 = vadd.f32 0.18741608, %v2566_v2  ;;  %v6248_v56 = vmul.f32 0.5, %v6088_v38  ;;  %v1888_v23 = vpop.f32.mrf.mxu1  ;;  %4125 = vmatpush.msrb.mxu2 %v5841_v19  ;;  %v2524_v46 = vmul.f32 %v2523_v52, %v6108_v37  ;;  %3502 = vmatpush.msrb.mxu0 %v6056_v22 }
 0x589   : > { %7510 = vst [vmem:[#allocation53_spill] sm:$0xff] %v6227_v45  ;;  %v2485_v47 = vadd.f32 0.05243302, %v2484_v62  ;;  %v2449_v45 = vadd.f32 1.1283791, %v2448_v61  ;;  %v2722_v1 = vmul.f32 %v2721_v20, %v6170_v18  ;;  %v2798_v38 = vmul.f32 %v6231_v11, %v6231_v11  ;;  %v1806_v62 = vpop.f32.mrf.mxu2  ;;  %4129 = vmatpush.msrb.mxu3 %v5866_v16 }
 0x58a   : > { %7512 = vst [vmem:[#allocation54_spill] sm:$0xff] %v6248_v56  ;;  %v2603_v58 = vadd.f32 0.0036580483, %v2602_v25  ;;  %v2880_v55 = vmul.f32 2.1237322e-06, %v6222_v48  ;;  %4128 = vmatpush.msrb.mxu2 %v5866_v16  ;;  %v2838_v25 = vmul.f32 %v6237_v24, %v6237_v24  ;;  %v6265_v19 = vadd.f32 %v1888_v23, %v5594_v26  ;;  %3503 = vmatpush.msrb.mxu0 %v6064_v17 }
 0x58b   : > { %v2641_v15 = vadd.f32 0.00028619796, %v2640_v44  ;;  %v6259_v2 = vmul.f32 0.70710677, %v6240_v57  ;;  %v2681_v61 = vadd.f32 0.00028619796, %v2680_v59  ;;  %v2568_v20 = vmul.f32 %v2567_v31, %v6019_v39  ;;  %4132 = vmatpush.msrb.mxu3 %v5894_v7 }
 0x58c   : > { %v2761_v52 = vadd.f32 0.00028619796, %v2760_v4  ;;  %7513 = vst [vmem:[#allocation75_spill] sm:$0xff] %v6265_v19  ;;  %v2486_v44 = vmul.f32 %v2485_v47, %v6070_v3  ;;  %v6272_v49 = vmul.f32 0.5, %v6121_v6  ;;  %4131 = vmatpush.msrb.mxu2 %v5894_v7  ;;  %v2525_v4 = vadd.f32 0.05243302, %v2524_v46  ;;  %3504 = vmatpush.msrb.mxu0 %v6082_v33 }
 0x58d   : > { %v2918_v59 = vmul.f32 %v6259_v2, %v6259_v2  ;;  %v2604_v23 = vmul.f32 %v2603_v58, %v6136_v63  ;;  %v2881_v56 = vadd.f32 0.00028619796, %v2880_v55  ;;  %v6279_v16 = vadd.f32 %v1806_v62, %v5605_v5  ;;  %4135 = vmatpush.msrb.mxu3 %v7504_v36 }
 0x58e   : > { %7514 = vst [vmem:[#allocation76_spill] sm:$0xff] %v6272_v49  ;;  %v2723_v31 = vadd.f32 0.0036580483, %v2722_v1  ;;  %v2642_v6 = vmul.f32 %v2641_v15, %v6192_v13  ;;  %v6284_v47 = vmin.f32 %v2798_v38, 16.0  ;;  %v6287_v49 = vmul.f32 0.70710677, %v6265_v19  ;;  %4134 = vmatpush.msrb.mxu2 %v7504_v36  ;;  %v1847_v19 = vpop.f32.mrf.mxu3  ;;  %3505 = vmatpush.msrb.mxu0 %v6112_v41 }
 0x58f   : > { %v6291_v46 = vmul.f32 %v2449_v45, %v5943_v54  ;;  %v2682_v55 = vmul.f32 %v2681_v61, %v6202_v50  ;;  %v2762_v58 = vmul.f32 %v2761_v52, %v6204_v51  ;;  %v6295_v7 = vmin.f32 %v2838_v25, 16.0  ;;  %4138 = vmatpush.msrb.mxu3 %v5957_v40 }
 0x590   : > { %v2569_v1 = vadd.f32 1.1283791, %v2568_v20  ;;  %v2487_v15 = vadd.f32 0.18741608, %v2486_v44  ;;  %v6299_v38 = vmin.f32 %v2918_v59, 16.0  ;;  %v3038_v62 = vmul.f32 %v6287_v49, %v6287_v49  ;;  %4137 = vmatpush.msrb.mxu2 %v5957_v40  ;;  %3506 = vmatpush.msrb.mxu0 %v6184_v32 }
 0x591   : > { %7515 = vst [vmem:[#allocation77_spill] sm:$0xff] %v6291_v46  ;;  %v2526_v54 = vmul.f32 %v2525_v4, %v6108_v37  ;;  %v2605_v45 = vadd.f32 0.05243302, %v2604_v23  ;;  %v2882_v61 = vmul.f32 %v2881_v56, %v6222_v48  ;;  %v6307_v52 = vmul.f32 0.70710677, %v6279_v16  ;;  %4141 = vmatpush.msrb.mxu3 %v5968_v0 }
 0x592   : > { %v2724_v36 = vmul.f32 %v2723_v31, %v6170_v18  ;;  %v2643_v25 = vadd.f32 0.0036580483, %v2642_v6  ;;  %v2800_v20 = vmul.f32 2.1237322e-06, %v6284_v47  ;;  %v6313_v44 = vmin.f32 %v3038_v62, 16.0  ;;  %4140 = vmatpush.msrb.mxu2 %v5968_v0  ;;  %3507 = vmatpush.msrb.mxu0 %v6197_v34 }
 0x593   : > { %v2683_v59 = vadd.f32 0.0036580483, %v2682_v55  ;;  %v2763_v4 = vadd.f32 0.0036580483, %v2762_v58  ;;  %v2840_v56 = vmul.f32 2.1237322e-06, %v6295_v7  ;;  %v6318_v23 = vadd.f32 %v1847_v19, %v5610_v43  ;;  %4144 = vmatpush.msrb.mxu3 %v6012_v21 }
 0x594   : > { %v6323_v40 = vmul.f32 0.5, %v6125_v35  ;;  %v6326_v31 = vmul.f32 0.5, %v6128_v14  ;;  %v2920_v6 = vmul.f32 2.1237322e-06, %v6299_v38  ;;  %v3051_v55 = vmul.f32 3.8918573e-05, %v6313_v44  ;;  %4143 = vmatpush.msrb.mxu2 %v6012_v21  ;;  %3508 = vmatpush.msrb.mxu0 %v6211_v10 }
 0x595   : > { %v2488_v58 = vmul.f32 %v2487_v15, %v6070_v3  ;;  %v2527_v19 = vadd.f32 0.18741608, %v2526_v54  ;;  %v2883_v62 = vadd.f32 0.0036580483, %v2882_v61  ;;  %v2958_v0 = vmul.f32 %v6307_v52, %v6307_v52  ;;  %4147 = vmatpush.msrb.mxu3 %v6056_v22 }
 0x596   : > { %7516 = vst [vmem:[#allocation78_spill] sm:$0xff] %v6323_v40  ;;  %v2606_v35 = vmul.f32 %v2605_v45, %v6136_v63  ;;  %v2725_v14 = vadd.f32 0.05243302, %v2724_v36  ;;  %v2801_v40 = vadd.f32 0.00028619796, %v2800_v20  ;;  %4146 = vmatpush.msrb.mxu2 %v6056_v22  ;;  %v2684_v46 = vmul.f32 %v2683_v59, %v6202_v50 }
 0x597   : > { %7517 = vst [vmem:[#allocation79_spill] sm:$0xff] %v6326_v31  ;;  %v2644_v31 = vmul.f32 %v2643_v25, %v6192_v13  ;;  %v2764_v15 = vmul.f32 %v2763_v4, %v6204_v51  ;;  %v2841_v54 = vadd.f32 0.00028619796, %v2840_v56  ;;  %v6342_v61 = vmul.f32 0.70710677, %v6318_v23  ;;  %4150 = vmatpush.msrb.mxu3 %v6064_v17 }
 0x598   : > { %v6347_v21 = vmul.f32 %v2569_v1, %v5983_v9  ;;  %v2921_v45 = vadd.f32 0.00028619796, %v2920_v6  ;;  %v3040_v36 = vmul.f32 2.1237322e-06, %v6313_v44  ;;  %v3052_v25 = vadd.f32 0.001143296, %v3051_v55  ;;  %4149 = vmatpush.msrb.mxu2 %v6064_v17 }
 0x599   : > { %v2489_v20 = vadd.f32 1.1283791, %v2488_v58  ;;  %v2884_v59 = vmul.f32 %v2883_v62, %v6222_v48  ;;  %v6352_v4 = vmin.f32 %v2958_v0, 16.0  ;;  %v2998_v56 = vmul.f32 %v6342_v61, %v6342_v61  ;;  %4153 = vmatpush.msrb.mxu3 %v6082_v33 }
 0x59a   : > { %7518 = vst [vmem:[#allocation80_spill] sm:$0xff] %v6347_v21  ;;  %v2528_v22 = vmul.f32 %v2527_v19, %v6108_v37  ;;  %v2645_v9 = vadd.f32 0.05243302, %v2644_v31  ;;  %v6359_v1 = vmul.f32 0.5, %v6139_v30  ;;  %v2802_v6 = vmul.f32 %v2801_v40, %v6284_v47  ;;  %4152 = vmatpush.msrb.mxu2 %v6082_v33  ;;  %v1768_v21 = vpop.f32.mrf.mxu0 }
 0x59b   : > { %v2607_v55 = vadd.f32 0.18741608, %v2606_v35  ;;  %v2726_v58 = vmul.f32 %v2725_v14, %v6170_v18  ;;  %v2685_v62 = vadd.f32 0.05243302, %v2684_v46  ;;  %v2765_v0 = vadd.f32 0.05243302, %v2764_v15  ;;  %4156 = vmatpush.msrb.mxu3 %v6112_v41 }
 0x59c   : > { %v2842_v17 = vmul.f32 %v2841_v54, %v6295_v7  ;;  %v2922_v19 = vmul.f32 %v2921_v45, %v6299_v38  ;;  %v3041_v31 = vadd.f32 0.00028619796, %v3040_v36  ;;  %v3053_v30 = vmul.f32 %v3052_v25, %v6313_v44  ;;  %4155 = vmatpush.msrb.mxu2 %v6112_v41 }
 0x59d   : > { %v6370_v40 = vmul.f32 %v2489_v20, %v6022_v28  ;;  %v2885_v35 = vadd.f32 0.05243302, %v2884_v59  ;;  %v2960_v14 = vmul.f32 2.1237322e-06, %v6352_v4  ;;  %v6373_v46 = vmin.f32 %v2998_v56, 16.0  ;;  %v1891_v59 = vpop.f32.mrf.mxu1  ;;  %4159 = vmatpush.msrb.mxu3 %v6184_v32 }
 0x59e   : > { %v2529_v33 = vadd.f32 1.1283791, %v2528_v22  ;;  %v2646_v15 = vmul.f32 %v2645_v9, %v6192_v13  ;;  %v2803_v54 = vadd.f32 0.0036580483, %v2802_v6  ;;  %v6378_v45 = vadd.f32 %v1768_v21, %v5592_v29  ;;  %4158 = vmatpush.msrb.mxu2 %v6184_v32 }
 0x59f   : > { %v2608_v36 = vmul.f32 %v2607_v55, %v6136_v63  ;;  %v2727_v28 = vadd.f32 0.18741608, %v2726_v58  ;;  %v2686_v25 = vmul.f32 %v2685_v62, %v6202_v50  ;;  %v2766_v20 = vmul.f32 %v2765_v0, %v6204_v51  ;;  %4162 = vmatpush.msrb.mxu3 %v6197_v34 }
 0x5a0   : > { %v2843_v41 = vadd.f32 0.0036580483, %v2842_v17  ;;  %v2923_v56 = vadd.f32 0.0036580483, %v2922_v19  ;;  %v3042_v22 = vmul.f32 %v3041_v31, %v6313_v44  ;;  %v3054_v9 = vadd.f32 0.014752088, %v3053_v30  ;;  %4161 = vmatpush.msrb.mxu2 %v6197_v34 }
 0x5a1   : > { %v2886_v29 = vmul.f32 %v2885_v35, %v6222_v48  ;;  %v6389_v21 = vmul.f32 0.5, %v6195_v42  ;;  %v2961_v6 = vadd.f32 0.00028619796, %v2960_v14  ;;  %v3000_v55 = vmul.f32 2.1237322e-06, %v6373_v46  ;;  %4165 = vmatpush.msrb.mxu3 %v6211_v10 }
 0x5a2   : > { %v2647_v58 = vadd.f32 0.18741608, %v2646_v15  ;;  %v2804_v32 = vmul.f32 %v2803_v54, %v6284_v47  ;;  %v6395_v62 = vmul.f32 0.70710677, %v6378_v45  ;;  %v6398_v0 = vadd.f32 %v1891_v59, %v5594_v26  ;;  %4164 = vmatpush.msrb.mxu2 %v6211_v10 }
 0x5a3   : > { %7519 = vst [vmem:[#allocation81_spill] sm:$0xff] %v6389_v21  ;;  %v2609_v17 = vadd.f32 1.1283791, %v2608_v36  ;;  %v2728_v42 = vmul.f32 %v2727_v28, %v6170_v18  ;;  %v2687_v19 = vadd.f32 0.18741608, %v2686_v25  ;;  %v2844_v34 = vmul.f32 %v2843_v41, %v6295_v7  ;;  %v7552_v21 = vld [vmem:[#allocation58_spill] sm:$0xff] }
 0x5a4   : > { %7520 = vst [vmem:[#allocation82_spill] sm:$0xff] %v6395_v62  ;;  %v2767_v31 = vadd.f32 0.18741608, %v2766_v20  ;;  %v2924_v30 = vmul.f32 %v2923_v56, %v6299_v38  ;;  %v3043_v35 = vadd.f32 0.0036580483, %v3042_v22  ;;  %v3055_v14 = vmul.f32 %v3054_v9, %v6313_v44 }
 0x5a5   : > { %7521 = vst [vmem:[#allocation83_spill] sm:$0xff] %v6398_v0  ;;  %v6407_v15 = vmul.f32 %v2529_v33, %v6051_v53  ;;  %v2887_v26 = vadd.f32 0.18741608, %v2886_v29  ;;  %v2962_v54 = vmul.f32 %v2961_v6, %v6352_v4  ;;  %v3001_v36 = vadd.f32 0.00028619796, %v3000_v55 }
 0x5a6   : > { %v2648_v28 = vmul.f32 %v2647_v58, %v6192_v13  ;;  %v2805_v25 = vadd.f32 0.05243302, %v2804_v32  ;;  %v3078_v10 = vmul.f32 %v6395_v62, %v6395_v62  ;;  %v6414_v20 = vmul.f32 0.70710677, %v6398_v0  ;;  %v7526_v0 = vld [vmem:[#allocation43_spill] sm:$0xff] }
 0x5a7   : > { %v6417_v59 = vmul.f32 %v2609_v17, %v6080_v12  ;;  %v2729_v41 = vadd.f32 1.1283791, %v2728_v42  ;;  %v2688_v53 = vmul.f32 %v2687_v19, %v6202_v50  ;;  %v2768_v33 = vmul.f32 %v2767_v31, %v6204_v51  ;;  %v7524_v31 = vld [vmem:[#allocation69_spill] sm:$0xff] }
 0x5a8   : > { %7522 = vst [vmem:[#allocation84_spill] sm:$0xff] %v6414_v20  ;;  %v2845_v56 = vadd.f32 0.05243302, %v2844_v34  ;;  %v2925_v22 = vadd.f32 0.05243302, %v2924_v30  ;;  %v3044_v9 = vmul.f32 %v3043_v35, %v6313_v44  ;;  %v2888_v6 = vmul.f32 %v2887_v26, %v6222_v48 }
 0x5a9   : > { %v3056_v29 = vadd.f32 0.112945676, %v3055_v14  ;;  %v6424_v55 = vmul.f32 0.5, %v6207_v27  ;;  %v2963_v58 = vadd.f32 0.0036580483, %v2962_v54  ;;  %v3002_v32 = vmul.f32 %v3001_v36, %v6373_v46 }
 0x5aa   : > { %v2649_v12 = vadd.f32 1.1283791, %v2648_v28  ;;  %v2806_v17 = vmul.f32 %v2805_v25, %v6284_v47  ;;  %v6428_v42 = vmin.f32 %v3078_v10, 16.0  ;;  %v3198_v19 = vmul.f32 %v6414_v20, %v6414_v20 }
 0x5ab   : > { %7523 = vst [vmem:[#allocation85_spill] sm:$0xff] %v6424_v55  ;;  %v6433_v34 = vmul.f32 %v2729_v41, %v7524_v31  ;;  %v2689_v30 = vadd.f32 1.1283791, %v2688_v53  ;;  %v2769_v35 = vadd.f32 1.1283791, %v2768_v33  ;;  %v6436_v14 = vmul.f32 0.5, %v6240_v57 }
 0x5ac   : > { %v2846_v27 = vmul.f32 %v2845_v56, %v6295_v7  ;;  %v2926_v26 = vmul.f32 %v2925_v22, %v6299_v38  ;;  %v3045_v54 = vadd.f32 0.05243302, %v3044_v9  ;;  %v3057_v36 = vmul.f32 %v3056_v29, %v6313_v44  ;;  %v7527_v41 = vld [vmem:[#allocation71_spill] sm:$0xff]  ;;  %v7528_v56 = vld [vmem:[#allocation72_spill] sm:$0xff]  ;;  %v7529_v22 = vld [vmem:[#allocation73_spill] sm:$0xff] }
 0x5ad   : > { %7525 = vst [vmem:[#allocation69_spill] sm:$0xff] %v6436_v14  ;;  %v2889_v28 = vadd.f32 1.1283791, %v2888_v6  ;;  %v2964_v25 = vmul.f32 %v2963_v58, %v6352_v4  ;;  %v3003_v10 = vadd.f32 0.0036580483, %v3002_v32  ;;  %v6444_v31 = vmul.f32 %v2649_v12, %v7527_v41  ;;  %v7531_v6 = vld [vmem:[#allocation46_spill] sm:$0xff]  ;;  %v1809_v41 = vpop.f32.mrf.mxu2 }
 0x5ae   : > { %v2131_v20 = vmul.f32 3.8918573e-05, %v7526_v0  ;;  %v2807_v53 = vadd.f32 0.18741608, %v2806_v17  ;;  %v3080_v57 = vmul.f32 2.1237322e-06, %v6428_v42  ;;  %v6450_v62 = vmul.f32 %v2689_v30, %v7528_v56 }
 0x5af   : > { %v6447_v33 = vmin.f32 %v3198_v19, 16.0  ;;  %v6453_v9 = vmul.f32 %v2769_v35, %v7529_v22  ;;  %v6456_v29 = vmul.f32 0.5, %v6279_v16  ;;  %v2171_v58 = vmul.f32 3.8918573e-05, %v7531_v6 }
 0x5b0   : > { %v2847_v32 = vadd.f32 0.18741608, %v2846_v27  ;;  %v2927_v14 = vadd.f32 0.18741608, %v2926_v26  ;;  %v3046_v12 = vmul.f32 %v3045_v54, %v6313_v44  ;;  %v3058_v17 = vadd.f32 0.4994258, %v3057_v36 }
 0x5b1   : > { %7530 = vst [vmem:[#allocation43_spill] sm:$0xff] %v6456_v29  ;;  %v2965_v55 = vadd.f32 0.05243302, %v2964_v25  ;;  %v6461_v19 = vmul.f32 0.5, %v6318_v23  ;;  %v3004_v30 = vmul.f32 %v3003_v10, %v6373_v46  ;;  %v2132_v56 = vadd.f32 0.001143296, %v2131_v20 }
 0x5b2   : > { %v6465_v35 = vmul.f32 %v2889_v28, %v6163_v60  ;;  %v2808_v16 = vmul.f32 %v2807_v53, %v6284_v47  ;;  %v3081_v22 = vadd.f32 0.00028619796, %v3080_v57  ;;  %v3200_v27 = vmul.f32 2.1237322e-06, %v6447_v33 }
 0x5b3   : > { %7532 = vst [vmem:[#allocation71_spill] sm:$0xff] %v6461_v19  ;;  %v3211_v26 = vmul.f32 3.8918573e-05, %v6447_v33  ;;  %v6471_v54 = vadd.f32 %v1809_v41, %v5605_v5  ;;  %v2133_v36 = vmul.f32 %v2132_v56, %v7526_v0  ;;  %v2172_v23 = vadd.f32 0.001143296, %v2171_v58 }
 0x5b4   : > { %v2848_v25 = vmul.f32 %v2847_v32, %v6295_v7  ;;  %v2928_v20 = vmul.f32 %v2927_v14, %v6299_v38  ;;  %v3047_v10 = vadd.f32 0.18741608, %v3046_v12  ;;  %v3059_v60 = vmul.f32 %v3058_v17, %v6313_v44  ;;  %v1850_v14 = vpop.f32.mrf.mxu3 }
 0x5b5   : > { %7533 = vst [vmem:[#allocation72_spill] sm:$0xff] %v6471_v54  ;;  %v2966_v28 = vmul.f32 %v2965_v55, %v6352_v4  ;;  %v3005_v53 = vadd.f32 0.05243302, %v3004_v30  ;;  %v2134_v57 = vadd.f32 0.014752088, %v2133_v36  ;;  %v2173_v19 = vmul.f32 %v2172_v23, %v7531_v6 }
 0x5b6   : > { %v2809_v29 = vadd.f32 1.1283791, %v2808_v16  ;;  %v6480_v5 = vmul.f32 0.5, %v6378_v45  ;;  %v3082_v41 = vmul.f32 %v3081_v22, %v6428_v42  ;;  %v3201_v58 = vadd.f32 0.00028619796, %v3200_v27 }
 0x5b7   : > { %v3212_v56 = vadd.f32 0.001143296, %v3211_v26  ;;  %v6484_v32 = vmul.f32 0.70710677, %v6471_v54  ;;  %v2135_v12 = vmul.f32 %v2134_v57, %v7526_v0  ;;  %v2174_v17 = vadd.f32 0.014752088, %v2173_v19 }
 0x5b8   : > { %7534 = vst [vmem:[#allocation73_spill] sm:$0xff] %v6480_v5  ;;  %v2849_v55 = vadd.f32 1.1283791, %v2848_v25  ;;  %v2929_v30 = vadd.f32 1.1283791, %v2928_v20  ;;  %v3048_v36 = vmul.f32 %v3047_v10, %v6313_v44  ;;  %v6488_v23 = vadd.f32 1.0, %v3059_v60 }
 0x5b9   : > { %7535 = vst [vmem:[#allocation46_spill] sm:$0xff] %v6484_v32  ;;  %v2967_v16 = vadd.f32 0.18741608, %v2966_v28  ;;  %v3006_v45 = vmul.f32 %v3005_v53, %v6373_v46  ;;  %v2136_v5 = vadd.f32 0.112945676, %v2135_v12  ;;  %v2175_v22 = vmul.f32 %v2174_v17, %v7531_v6  ;;  %v7538_v57 = vld [vmem:[#allocation47_spill] sm:$0xff] }
 0x5ba   : > { %7536 = vst [vmem:[#allocation86_spill] sm:$0xff] %v6488_v23  ;;  %v3083_v27 = vadd.f32 0.0036580483, %v3082_v41  ;;  %v3202_v26 = vmul.f32 %v3201_v58, %v6447_v33  ;;  %v6494_v54 = vadd.f32 %v1850_v14, %v5610_v43  ;;  %v2211_v19 = vmul.f32 3.8918573e-05, %v7538_v57 }
 0x5bb   : > { %v3213_v25 = vmul.f32 %v3212_v56, %v6447_v33  ;;  %v3118_v44 = vmul.f32 %v6484_v32, %v6484_v32  ;;  %v2137_v20 = vmul.f32 %v2136_v5, %v7526_v0  ;;  %v2176_v10 = vadd.f32 0.112945676, %v2175_v22 }
 0x5bc   : > { %7537 = vst [vmem:[#allocation87_spill] sm:$0xff] %v6494_v54  ;;  %v6502_v60 = vmul.f32 %v2809_v29, %v6231_v11  ;;  %v6505_v28 = vmul.f32 %v2849_v55, %v6237_v24  ;;  %v6508_v53 = vmul.f32 %v2929_v30, %v6259_v2  ;;  %4412 = vrcp.f32 %v6488_v23 }
 0x5bd   : > { %v3049_v43 = vadd.f32 1.1283791, %v3048_v36  ;;  %v2968_v41 = vmul.f32 %v2967_v16, %v6352_v4  ;;  %v3007_v58 = vadd.f32 0.18741608, %v3006_v45  ;;  %v2138_v56 = vadd.f32 0.4994258, %v2137_v20 }
 0x5be   : > { %7539 = vst [vmem:[#allocation47_spill] sm:$0xff] %v6505_v28  ;;  %v3084_v14 = vmul.f32 %v3083_v27, %v6428_v42  ;;  %v3203_v5 = vadd.f32 0.0036580483, %v3202_v26  ;;  %v2177_v12 = vmul.f32 %v2176_v10, %v7531_v6  ;;  %v2212_v11 = vadd.f32 0.001143296, %v2211_v19  ;;  %v7542_v36 = vld [vmem:[#allocation52_spill] sm:$0xff] }
 0x5bf   : > { %7540 = vst [vmem:[#allocation88_spill] sm:$0xff] %v6508_v53  ;;  %v3214_v29 = vadd.f32 0.014752088, %v3213_v25  ;;  %v6514_v17 = vmin.f32 %v3118_v44, 16.0  ;;  %v6517_v24 = vmul.f32 0.70710677, %v6494_v54  ;;  %v2139_v2 = vmul.f32 %v2138_v56, %v7526_v0 }
 0x5c0   : > { %v2178_v55 = vadd.f32 0.4994258, %v2177_v12  ;;  %v2213_v30 = vmul.f32 %v2212_v11, %v7538_v57  ;;  %v2291_v16 = vmul.f32 3.8918573e-05, %v7542_v36  ;;  %v7543_v45 = vld [vmem:[#allocation55_spill] sm:$0xff]  ;;  %v6524_v27 = vmul.f32 %v3049_v43, %v6287_v49 }
 0x5c1   : > { %7541 = vst [vmem:[#allocation89_spill] sm:$0xff] %v6517_v24  ;;  %v2411_v22 = vmul.f32 3.8918573e-05, %v7543_v45  ;;  %v3072_v26 = vand.u32 2147483648, %v6488_v23  ;;  %v3008_v19 = vmul.f32 %v3007_v58, %v6373_v46  ;;  %v6528_v25 = vadd.f32 1.0, %v2139_v2 }
 0x5c2   : > { %7544 = vst [vmem:[#allocation52_spill] sm:$0xff] %v6524_v27  ;;  %v6530_v44 = vpop.eup %4412  ;;  %v3085_v20 = vadd.f32 0.05243302, %v3084_v14  ;;  %v2179_v0 = vmul.f32 %v2178_v55, %v7531_v6  ;;  %v2214_v10 = vadd.f32 0.014752088, %v2213_v30  ;;  %v3215_v54 = vmul.f32 %v3214_v29, %v6447_v33 }
 0x5c3   : > { %v2292_v56 = vadd.f32 0.001143296, %v2291_v16  ;;  %v2969_v11 = vadd.f32 1.1283791, %v2968_v41  ;;  %v3120_v49 = vmul.f32 2.1237322e-06, %v6514_v17  ;;  %v3204_v43 = vmul.f32 %v3203_v5, %v6447_v33 }
 0x5c4   : > { %v3158_v58 = vmul.f32 %v6517_v24, %v6517_v24  ;;  %4414 = vrcp.f32 %v6528_v25  ;;  %v2412_v2 = vadd.f32 0.001143296, %v2411_v22  ;;  %v6542_v6 = vmul.f32 %v6530_v44, %v6488_v23  ;;  %v7545_v41 = vld [vmem:[#allocation57_spill] sm:$0xff] }
 0x5c5   : > { %v3009_v14 = vadd.f32 1.1283791, %v3008_v19  ;;  %v6544_v55 = vadd.f32 1.0, %v2179_v0  ;;  %v2331_v30 = vmul.f32 3.8918573e-05, %v7545_v41  ;;  %v6547_v29 = vor.u32 1.1754944e-38, %v3072_v26 }
 0x5c6   : > { %v3086_v16 = vmul.f32 %v3085_v20, %v6428_v42  ;;  %v2215_v5 = vmul.f32 %v2214_v10, %v7538_v57  ;;  %v2293_v12 = vmul.f32 %v2292_v56, %v7542_v36  ;;  %v6553_v24 = vmul.f32 %v2969_v11, %v6307_v52 }
 0x5c7   : > { %7546 = vst [vmem:[#allocation55_spill] sm:$0xff] %v6547_v29  ;;  %v3216_v22 = vadd.f32 0.112945676, %v3215_v54  ;;  %v3121_v27 = vadd.f32 0.00028619796, %v3120_v49  ;;  %4416 = vrcp.f32 %v6544_v55  ;;  %v6558_v0 = vmin.f32 %v3158_v58, 16.0 }
 0x5c8   : > { %7547 = vst [vmem:[#allocation57_spill] sm:$0xff] %v6553_v24  ;;  %v6556_v19 = vadd.f32 0.05243302, %v3204_v43  ;;  %v2216_v32 = vadd.f32 0.112945676, %v2215_v5  ;;  %v2413_v26 = vmul.f32 %v2412_v2, %v7543_v45  ;;  %v6563_v10 = vmul.f32 %v3009_v14, %v6342_v61 }
 0x5c9   : > { %7549 = vst [vmem:[#allocation91_spill] sm:$0xff] %v6558_v0  ;;  %v2294_v56 = vadd.f32 0.014752088, %v2293_v12  ;;  %v2332_v29 = vadd.f32 0.001143296, %v2331_v30  ;;  %v2152_v54 = vand.u32 2147483648, %v6528_v25  ;;  %v6570_v58 = vmul.f32 %v3216_v22, %v6447_v33 }
 0x5ca   : > { %7548 = vst [vmem:[#allocation90_spill] sm:$0xff] %v6556_v19  ;;  %v4415_v52 = vpop.eup %4414  ;;  %v6565_v11 = vadd.f32 0.18741608, %v3086_v16  ;;  %v2217_v49 = vmul.f32 %v2216_v32, %v7538_v57  ;;  %v2414_v43 = vadd.f32 0.014752088, %v2413_v26  ;;  %v6573_v2 = vmul.f32 %v3121_v27, %v6514_v17 }
 0x5cb   : > { %7550 = vst [vmem:[#allocation92_spill] sm:$0xff] %v6563_v10  ;;  %v2142_v5 = vmul.f32 %v4415_v52, %v6528_v25  ;;  %v2295_v61 = vmul.f32 %v2294_v56, %v7542_v36  ;;  %v6578_v12 = vmul.f32 2.1237322e-06, %v6558_v0  ;;  %v2333_v16 = vmul.f32 %v2332_v29, %v7545_v41 }
 0x5cc   : > { %7551 = vst [vmem:[#allocation93_spill] sm:$0xff] %v6565_v11  ;;  %v2218_v14 = vadd.f32 0.4994258, %v2217_v49  ;;  %v2415_v30 = vmul.f32 %v2414_v43, %v7543_v45  ;;  %vm2146_vm12 = vweird.f32 %v6528_v25  ;;  %v2150_v22 = vand.u32 2147483647, %v6528_v25 }
 0x5cd   : > { %v4417_v32 = vpop.eup %4416  ;;  %v2143_v26 = vsub.f32 1.0, %v2142_v5  ;;  %v2296_v27 = vadd.f32 0.112945676, %v2295_v61  ;;  %v2153_v20 = vor.u32 1.1754944e-38, %v2152_v54  ;;  %vm2147_vm13 = vweird.f32 %v4415_v52 }
 0x5ce   : > { %v2182_v10 = vmul.f32 %v4417_v32, %v6544_v55  ;;  %v2219_v56 = vmul.f32 %v2218_v14, %v7538_v57  ;;  %v2416_v23 = vadd.f32 0.112945676, %v2415_v30  ;;  %v2334_v43 = vadd.f32 0.014752088, %v2333_v16  ;;  %vm2148_vm14 = vmor %vm2146_vm12, %vm2147_vm13 }
 0x5cf   : > { %v2144_v24 = vmul.f32 %v4415_v52, %v2143_v26  ;;  %v2297_v49 = vmul.f32 %v2296_v27, %v7542_v36  ;;  %v2371_v28 = vmul.f32 3.8918573e-05, %v7552_v21  ;;  %v2192_v54 = vand.u32 2147483648, %v6544_v55  ;;  %v7553_v27 = vld [vmem:[#allocation63_spill] sm:$0xff] }
 0x5d0   : > { %v2183_v53 = vsub.f32 1.0, %v2182_v10  ;;  %v6587_v29 = vadd.f32 1.0, %v2219_v56  ;;  %v2417_v5 = vmul.f32 %v2416_v23, %v7543_v45  ;;  %v2335_v0 = vmul.f32 %v2334_v43, %v7545_v41 }
 0x5d1   : > { %v2145_v11 = vadd.f32 %v4415_v52, %v2144_v24  ;;  %v2298_v61 = vadd.f32 0.4994258, %v2297_v49  ;;  %vm2187_vm15 = vweird.f32 %v4417_v32  ;;  %v2190_v14 = vand.u32 2147483647, %v6544_v55 }
 0x5d2   : > { %v2184_v57 = vmul.f32 %v4417_v32, %v2183_v53  ;;  %4418 = vrcp.f32 %v6587_v29  ;;  %vm2151_vm0 = vcmp.eq.f32.partialorder %v2150_v22, 8.507059e+37  ;;  %vm2186_vm1 = vweird.f32 %v6544_v55 }
 0x5d3   : > { %v2149_v10 = vsel %vm2148_vm14, %v4415_v52, %v2145_v11  ;;  %v2299_v23 = vmul.f32 %v2298_v61, %v7542_v36  ;;  %v2418_v16 = vadd.f32 0.4994258, %v2417_v5  ;;  %v2372_v26 = vadd.f32 0.001143296, %v2371_v28  ;;  %vm2188_vm2 = vmor %vm2186_vm1, %vm2187_vm15 }
 0x5d4   : > { %v2154_v24 = vsel %vm2151_vm0, %v2153_v20, %v2149_v10  ;;  %v2185_v30 = vadd.f32 %v4417_v32, %v2184_v57  ;;  %v2193_v25 = vor.u32 1.1754944e-38, %v2192_v54  ;;  %v2336_v49 = vadd.f32 0.112945676, %v2335_v0  ;;  %v7554_v20 = vld [vmem:[#allocation67_spill] sm:$0xff]  ;;  %v7555_v57 = vld [vmem:[#allocation60_spill] sm:$0xff] }
 0x5d5   : > { %v2155_v56 = vmul.f32 %v2154_v24, %v7553_v27  ;;  %v6600_v53 = vadd.f32 1.0, %v2299_v23  ;;  %vm2191_vm3 = vcmp.eq.f32.partialorder %v2190_v14, 8.507059e+37  ;;  %v2230_v52 = vand.u32 2147483647, %v6587_v29 }
 0x5d6   : > { %v2189_v43 = vsel %vm2188_vm2, %v4417_v32, %v2185_v30  ;;  %v2419_v11 = vmul.f32 %v2418_v16, %v7543_v45  ;;  %v2232_v36 = vand.u32 2147483648, %v6587_v29  ;;  %vm2226_vm4 = vweird.f32 %v6587_v29  ;;  %v7556_v30 = vld [vmem:[#allocation44_spill] sm:$0xff] }
 0x5d7   : > { %v4047_v55 = vclamps-f32 %v2155_v56, 1.0  ;;  %v2194_v22 = vsel %vm2191_vm3, %v2193_v25, %v2189_v43  ;;  %4420 = vrcp.f32 %v6600_v53  ;;  %v2373_v0 = vmul.f32 %v2372_v26, %v7552_v21 }
 0x5d8   : > { %v4419_v28 = vpop.eup %4418  ;;  %v2195_v5 = vmul.f32 %v2194_v22, %v7554_v20  ;;  %v6608_v54 = vadd.f32 1.0, %v2419_v11  ;;  %v2337_v45 = vmul.f32 %v2336_v49, %v7545_v41  ;;  %v2451_v14 = vmul.f32 3.8918573e-05, %v7555_v57 }
 0x5d9   : > { %v3242_v32 = vadd.f32 1.0, %v4047_v55  ;;  %v2222_v61 = vmul.f32 %v4419_v28, %v6587_v29  ;;  %v2310_v23 = vand.u32 2147483647, %v6600_v53  ;;  %v2312_v24 = vand.u32 2147483648, %v6600_v53  ;;  %v7562_v29 = vld [vmem:[#allocation68_spill] sm:$0xff] }
 0x5da   : > { %v4048_v10 = vclamps-f32 %v2195_v5, 1.0  ;;  %4422 = vrcp.f32 %v6608_v54  ;;  %vm6618_vm5 = vcmp.eq.f32.partialorder %v2230_v52, 8.507059e+37  ;;  %v2233_v26 = vor.u32 1.1754944e-38, %v2232_v36  ;;  %v7559_v5 = vld [vmem:[#allocation48_spill] sm:$0xff] }
 0x5db   : > { %v3274_v16 = vmul.f32 %v3242_v32, %v7556_v30  ;;  %v2223_v27 = vsub.f32 1.0, %v2222_v61  ;;  %vm2306_vm6 = vweird.f32 %v6600_v53  ;;  %v2338_v49 = vadd.f32 0.4994258, %v2337_v45 }
 0x5dc   : > { %v3243_v25 = vadd.f32 1.0, %v4048_v10  ;;  %v2374_v43 = vadd.f32 0.014752088, %v2373_v0  ;;  %vm2227_vm7 = vweird.f32 %v4419_v28  ;;  %v2452_v22 = vadd.f32 0.001143296, %v2451_v14 }
 0x5dd   : > { %v4421_v11 = vpop.eup %4420  ;;  %3389 = vmatmul.f32.gmra.mxu0 %v3274_v16  ;;  %v2224_v55 = vmul.f32 %v4419_v28, %v2223_v27  ;;  %v2571_v20 = vmul.f32 3.8918573e-05, %v6019_v39  ;;  %vm6626_vm8 = vcmp.eq.f32.partialorder %v2310_v23, 8.507059e+37  ;;  %v2313_v36 = vor.u32 1.1754944e-38, %v2312_v24  ;;  %vm2228_vm9 = vmor %vm2226_vm4, %vm2227_vm7 }
 0x5de   : > { %v3275_v32 = vmul.f32 %v3243_v25, %v7559_v5  ;;  %v2302_v52 = vmul.f32 %v4421_v11, %v6600_v53  ;;  %v2339_v45 = vmul.f32 %v2338_v49, %v7545_v41  ;;  %v2375_v0 = vmul.f32 %v2374_v43, %v7552_v21  ;;  %v7565_v53 = vld [vmem:[#allocation50_spill] sm:$0xff] }
 0x5df   : > { %v2225_v10 = vadd.f32 %v4419_v28, %v2224_v55  ;;  %v2453_v30 = vmul.f32 %v2452_v22, %v7555_v57  ;;  %vm2307_vm10 = vweird.f32 %v4421_v11  ;;  %v2430_v23 = vand.u32 2147483647, %v6608_v54 }
 0x5e0   : > { %v4423_v16 = vpop.eup %4422  ;;  %3430 = vmatmul.f32.gmra.mxu2 %v3275_v32  ;;  %v2303_v14 = vsub.f32 1.0, %v2302_v52  ;;  %v2432_v27 = vand.u32 2147483648, %v6608_v54  ;;  %v6638_v55 = vadd.f32 1.0, %v2339_v45  ;;  %v2572_v41 = vadd.f32 0.001143296, %v2571_v20  ;;  %vm2308_vm13 = vmor %vm2306_vm6, %vm2307_vm10 }
 0x5e1   : > { %v2229_v25 = vsel %vm2228_vm9, %v4419_v28, %v2225_v10  ;;  %v2422_v24 = vmul.f32 %v4423_v16, %v6608_v54  ;;  %v2376_v22 = vadd.f32 0.112945676, %v2375_v0  ;;  %v2454_v5 = vadd.f32 0.014752088, %v2453_v30 }
 0x5e2   : > { %v2234_v49 = vsel %vm6618_vm5, %v2233_v26, %v2229_v25  ;;  %v2304_v43 = vmul.f32 %v4421_v11, %v2303_v14  ;;  %vm2426_vm11 = vweird.f32 %v6608_v54  ;;  %4424 = vrcp.f32 %v6638_v55 }
 0x5e3   : > { %v2235_v32 = vmul.f32 %v2234_v49, %v7562_v29  ;;  %v2423_v52 = vsub.f32 1.0, %v2422_v24  ;;  %vm2427_vm12 = vweird.f32 %v4423_v16  ;;  %v2377_v28 = vmul.f32 %v2376_v22, %v7552_v21 }
 0x5e4   : > { %v2305_v19 = vadd.f32 %v4421_v11, %v2304_v43  ;;  %v2491_v10 = vmul.f32 3.8918573e-05, %v6070_v3  ;;  %v2455_v26 = vmul.f32 %v2454_v5, %v7555_v57  ;;  %v2573_v45 = vmul.f32 %v2572_v41, %v6019_v39  ;;  %vm2428_vm15 = vmor %vm2426_vm11, %vm2427_vm12  ;;  %v7566_v5 = vld [vmem:[#allocation49_spill] sm:$0xff] }
 0x5e5   : > { %v4049_v20 = vclamps-f32 %v2235_v32, 1.0  ;;  %v2424_v56 = vmul.f32 %v4423_v16, %v2423_v52  ;;  %vm6652_vm14 = vcmp.eq.f32.partialorder %v2430_v23, 8.507059e+37  ;;  %v2433_v14 = vor.u32 1.1754944e-38, %v2432_v27 }
 0x5e6   : > { %v2309_v0 = vsel %vm2308_vm13, %v4421_v11, %v2305_v19  ;;  %v2378_v25 = vadd.f32 0.4994258, %v2377_v28  ;;  %v2456_v22 = vadd.f32 0.112945676, %v2455_v26  ;;  %v2574_v11 = vadd.f32 0.014752088, %v2573_v45 }
 0x5e7   : > { %v3244_v24 = vadd.f32 1.0, %v4049_v20  ;;  %v2314_v49 = vsel %vm6626_vm8, %v2313_v36, %v2309_v0  ;;  %v2425_v43 = vadd.f32 %v4423_v16, %v2424_v56  ;;  %v2492_v23 = vadd.f32 0.001143296, %v2491_v10 }
 0x5e8   : > { %v2315_v29 = vmul.f32 %v2314_v49, %v7565_v53  ;;  %v2379_v19 = vmul.f32 %v2378_v25, %v7552_v21  ;;  %v4425_v41 = vpop.eup %4424  ;;  %v2457_v52 = vmul.f32 %v2456_v22, %v7555_v57  ;;  %v2531_v61 = vmul.f32 3.8918573e-05, %v6108_v37  ;;  %v7567_v21 = vld [vmem:[#allocation56_spill] sm:$0xff]  ;;  %v7568_v49 = vld [vmem:[#allocation61_spill] sm:$0xff] }
 0x5e9   : > { %v3276_v27 = vmul.f32 %v3244_v24, %v7566_v5  ;;  %v2429_v32 = vsel %vm2428_vm15, %v4423_v16, %v2425_v43  ;;  %v2342_v20 = vmul.f32 %v4425_v41, %v6638_v55  ;;  %v2352_v54 = vand.u32 2147483648, %v6638_v55 }
 0x5ea   : > { %v4051_v36 = vclamps-f32 %v2315_v29, 1.0  ;;  %v2434_v28 = vsel %vm6652_vm14, %v2433_v14, %v2429_v32  ;;  %v6671_v10 = vadd.f32 1.0, %v2379_v19  ;;  %v2458_v26 = vadd.f32 0.4994258, %v2457_v52 }
 0x5eb   : > { %3471 = vmatmul.f32.gmra.mxu3 %v3276_v27  ;;  %v2435_v56 = vmul.f32 %v2434_v28, %v7567_v21  ;;  %v2575_v16 = vmul.f32 %v2574_v11, %v6019_v39  ;;  %v2343_v0 = vsub.f32 1.0, %v2342_v20  ;;  %vm2346_vm0 = vweird.f32 %v6638_v55 }
 0x5ec   : > { %v3246_v45 = vadd.f32 1.0, %v4051_v36  ;;  %v2493_v25 = vmul.f32 %v2492_v23, %v6070_v3  ;;  %v2350_v14 = vand.u32 2147483647, %v6638_v55  ;;  %4426 = vrcp.f32 %v6671_v10  ;;  %v7569_v36 = vld [vmem:[#allocation62_spill] sm:$0xff] }
 0x5ed   : > { %v4054_v30 = vclamps-f32 %v2435_v56, 1.0  ;;  %v2532_v24 = vadd.f32 0.001143296, %v2531_v61  ;;  %v2344_v22 = vmul.f32 %v4425_v41, %v2343_v0  ;;  %vm2347_vm1 = vweird.f32 %v4425_v41  ;;  %v7570_v0 = vld [vmem:[#allocation53_spill] sm:$0xff] }
 0x5ee   : > { %v3278_v43 = vmul.f32 %v3246_v45, %v7568_v49  ;;  %v2459_v53 = vmul.f32 %v2458_v26, %v7555_v57  ;;  %v2353_v19 = vor.u32 1.1754944e-38, %v2352_v54  ;;  %v2576_v11 = vadd.f32 0.112945676, %v2575_v16  ;;  %vm2348_vm2 = vmor %vm2346_vm0, %vm2347_vm1 }
 0x5ef   : > { %v3249_v29 = vadd.f32 1.0, %v4054_v30  ;;  %v2494_v5 = vadd.f32 0.014752088, %v2493_v25  ;;  %v2345_v27 = vadd.f32 %v4425_v41, %v2344_v22  ;;  %v2390_v23 = vand.u32 2147483647, %v6671_v10 }
 0x5f0   : > { %3392 = vmatmul.f32.gmra.mxu0 %v3278_v43  ;;  %v2392_v32 = vand.u32 2147483648, %v6671_v10  ;;  %v6682_v52 = vadd.f32 1.0, %v2459_v53  ;;  %v2577_v28 = vmul.f32 %v2576_v11, %v6019_v39  ;;  %v2533_v20 = vmul.f32 %v2532_v24, %v6108_v37 }
 0x5f1   : > { %v3281_v61 = vmul.f32 %v3249_v29, %v7569_v36  ;;  %v2495_v57 = vmul.f32 %v2494_v5, %v6070_v3  ;;  %v2349_v54 = vsel %vm2348_vm2, %v4425_v41, %v2345_v27  ;;  %vm2351_vm3 = vcmp.eq.f32.partialorder %v2350_v14, 8.507059e+37 }
 0x5f2   : > { %4428 = vrcp.f32 %v6682_v52  ;;  %v2611_v21 = vmul.f32 3.8918573e-05, %v6136_v63  ;;  %v4427_v56 = vpop.eup %4426  ;;  %v6693_v26 = vadd.f32 0.4994258, %v6570_v58  ;;  %v2354_v16 = vsel %vm2351_vm3, %v2353_v19, %v2349_v54 }
 0x5f3   : > { %3515 = vmatmul.f32.gmra.mxu1 %v3281_v61  ;;  %v2578_v55 = vadd.f32 0.4994258, %v2577_v28  ;;  %v2496_v45 = vadd.f32 0.112945676, %v2495_v57  ;;  %v2355_v25 = vmul.f32 %v2354_v16, %v7570_v0  ;;  %v2382_v30 = vmul.f32 %v4427_v56, %v6671_v10  ;;  %v7573_v57 = vld [vmem:[#allocation64_spill] sm:$0xff] }
 0x5f4   : > { %vm2386_vm4 = vweird.f32 %v6671_v10  ;;  %vm6698_vm5 = vcmp.eq.f32.partialorder %v2390_v23, 8.507059e+37  ;;  %v2393_v14 = vor.u32 1.1754944e-38, %v2392_v32  ;;  %v2534_v49 = vadd.f32 0.014752088, %v2533_v20 }
 0x5f5   : > { %v2579_v24 = vmul.f32 %v2578_v55, %v6019_v39  ;;  %v2497_v58 = vmul.f32 %v2496_v45, %v6070_v3  ;;  %v4052_v43 = vclamps-f32 %v2355_v25, 1.0  ;;  %v2383_v22 = vsub.f32 1.0, %v2382_v30 }
 0x5f6   : > { %v2612_v53 = vadd.f32 0.001143296, %v2611_v21  ;;  %v2731_v29 = vmul.f32 3.8918573e-05, %v6170_v18  ;;  %vm2387_vm6 = vweird.f32 %v4427_v56  ;;  %v2535_v5 = vmul.f32 %v2534_v49, %v6108_v37 }
 0x5f7   : > { %v6705_v19 = vadd.f32 1.0, %v2579_v24  ;;  %v2498_v11 = vadd.f32 0.4994258, %v2497_v58  ;;  %v3247_v23 = vadd.f32 1.0, %v4052_v43  ;;  %v2384_v36 = vmul.f32 %v4427_v56, %v2383_v22  ;;  %vm2388_vm8 = vmor %vm2386_vm4, %vm2387_vm6 }
 0x5f8   : > { %v4429_v27 = vpop.eup %4428  ;;  %v2613_v32 = vmul.f32 %v2612_v53, %v6136_v63  ;;  %v2732_v39 = vadd.f32 0.001143296, %v2731_v29  ;;  %vm2466_vm7 = vweird.f32 %v6682_v52  ;;  %v2470_v28 = vand.u32 2147483647, %v6682_v52 }
 0x5f9   : > { %v2462_v61 = vmul.f32 %v4429_v27, %v6682_v52  ;;  %4430 = vrcp.f32 %v6705_v19  ;;  %v3279_v20 = vmul.f32 %v3247_v23, %v7573_v57  ;;  %v2385_v54 = vadd.f32 %v4427_v56, %v2384_v36 }
 0x5fa   : > { %v2472_v21 = vand.u32 2147483648, %v6682_v52  ;;  %v2651_v16 = vmul.f32 3.8918573e-05, %v6192_v13  ;;  %v2499_v45 = vmul.f32 %v2498_v11, %v6070_v3  ;;  %v2536_v0 = vadd.f32 0.112945676, %v2535_v5  ;;  %v7578_v52 = vld [vmem:[#allocation77_spill] sm:$0xff] }
 0x5fb   : > { %v2463_v55 = vsub.f32 1.0, %v2462_v61  ;;  %v2614_v25 = vadd.f32 0.014752088, %v2613_v32  ;;  %3433 = vmatmul.f32.gmra.mxu2 %v3279_v20  ;;  %v2389_v30 = vsel %vm2388_vm8, %v4427_v56, %v2385_v54  ;;  %vm2467_vm9 = vweird.f32 %v4429_v27 }
 0x5fc   : > { %v2590_v24 = vand.u32 2147483647, %v6705_v19  ;;  %v2733_v58 = vmul.f32 %v2732_v39, %v6170_v18  ;;  %v2394_v49 = vsel %vm6698_vm5, %v2393_v14, %v2389_v30  ;;  %v6724_v22 = vadd.f32 1.0, %v2499_v45  ;;  %vm2468_vm11 = vmor %vm2466_vm7, %vm2467_vm9 }
 0x5fd   : > { %v2464_v43 = vmul.f32 %v4429_v27, %v2463_v55  ;;  %v2537_v10 = vmul.f32 %v2536_v0, %v6108_v37  ;;  %v2395_v53 = vmul.f32 %v2394_v49, %v6245_v8  ;;  %vm6728_vm10 = vcmp.eq.f32.partialorder %v2470_v28, 8.507059e+37 }
 0x5fe   : > { %v2592_v56 = vand.u32 2147483648, %v6705_v19  ;;  %v2615_v29 = vmul.f32 %v2614_v25, %v6136_v63  ;;  %v2473_v23 = vor.u32 1.1754944e-38, %v2472_v21  ;;  %4432 = vrcp.f32 %v6724_v22 }
 0x5ff   : > { %v4431_v11 = vpop.eup %4430  ;;  %v2465_v5 = vadd.f32 %v4429_v27, %v2464_v43  ;;  %v2734_v41 = vadd.f32 0.014752088, %v2733_v58  ;;  %v4053_v14 = vclamps-f32 %v2395_v53, 1.0  ;;  %vm2586_vm12 = vweird.f32 %v6705_v19 }
 0x600   : > { %v2582_v8 = vmul.f32 %v4431_v11, %v6705_v19  ;;  %v2652_v36 = vadd.f32 0.001143296, %v2651_v16  ;;  %vm6740_vm13 = vcmp.eq.f32.partialorder %v2590_v24, 8.507059e+37  ;;  %v2538_v61 = vadd.f32 0.4994258, %v2537_v10  ;;  %v7579_v16 = vld [vmem:[#allocation65_spill] sm:$0xff] }
 0x601   : > { %v2469_v32 = vsel %vm2468_vm11, %v4429_v27, %v2465_v5  ;;  %v2616_v28 = vadd.f32 0.112945676, %v2615_v29  ;;  %v3248_v57 = vadd.f32 1.0, %v4053_v14  ;;  %v2593_v21 = vor.u32 1.1754944e-38, %v2592_v56 }
 0x602   : > { %v2474_v20 = vsel %vm6728_vm10, %v2473_v23, %v2469_v32  ;;  %v2583_v54 = vsub.f32 1.0, %v2582_v8  ;;  %v2539_v45 = vmul.f32 %v2538_v61, %v6108_v37  ;;  %v2735_v27 = vmul.f32 %v2734_v41, %v6170_v18  ;;  %v7580_v32 = vld [vmem:[#allocation66_spill] sm:$0xff] }
 0x603   : > { %v2475_v55 = vmul.f32 %v2474_v20, %v7578_v52  ;;  %v2617_v0 = vmul.f32 %v2616_v28, %v6136_v63  ;;  %v3280_v25 = vmul.f32 %v3248_v57, %v7579_v16  ;;  %vm2587_vm14 = vweird.f32 %v4431_v11  ;;  %v7581_v20 = vld [vmem:[#allocation80_spill] sm:$0xff] }
 0x604   : > { %v2584_v30 = vmul.f32 %v4431_v11, %v2583_v54  ;;  %v2653_v24 = vmul.f32 %v2652_v36, %v6192_v13  ;;  %v4433_v58 = vpop.eup %4432  ;;  %v6752_v43 = vadd.f32 1.0, %v2539_v45  ;;  %v2736_v53 = vadd.f32 0.112945676, %v2735_v27  ;;  %vm2588_vm15 = vmor %vm2586_vm12, %vm2587_vm14 }
 0x605   : > { %v4055_v49 = vclamps-f32 %v2475_v55, 1.0  ;;  %v2618_v10 = vadd.f32 0.4994258, %v2617_v0  ;;  %3474 = vmatmul.f32.gmra.mxu3 %v3280_v25  ;;  %v2502_v37 = vmul.f32 %v4433_v58, %v6724_v22  ;;  %v2510_v56 = vand.u32 2147483647, %v6724_v22 }
 0x606   : > { %v2585_v3 = vadd.f32 %v4431_v11, %v2584_v30  ;;  %v2512_v29 = vand.u32 2147483648, %v6724_v22  ;;  %4434 = vrcp.f32 %v6752_v43  ;;  %v2654_v23 = vadd.f32 0.014752088, %v2653_v24 }
 0x607   : > { %v3250_v5 = vadd.f32 1.0, %v4055_v49  ;;  %v2691_v41 = vmul.f32 3.8918573e-05, %v6202_v50  ;;  %v2503_v8 = vsub.f32 1.0, %v2502_v37  ;;  %vm2507_vm0 = vweird.f32 %v4433_v58 }
 0x608   : > { %v2589_v14 = vsel %vm2588_vm15, %v4431_v11, %v2585_v3  ;;  %v2619_v36 = vmul.f32 %v2618_v10, %v6136_v63  ;;  %v2552_v57 = vand.u32 2147483648, %v6752_v43  ;;  %v2737_v19 = vmul.f32 %v2736_v53, %v6170_v18 }
 0x609   : > { %v3282_v61 = vmul.f32 %v3250_v5, %v7580_v32  ;;  %v2594_v28 = vsel %vm6740_vm13, %v2593_v21, %v2589_v14  ;;  %v2504_v52 = vmul.f32 %v4433_v58, %v2503_v8  ;;  %v2550_v55 = vand.u32 2147483647, %v6752_v43 }
 0x60a   : > { %v2595_v54 = vmul.f32 %v2594_v28, %v7581_v20  ;;  %v6769_v45 = vadd.f32 1.0, %v2619_v36  ;;  %vm2506_vm1 = vweird.f32 %v6724_v22  ;;  %vm6772_vm2 = vcmp.eq.f32.partialorder %v2510_v56, 8.507059e+37 }
 0x60b   : > { %3395 = vmatmul.f32.gmra.mxu0 %v3282_v61  ;;  %v2738_v11 = vadd.f32 0.4994258, %v2737_v19  ;;  %v2655_v39 = vmul.f32 %v2654_v23, %v6192_v13  ;;  %v2505_v0 = vadd.f32 %v4433_v58, %v2504_v52  ;;  %v2513_v27 = vor.u32 1.1754944e-38, %v2512_v29  ;;  %vm2508_vm3 = vmor %vm2506_vm1, %vm2507_vm0 }
 0x60c   : > { %v4058_v21 = vclamps-f32 %v2595_v54, 1.0  ;;  %4436 = vrcp.f32 %v6769_v45  ;;  %v4435_v16 = vpop.eup %4434  ;;  %vm2546_vm4 = vweird.f32 %v6752_v43  ;;  %v2553_v25 = vor.u32 1.1754944e-38, %v2552_v57 }
 0x60d   : > { %v2739_v22 = vmul.f32 %v2738_v11, %v6170_v18  ;;  %v2656_v30 = vadd.f32 0.112945676, %v2655_v39  ;;  %v2509_v49 = vsel %vm2508_vm3, %v4433_v58, %v2505_v0  ;;  %v2542_v10 = vmul.f32 %v4435_v16, %v6752_v43  ;;  %v7586_v18 = vld [vmem:[#allocation70_spill] sm:$0xff] }
 0x60e   : > { %v3253_v24 = vadd.f32 1.0, %v4058_v21  ;;  %vm6782_vm5 = vcmp.eq.f32.partialorder %v2550_v55, 8.507059e+37  ;;  %v2692_v3 = vadd.f32 0.001143296, %v2691_v41  ;;  %v2514_v37 = vsel %vm6772_vm2, %v2513_v27, %v2509_v49 }
 0x60f   : > { %v2630_v56 = vand.u32 2147483647, %v6769_v45  ;;  %v2632_v29 = vand.u32 2147483648, %v6769_v45  ;;  %v6790_v5 = vadd.f32 1.0, %v2739_v22  ;;  %v2515_v58 = vmul.f32 %v2514_v37, %v6370_v40  ;;  %v7589_v22 = vld [vmem:[#allocation74_spill] sm:$0xff] }
 0x610   : > { %v3285_v23 = vmul.f32 %v3253_v24, %v7586_v18  ;;  %v2543_v14 = vsub.f32 1.0, %v2542_v10  ;;  %v2657_v8 = vmul.f32 %v2656_v30, %v6192_v13  ;;  %vm2547_vm6 = vweird.f32 %v4435_v16 }
 0x611   : > { %vm2626_vm7 = vweird.f32 %v6769_v45  ;;  %4438 = vrcp.f32 %v6790_v5  ;;  %v2771_v41 = vmul.f32 3.8918573e-05, %v6204_v51  ;;  %v4056_v32 = vclamps-f32 %v2515_v58, 1.0  ;;  %vm2548_vm9 = vmor %vm2546_vm4, %vm2547_vm6 }
 0x612   : > { %v4437_v36 = vpop.eup %4436  ;;  %3518 = vmatmul.f32.gmra.mxu1 %v3285_v23  ;;  %v2544_v61 = vmul.f32 %v4435_v16, %v2543_v14  ;;  %v2658_v28 = vadd.f32 0.4994258, %v2657_v8  ;;  %v2693_v57 = vmul.f32 %v2692_v3, %v6202_v50  ;;  %vm6800_vm8 = vcmp.eq.f32.partialorder %v2630_v56, 8.507059e+37 }
 0x613   : > { %v2622_v19 = vmul.f32 %v4437_v36, %v6769_v45  ;;  %v2633_v20 = vor.u32 1.1754944e-38, %v2632_v29  ;;  %v2750_v54 = vand.u32 2147483647, %v6790_v5  ;;  %v2752_v52 = vand.u32 2147483648, %v6790_v5 }
 0x614   : > { %v3251_v55 = vadd.f32 1.0, %v4056_v32  ;;  %v2545_v63 = vadd.f32 %v4435_v16, %v2544_v61  ;;  %v2659_v11 = vmul.f32 %v2658_v28, %v6192_v13  ;;  %v2694_v39 = vadd.f32 0.014752088, %v2693_v57 }
 0x615   : > { %v2623_v21 = vsub.f32 1.0, %v2622_v19  ;;  %vm2627_vm10 = vweird.f32 %v4437_v36  ;;  %v2772_v0 = vadd.f32 0.001143296, %v2771_v41  ;;  %v2891_v27 = vmul.f32 3.8918573e-05, %v6222_v48 }
 0x616   : > { %v3283_v30 = vmul.f32 %v3251_v55, %v7589_v22  ;;  %v2549_v24 = vsel %vm2548_vm9, %v4435_v16, %v2545_v63  ;;  %v6812_v49 = vadd.f32 1.0, %v2659_v11  ;;  %v2695_v10 = vmul.f32 %v2694_v39, %v6202_v50  ;;  %vm2628_vm14 = vmor %vm2626_vm7, %vm2627_vm10  ;;  %v7592_v11 = vld [vmem:[#allocation45_spill] sm:$0xff] }
 0x617   : > { %v4439_v3 = vpop.eup %4438  ;;  %v2554_v13 = vsel %vm6782_vm5, %v2553_v25, %v2549_v24  ;;  %v2624_v37 = vmul.f32 %v4437_v36, %v2623_v21  ;;  %v2773_v43 = vmul.f32 %v2772_v0, %v6204_v51  ;;  %v2892_v56 = vadd.f32 0.001143296, %v2891_v27 }
 0x618   : > { %3436 = vmatmul.f32.gmra.mxu2 %v3283_v30  ;;  %v2555_v29 = vmul.f32 %v2554_v13, %v6407_v15  ;;  %v2742_v18 = vmul.f32 %v4439_v3, %v6790_v5  ;;  %vm2746_vm11 = vweird.f32 %v6790_v5  ;;  %4440 = vrcp.f32 %v6812_v49 }
 0x619   : > { %v2625_v16 = vadd.f32 %v4437_v36, %v2624_v37  ;;  %vm2747_vm12 = vweird.f32 %v4439_v3  ;;  %vm6822_vm13 = vcmp.eq.f32.partialorder %v2750_v54, 8.507059e+37  ;;  %v2753_v25 = vor.u32 1.1754944e-38, %v2752_v52 }
 0x61a   : > { %v4057_v53 = vclamps-f32 %v2555_v29, 1.0  ;;  %v2743_v58 = vsub.f32 1.0, %v2742_v18  ;;  %v2696_v15 = vadd.f32 0.112945676, %v2695_v10  ;;  %v2774_v14 = vadd.f32 0.014752088, %v2773_v43  ;;  %vm2748_vm15 = vmor %vm2746_vm11, %vm2747_vm12 }
 0x61b   : > { %v2629_v8 = vsel %vm2628_vm14, %v4437_v36, %v2625_v16  ;;  %v2670_v41 = vand.u32 2147483647, %v6812_v49  ;;  %v2672_v32 = vand.u32 2147483648, %v6812_v49  ;;  %v2893_v61 = vmul.f32 %v2892_v56, %v6222_v48 }
 0x61c   : > { %v3252_v28 = vadd.f32 1.0, %v4057_v53  ;;  %v2634_v57 = vsel %vm6800_vm8, %v2633_v20, %v2629_v8  ;;  %v2744_v19 = vmul.f32 %v4439_v3, %v2743_v58  ;;  %v2697_v54 = vmul.f32 %v2696_v15, %v6202_v50 }
 0x61d   : > { %v2635_v45 = vmul.f32 %v2634_v57, %v6417_v59  ;;  %v2775_v52 = vmul.f32 %v2774_v14, %v6204_v51  ;;  %v2894_v55 = vadd.f32 0.014752088, %v2893_v61  ;;  %v2811_v36 = vmul.f32 3.8918573e-05, %v6284_v47 }
 0x61e   : > { %v4441_v63 = vpop.eup %4440  ;;  %v3284_v39 = vmul.f32 %v3252_v28, %v7592_v11  ;;  %v2745_v21 = vadd.f32 %v4439_v3, %v2744_v19  ;;  %v2698_v0 = vadd.f32 0.4994258, %v2697_v54  ;;  %v2851_v27 = vmul.f32 3.8918573e-05, %v6295_v7 }
 0x61f   : > { %v4059_v22 = vclamps-f32 %v2635_v45, 1.0  ;;  %v2662_v40 = vmul.f32 %v4441_v63, %v6812_v49  ;;  %vm2667_vm0 = vweird.f32 %v4441_v63  ;;  %v2776_v59 = vadd.f32 0.112945676, %v2775_v52  ;;  %v7594_v52 = vld [vmem:[#allocation54_spill] sm:$0xff] }
 0x620   : > { %3477 = vmatmul.f32.gmra.mxu3 %v3284_v39  ;;  %v2749_v20 = vsel %vm2748_vm15, %v4439_v3, %v2745_v21  ;;  %v2699_v30 = vmul.f32 %v2698_v0, %v6202_v50  ;;  %v2895_v24 = vmul.f32 %v2894_v55, %v6222_v48  ;;  %v2812_v10 = vadd.f32 0.001143296, %v2811_v36  ;;  %v7593_v3 = vld [vmem:[#allocation51_spill] sm:$0xff] }
 0x621   : > { %v3254_v13 = vadd.f32 1.0, %v4059_v22  ;;  %v2754_v37 = vsel %vm6822_vm13, %v2753_v25, %v2749_v20  ;;  %v2663_v43 = vsub.f32 1.0, %v2662_v40  ;;  %v2777_v56 = vmul.f32 %v2776_v59, %v6204_v51 }
 0x622   : > { %v2755_v5 = vmul.f32 %v2754_v37, %v6433_v34  ;;  %v6850_v29 = vadd.f32 1.0, %v2699_v30  ;;  %v2896_v18 = vadd.f32 0.112945676, %v2895_v24  ;;  %v2813_v16 = vmul.f32 %v2812_v10, %v6284_v47 }
 0x623   : > { %v3286_v53 = vmul.f32 %v3254_v13, %v7593_v3  ;;  %v2664_v50 = vmul.f32 %v4441_v63, %v2663_v43  ;;  %v2778_v58 = vadd.f32 0.4994258, %v2777_v56  ;;  %v2852_v15 = vadd.f32 0.001143296, %v2851_v27 }
 0x624   : > { %v3123_v14 = vadd.f32 0.0036580483, %v6573_v2  ;;  %v6856_v23 = vadd.f32 0.00028619796, %v6578_v12  ;;  %v4062_v25 = vclamps-f32 %v2755_v5, 1.0  ;;  %4442 = vrcp.f32 %v6850_v29  ;;  %v7597_v5 = vld [vmem:[#allocation76_spill] sm:$0xff] }
 0x625   : > { %3398 = vmatmul.f32.gmra.mxu0 %v3286_v53  ;;  %v2665_v34 = vadd.f32 %v4441_v63, %v2664_v50  ;;  %vm2666_vm1 = vweird.f32 %v6812_v49  ;;  %v2779_v8 = vmul.f32 %v2778_v58, %v6204_v51  ;;  %v2897_v61 = vmul.f32 %v2896_v18, %v6222_v48 }
 0x626   : > { %v3257_v28 = vadd.f32 1.0, %v4062_v25  ;;  %vm2668_vm2 = vmor %vm2666_vm1, %vm2667_vm0  ;;  %v2673_v57 = vor.u32 1.1754944e-38, %v2672_v32  ;;  %v2814_v19 = vadd.f32 0.014752088, %v2813_v16  ;;  %v2853_v2 = vmul.f32 %v2852_v15, %v6295_v7 }
 0x627   : > { %v2669_v12 = vsel %vm2668_vm2, %v4441_v63, %v2665_v34  ;;  %vm2671_vm3 = vcmp.eq.f32.partialorder %v2670_v41, 8.507059e+37  ;;  %v6864_v54 = vadd.f32 1.0, %v2779_v8  ;;  %v2898_v45 = vadd.f32 0.4994258, %v2897_v61 }
 0x628   : > { %v3289_v55 = vmul.f32 %v3257_v28, %v7594_v52  ;;  %v2674_v36 = vsel %vm2671_vm3, %v2673_v57, %v2669_v12  ;;  %v2815_v49 = vmul.f32 %v2814_v19, %v6284_v47  ;;  %v2854_v51 = vadd.f32 0.014752088, %v2853_v2 }
 0x629   : > { %v6870_v11 = vmul.f32 %v6693_v26, %v6447_v33  ;;  %v2675_v32 = vmul.f32 %v2674_v36, %v6444_v31  ;;  %v2710_v39 = vand.u32 2147483647, %v6850_v29  ;;  %4444 = vrcp.f32 %v6864_v54 }
 0x62a   : > { %v4443_v41 = vpop.eup %4442  ;;  %v6876_v63 = vmul.f32 %v3123_v14, %v6514_v17  ;;  %3521 = vmatmul.f32.gmra.mxu1 %v3289_v55  ;;  %v2899_v21 = vmul.f32 %v2898_v45, %v6222_v48  ;;  %v2816_v0 = vadd.f32 0.112945676, %v2815_v49  ;;  %v2855_v27 = vmul.f32 %v2854_v51, %v6295_v7 }
 0x62b   : > { %v4060_v22 = vclamps-f32 %v2675_v32, 1.0  ;;  %v2702_v26 = vmul.f32 %v4443_v41, %v6850_v29  ;;  %vm2706_vm4 = vweird.f32 %v6850_v29  ;;  %v2712_v31 = vand.u32 2147483648, %v6850_v29 }
 0x62c   : > { %v2790_v40 = vand.u32 2147483647, %v6864_v54  ;;  %v6884_v59 = vadd.f32 1.0, %v2899_v21  ;;  %v2817_v20 = vmul.f32 %v2816_v0, %v6284_v47  ;;  %v2856_v30 = vadd.f32 0.112945676, %v2855_v27 }
 0x62d   : > { %v3255_v24 = vadd.f32 1.0, %v4060_v22  ;;  %v2703_v10 = vsub.f32 1.0, %v2702_v26  ;;  %vm6887_vm5 = vcmp.eq.f32.partialorder %v2710_v39, 8.507059e+37  ;;  %v2931_v13 = vmul.f32 3.8918573e-05, %v6299_v38 }
 0x62e   : > { %vm2707_vm6 = vweird.f32 %v4443_v41  ;;  %v2792_v37 = vand.u32 2147483648, %v6864_v54  ;;  %4446 = vrcp.f32 %v6884_v59  ;;  %v2971_v43 = vmul.f32 3.8918573e-05, %v6352_v4 }
 0x62f   : > { %v4445_v56 = vpop.eup %4444  ;;  %v3287_v18 = vmul.f32 %v3255_v24, %v7597_v5  ;;  %v2704_v16 = vmul.f32 %v4443_v41, %v2703_v10  ;;  %v2818_v3 = vadd.f32 0.4994258, %v2817_v20  ;;  %v2857_v53 = vmul.f32 %v2856_v30, %v6295_v7  ;;  %vm2708_vm9 = vmor %vm2706_vm4, %vm2707_vm6 }
 0x630   : > { %v2713_v50 = vor.u32 1.1754944e-38, %v2712_v31  ;;  %v2782_v58 = vmul.f32 %v4445_v56, %v6864_v54  ;;  %vm2786_vm7 = vweird.f32 %v6864_v54  ;;  %vm6899_vm8 = vcmp.eq.f32.partialorder %v2790_v40, 8.507059e+37 }
 0x631   : > { %3439 = vmatmul.f32.gmra.mxu2 %v3287_v18  ;;  %v2705_v14 = vadd.f32 %v4443_v41, %v2704_v16  ;;  %v2819_v25 = vmul.f32 %v2818_v3, %v6284_v47  ;;  %v2858_v34 = vadd.f32 0.4994258, %v2857_v53  ;;  %v2932_v8 = vadd.f32 0.001143296, %v2931_v13 }
 0x632   : > { %v2783_v61 = vsub.f32 1.0, %v2782_v58  ;;  %v2793_v28 = vor.u32 1.1754944e-38, %v2792_v37  ;;  %v2910_v57 = vand.u32 2147483647, %v6884_v59  ;;  %v2972_v19 = vadd.f32 0.001143296, %v2971_v43 }
 0x633   : > { %v2709_v2 = vsel %vm2708_vm9, %v4443_v41, %v2705_v14  ;;  %vm2906_vm10 = vweird.f32 %v6884_v59  ;;  %v6909_v12 = vadd.f32 1.0, %v2819_v25  ;;  %v2859_v45 = vmul.f32 %v2858_v34, %v6295_v7  ;;  %v7602_v37 = vld [vmem:[#allocation78_spill] sm:$0xff] }
 0x634   : > { %v2933_v47 = vmul.f32 %v2932_v8, %v6299_v38  ;;  %v4447_v52 = vpop.eup %4446  ;;  %v2714_v55 = vsel %vm6887_vm5, %v2713_v50, %v2709_v2  ;;  %v2784_v29 = vmul.f32 %v4445_v56, %v2783_v61  ;;  %vm2787_vm11 = vweird.f32 %v4445_v56 }
 0x635   : > { %v2973_v36 = vmul.f32 %v2972_v19, %v6352_v4  ;;  %v2715_v49 = vmul.f32 %v2714_v55, %v6450_v62  ;;  %v2902_v51 = vmul.f32 %v4447_v52, %v6884_v59  ;;  %v2912_v32 = vand.u32 2147483648, %v6884_v59  ;;  %vm2788_vm14 = vmor %vm2786_vm7, %vm2787_vm11 }
 0x636   : > { %4448 = vrcp.f32 %v6909_v12  ;;  %v2785_v39 = vadd.f32 %v4445_v56, %v2784_v29  ;;  %vm2907_vm12 = vweird.f32 %v4447_v52  ;;  %vm6920_vm13 = vcmp.eq.f32.partialorder %v2910_v57, 8.507059e+37 }
 0x637   : > { %v3011_v41 = vmul.f32 3.8918573e-05, %v6373_v46  ;;  %v4061_v21 = vclamps-f32 %v2715_v49, 1.0  ;;  %v2903_v0 = vsub.f32 1.0, %v2902_v51  ;;  %v6927_v62 = vadd.f32 1.0, %v2859_v45  ;;  %vm2908_vm0 = vmor %vm2906_vm10, %vm2907_vm12  ;;  %v7605_v45 = vld [vmem:[#allocation79_spill] sm:$0xff] }
 0x638   : > { %v2934_v27 = vadd.f32 0.014752088, %v2933_v47  ;;  %v2789_v22 = vsel %vm2788_vm14, %v4445_v56, %v2785_v39  ;;  %v2830_v26 = vand.u32 2147483647, %v6909_v12  ;;  %v2832_v31 = vand.u32 2147483648, %v6909_v12 }
 0x639   : > { %v2974_v40 = vadd.f32 0.014752088, %v2973_v36  ;;  %v3256_v20 = vadd.f32 1.0, %v4061_v21  ;;  %v2794_v30 = vsel %vm6899_vm8, %v2793_v28, %v2789_v22  ;;  %v2904_v24 = vmul.f32 %v4447_v52, %v2903_v0 }
 0x63a   : > { %4450 = vrcp.f32 %v6927_v62  ;;  %v2795_v54 = vmul.f32 %v2794_v30, %v6453_v9  ;;  %v2913_v10 = vor.u32 1.1754944e-38, %v2912_v32  ;;  %vm2826_vm15 = vweird.f32 %v6909_v12 }
 0x63b   : > { %v3012_v48 = vadd.f32 0.001143296, %v3011_v41  ;;  %v3288_v43 = vmul.f32 %v3256_v20, %v7602_v37  ;;  %v2905_v56 = vadd.f32 %v4447_v52, %v2904_v24  ;;  %v2935_v5 = vmul.f32 %v2934_v27, %v6299_v38 }
 0x63c   : > { %v4449_v13 = vpop.eup %4448  ;;  %v2975_v18 = vmul.f32 %v2974_v40, %v6352_v4  ;;  %v4063_v16 = vclamps-f32 %v2795_v54, 1.0  ;;  %vm6943_vm1 = vcmp.eq.f32.partialorder %v2830_v26, 8.507059e+37  ;;  %v2833_v53 = vor.u32 1.1754944e-38, %v2832_v31 }
 0x63d   : > { %v2822_v3 = vmul.f32 %v4449_v13, %v6909_v12  ;;  %3480 = vmatmul.f32.gmra.mxu3 %v3288_v43  ;;  %v2909_v50 = vsel %vm2908_vm0, %v4447_v52, %v2905_v56  ;;  %v2870_v58 = vand.u32 2147483647, %v6927_v62  ;;  %v2936_v15 = vadd.f32 0.112945676, %v2935_v5  ;;  %v7608_v56 = vld [vmem:[#allocation91_spill] sm:$0xff] }
 0x63e   : > { %v2976_v14 = vadd.f32 0.112945676, %v2975_v18  ;;  %v3258_v25 = vadd.f32 1.0, %v4063_v16  ;;  %v2914_v34 = vsel %vm6920_vm13, %v2913_v10, %v2909_v50  ;;  %v3013_v59 = vmul.f32 %v3012_v48, %v6373_v46  ;;  %v7609_v16 = vld [vmem:[#allocation93_spill] sm:$0xff] }
 0x63f   : > { %v2823_v8 = vsub.f32 1.0, %v2822_v3  ;;  %v2915_v28 = vmul.f32 %v2914_v34, %v6465_v35  ;;  %v2937_v57 = vmul.f32 %v2936_v15, %v6299_v38  ;;  %v3091_v2 = vmul.f32 3.8918573e-05, %v6428_v42  ;;  %v7611_v34 = vld [vmem:[#allocation81_spill] sm:$0xff] }
 0x640   : > { %v4451_v61 = vpop.eup %4450  ;;  %v2977_v19 = vmul.f32 %v2976_v14, %v6352_v4  ;;  %v3290_v47 = vmul.f32 %v3258_v25, %v7605_v45  ;;  %vm2827_vm2 = vweird.f32 %v4449_v13  ;;  %v2872_v36 = vand.u32 2147483648, %v6927_v62 }
 0x641   : > { %v2824_v52 = vmul.f32 %v4449_v13, %v2823_v8  ;;  %v2862_v55 = vmul.f32 %v4451_v61, %v6927_v62  ;;  %v4066_v29 = vclamps-f32 %v2915_v28, 1.0  ;;  %v2938_v49 = vadd.f32 0.4994258, %v2937_v57  ;;  %vm2828_vm3 = vmor %vm2826_vm15, %vm2827_vm2 }
 0x642   : > { %v2978_v51 = vadd.f32 0.4994258, %v2977_v19  ;;  %3401 = vmatmul.f32.gmra.mxu0 %v3290_v47  ;;  %v3014_v39 = vadd.f32 0.014752088, %v3013_v59  ;;  %v3092_v7 = vadd.f32 0.001143296, %v3091_v2  ;;  %vm2867_vm4 = vweird.f32 %v4451_v61 }
 0x643   : > { %v2825_v32 = vadd.f32 %v4449_v13, %v2824_v52  ;;  %v2863_v35 = vsub.f32 1.0, %v2862_v55  ;;  %v3261_v41 = vadd.f32 1.0, %v4066_v29  ;;  %v2939_v21 = vmul.f32 %v2938_v49, %v6299_v38 }
 0x644   : > { %v2979_v0 = vmul.f32 %v2978_v51, %v6352_v4  ;;  %v3015_v26 = vmul.f32 %v3014_v39, %v6373_v46  ;;  %v3093_v31 = vmul.f32 %v3092_v7, %v6428_v42  ;;  %vm2866_vm5 = vweird.f32 %v6927_v62  ;;  %v7607_v62 = vld [vmem:[#allocation90_spill] sm:$0xff] }
 0x645   : > { %v2829_v27 = vsel %vm2828_vm3, %v4449_v13, %v2825_v32  ;;  %v2864_v22 = vmul.f32 %v4451_v61, %v2863_v35  ;;  %v3293_v40 = vmul.f32 %v3261_v41, %v6359_v1  ;;  %v6967_v30 = vadd.f32 1.0, %v2939_v21  ;;  %vm2868_vm6 = vmor %vm2866_vm5, %vm2867_vm4  ;;  %v7612_v32 = vld [vmem:[#allocation85_spill] sm:$0xff] }
 0x646   : > { %v2834_v20 = vsel %vm6943_vm1, %v2833_v53, %v2829_v27  ;;  %v6969_v12 = vadd.f32 1.0, %v2979_v0  ;;  %v3016_v4 = vadd.f32 0.112945676, %v3015_v26  ;;  %v2873_v54 = vor.u32 1.1754944e-38, %v2872_v36  ;;  %v7610_v53 = vld [vmem:[#allocation47_spill] sm:$0xff] }
 0x647   : > { %v2835_v24 = vmul.f32 %v2834_v20, %v6502_v60  ;;  %v2865_v38 = vadd.f32 %v4451_v61, %v2864_v22  ;;  %3524 = vmatmul.f32.gmra.mxu1 %v3293_v40  ;;  %4452 = vrcp.f32 %v6967_v30  ;;  %v3094_v1 = vadd.f32 0.014752088, %v3093_v31 }
 0x648   : > { %v3131_v10 = vmul.f32 3.8918573e-05, %v6514_v17  ;;  %vm2871_vm7 = vcmp.eq.f32.partialorder %v2870_v58, 8.507059e+37  ;;  %4454 = vrcp.f32 %v6969_v12  ;;  %v7606_v60 = vsub.f32 1.0, %v6542_v6 }
 0x649   : > { %v4064_v48 = vclamps-f32 %v2835_v24, 1.0  ;;  %v2869_v13 = vsel %vm2868_vm6, %v4451_v61, %v2865_v38  ;;  %v6984_v43 = vmul.f32 %v7607_v62, %v6447_v33  ;;  %v3162_v5 = vmul.f32 %v6856_v23, %v7608_v56 }
 0x64a   : > { %v6980_v37 = vmul.f32 %v6530_v44, %v7606_v60  ;;  %v2874_v18 = vsel %vm2871_vm7, %v2873_v54, %v2869_v13  ;;  %v6990_v3 = vmul.f32 %v7609_v16, %v6428_v42  ;;  %v3017_v6 = vmul.f32 %v3016_v4, %v6373_v46 }
 0x64b   : > { %v3259_v9 = vadd.f32 1.0, %v4064_v48  ;;  %v2875_v50 = vmul.f32 %v2874_v18, %v7610_v53  ;;  %v6995_v58 = vadd.f32 1.0, %v6870_v11  ;;  %v3095_v15 = vmul.f32 %v3094_v1, %v6428_v42  ;;  %v7614_v53 = vld [vmem:[#allocation57_spill] sm:$0xff] }
 0x64c   : > { %v3132_v14 = vadd.f32 0.001143296, %v3131_v10  ;;  %v3171_v25 = vmul.f32 3.8918573e-05, %v7608_v56  ;;  %v7000_v23 = vadd.f32 0.05243302, %v6876_v63  ;;  %vm2946_vm10 = vweird.f32 %v6967_v30 }
 0x64d   : > { %v3291_v8 = vmul.f32 %v3259_v9, %v7611_v34  ;;  %v4065_v59 = vclamps-f32 %v2875_v50, 1.0  ;;  %v3018_v61 = vadd.f32 0.4994258, %v3017_v6  ;;  %v4453_v28 = vpop.eup %4452  ;;  %v3163_v57 = vadd.f32 0.0036580483, %v3162_v5  ;;  %v7613_v5 = vld [vmem:[#allocation88_spill] sm:$0xff] }
 0x64e   : > { %v3096_v19 = vadd.f32 0.112945676, %v3095_v15  ;;  %v3133_v2 = vmul.f32 %v3132_v14, %v6514_v17  ;;  %v3172_v45 = vadd.f32 0.001143296, %v3171_v25  ;;  %v4455_v11 = vpop.eup %4454  ;;  %v2942_v52 = vmul.f32 %v4453_v28, %v6967_v30  ;;  %v7615_v14 = vld [vmem:[#allocation86_spill] sm:$0xff] }
 0x64f   : > { %3442 = vmatmul.f32.gmra.mxu2 %v3291_v8  ;;  %v3260_v47 = vadd.f32 1.0, %v4065_v59  ;;  %v2950_v55 = vand.u32 2147483647, %v6967_v30  ;;  %v3019_v63 = vmul.f32 %v3018_v61, %v6373_v46  ;;  %v2952_v29 = vand.u32 2147483648, %v6967_v30 }
 0x650   : > { %v2982_v36 = vmul.f32 %v4455_v11, %v6969_v12  ;;  %v3097_v49 = vmul.f32 %v3096_v19, %v6428_v42  ;;  %v3134_v51 = vadd.f32 0.014752088, %v3133_v2  ;;  %v2943_v39 = vsub.f32 1.0, %v2942_v52 }
 0x651   : > { %v3292_v35 = vmul.f32 %v3260_v47, %v7612_v32  ;;  %v7011_v7 = vadd.f32 1.0, %v3019_v63  ;;  %v3173_v41 = vmul.f32 %v3172_v45, %v7608_v56  ;;  %v2990_v0 = vand.u32 2147483647, %v6969_v12 }
 0x652   : > { %v2983_v21 = vsub.f32 1.0, %v2982_v36  ;;  %v3098_v27 = vadd.f32 0.4994258, %v3097_v49  ;;  %v3135_v46 = vmul.f32 %v3134_v51, %v6514_v17  ;;  %v2944_v22 = vmul.f32 %v4453_v28, %v2943_v39  ;;  %v7619_v36 = vld [vmem:[#allocation69_spill] sm:$0xff] }
 0x653   : > { %3483 = vmatmul.f32.gmra.mxu3 %v3292_v35  ;;  %vm2947_vm8 = vweird.f32 %v4453_v28  ;;  %v2992_v26 = vand.u32 2147483648, %v6969_v12  ;;  %4456 = vrcp.f32 %v7011_v7  ;;  %vm2987_vm9 = vweird.f32 %v4455_v11  ;;  %v7620_v35 = vld [vmem:[#allocation43_spill] sm:$0xff] }
 0x654   : > { %v2984_v31 = vmul.f32 %v4455_v11, %v2983_v21  ;;  %v3099_v40 = vmul.f32 %v3098_v27, %v6428_v42  ;;  %v3136_v20 = vadd.f32 0.112945676, %v3135_v46  ;;  %v2945_v24 = vadd.f32 %v4453_v28, %v2944_v22  ;;  %vm2948_vm12 = vmor %vm2946_vm10, %vm2947_vm8 }
 0x655   : > { %vm2986_vm11 = vweird.f32 %v6969_v12  ;;  %v3174_v38 = vadd.f32 0.014752088, %v3173_v41  ;;  %v2953_v4 = vor.u32 1.1754944e-38, %v2952_v29  ;;  %vm2951_vm13 = vcmp.eq.f32.partialorder %v2950_v55, 8.507059e+37 }
 0x656   : > { %v2985_v54 = vadd.f32 %v4455_v11, %v2984_v31  ;;  %v7021_v1 = vadd.f32 1.0, %v3099_v40  ;;  %v3137_v10 = vmul.f32 %v3136_v20, %v6514_v17  ;;  %v2949_v48 = vsel %vm2948_vm12, %v4453_v28, %v2945_v24  ;;  %vm2988_vm14 = vmor %vm2986_vm11, %vm2987_vm9 }
 0x657   : > { %v2993_v13 = vor.u32 1.1754944e-38, %v2992_v26  ;;  %v3175_v42 = vmul.f32 %v3174_v38, %v7608_v56  ;;  %v2954_v60 = vsel %vm2951_vm13, %v2953_v4, %v2949_v48  ;;  %vm2991_vm15 = vcmp.eq.f32.partialorder %v2990_v0, 8.507059e+37 }
 0x658   : > { %v2989_v62 = vsel %vm2988_vm14, %v4455_v11, %v2985_v54  ;;  %4458 = vrcp.f32 %v7021_v1  ;;  %vm3067_vm0 = vweird.f32 %v6530_v44  ;;  %v3207_v12 = vadd.f32 0.18741608, %v6984_v43  ;;  %v7623_v54 = vld [vmem:[#allocation92_spill] sm:$0xff] }
 0x659   : > { %v4457_v30 = vpop.eup %4456  ;;  %4460 = vrcp.f32 %v6995_v58  ;;  %v2955_v18 = vmul.f32 %v2954_v60, %v7613_v5  ;;  %v2994_v16 = vsel %vm2991_vm15, %v2993_v13, %v2989_v62  ;;  %v7032_v9 = vadd.f32 %v6530_v44, %v6980_v37  ;;  %v7624_v5 = vld [vmem:[#allocation82_spill] sm:$0xff] }
 0x65a   : > { %v2995_v50 = vmul.f32 %v2994_v16, %v7614_v53  ;;  %v3022_v6 = vmul.f32 %v4457_v30, %v7011_v7  ;;  %v3138_v15 = vadd.f32 0.4994258, %v3137_v10  ;;  %vm3066_vm1 = vweird.f32 %v7615_v14 }
 0x65b   : > { %v3089_v25 = vadd.f32 1.1283791, %v6990_v3  ;;  %v3164_v43 = vmul.f32 %v3163_v57, %v7608_v56  ;;  %v4067_v34 = vclamps-f32 %v2955_v18, 1.0  ;;  %v3176_v8 = vadd.f32 0.112945676, %v3175_v42  ;;  %vm7069_vm8 = vmor %vm3066_vm1, %vm3067_vm0 }
 0x65c   : > { %v3126_v59 = vmul.f32 %v7000_v23, %v6514_v17  ;;  %v4068_v61 = vclamps-f32 %v2995_v50, 1.0  ;;  %v3023_v28 = vsub.f32 1.0, %v3022_v6  ;;  %v3139_v37 = vmul.f32 %v3138_v15, %v6514_v17 }
 0x65d   : > { %v3262_v19 = vadd.f32 1.0, %v4067_v34  ;;  %v3030_v2 = vand.u32 2147483647, %v7011_v7  ;;  %v3032_v45 = vand.u32 2147483648, %v7011_v7  ;;  %v3177_v11 = vmul.f32 %v3176_v8, %v7608_v56 }
 0x65e   : > { %v4459_v47 = vpop.eup %4458  ;;  %v3263_v3 = vadd.f32 1.0, %v4068_v61  ;;  %v3024_v52 = vmul.f32 %v4457_v30, %v3023_v28  ;;  %vm3027_vm2 = vweird.f32 %v4457_v30  ;;  %v7045_v57 = vadd.f32 1.0, %v3139_v37  ;;  %v7627_v28 = vld [vmem:[#allocation71_spill] sm:$0xff] }
 0x65f   : > { %v7047_v55 = vpop.eup %4460  ;;  %v7616_v23 = vand.u32 2147483647, %v7615_v14  ;;  %v3165_v29 = vadd.f32 0.05243302, %v3164_v43  ;;  %v3294_v49 = vmul.f32 %v3262_v19, %v7619_v36  ;;  %v3102_v51 = vmul.f32 %v4459_v47, %v7021_v1  ;;  %v3428_v14 = vpop.f32.mrf.mxu2 }
 0x660   : > { %v3178_v32 = vadd.f32 0.4994258, %v3177_v11  ;;  %v3295_v39 = vmul.f32 %v3263_v3, %v7620_v35  ;;  %v3025_v41 = vadd.f32 %v4457_v30, %v3024_v52  ;;  %vm3026_vm4 = vweird.f32 %v7011_v7 }
 0x661   : > { %vm7051_vm3 = vcmp.eq.f32.partialorder %v7616_v23, 8.507059e+37  ;;  %4462 = vrcp.f32 %v7045_v57  ;;  %v3127_v21 = vadd.f32 0.18741608, %v3126_v59  ;;  %3404 = vmatmul.f32.gmra.mxu0 %v3294_v49  ;;  %vm3028_vm5 = vmor %vm3026_vm4, %vm3027_vm2  ;;  %v3033_v0 = vor.u32 1.1754944e-38, %v3032_v45  ;;  %v3469_v59 = vpop.f32.mrf.mxu3 }
 0x662   : > { %v3103_v27 = vsub.f32 1.0, %v3102_v51  ;;  %v3179_v46 = vmul.f32 %v3178_v32, %v7608_v56  ;;  %v3222_v22 = vmul.f32 %v7047_v55, %v6995_v58  ;;  %3445 = vmatmul.f32.gmra.mxu2 %v3295_v39  ;;  %v3029_v26 = vsel %vm3028_vm5, %v4457_v30, %v3025_v41  ;;  %v7628_v32 = vld [vmem:[#allocation46_spill] sm:$0xff] }
 0x663   : > { %vm3031_vm6 = vcmp.eq.f32.partialorder %v3030_v2, 8.507059e+37  ;;  %v3112_v31 = vand.u32 2147483648, %v7021_v1  ;;  %vm3107_vm7 = vweird.f32 %v4459_v47  ;;  %v3110_v7 = vand.u32 2147483647, %v7021_v1 }
 0x664   : > { %v3034_v40 = vsel %vm3031_vm6, %v3033_v0, %v3029_v26  ;;  %v3104_v20 = vmul.f32 %v4459_v47, %v3103_v27  ;;  %v7074_v38 = vmul.f32 %v3207_v12, %v6447_v33  ;;  %v3166_v4 = vmul.f32 %v3165_v29, %v7608_v56 }
 0x665   : > { %v3035_v10 = vmul.f32 %v3034_v40, %v7623_v54  ;;  %v7078_v48 = vadd.f32 1.0, %v3179_v46  ;;  %v3069_v13 = vsel %vm7069_vm8, %v6530_v44, %v7032_v9  ;;  %v3128_v42 = vmul.f32 %v3127_v21, %v6514_v17  ;;  %v7092_v17 = vld [vmem:[%s7625_s17] ss:$0 sm:$0xff]  ;;  %v3387_v44 = vpop.f32.mrf.mxu0  ;;  %v7629_v21 = vld [vmem:[#allocation73_spill] sm:$0xff]  ;;  %s3805_s17 = sshll.u32 %s5251_s5, 4  ;;  %s3806_s17 = int_to_ptr.vmem [resolvable:$true] %s3805_s17 }
 0x666   : > { %v3105_v60 = vadd.f32 %v4459_v47, %v3104_v20  ;;  %vm3106_vm9 = vweird.f32 %v7021_v1  ;;  %v3223_v30 = vsub.f32 1.0, %v3222_v22  ;;  %v3113_v12 = vor.u32 1.1754944e-38, %v3112_v31  ;;  %v7626_v1 = vld [vmem:[#allocation55_spill] sm:$0xff] }
 0x667   : > { %v4463_v62 = vpop.eup %4462  ;;  %v4069_v33 = vclamps-f32 %v3035_v10, 1.0  ;;  %vm3108_vm10 = vmor %vm3106_vm9, %vm3107_vm7  ;;  %4464 = vrcp.f32 %v7078_v48  ;;  %v3090_v18 = vmul.f32 %v3089_v25, %v7624_v5  ;;  %vm3111_vm11 = vcmp.eq.f32.partialorder %v3110_v7, 8.507059e+37  ;;  %v3431_v40 = vpop.f32.mrf.mxu2 }
 0x668   : > { %v3109_v16 = vsel %vm3108_vm10, %v4459_v47, %v3105_v60  ;;  %v3142_v53 = vmul.f32 %v4463_v62, %v7045_v57  ;;  %v3074_v9 = vsel %vm7051_vm3, %v7626_v1, %v3069_v13  ;;  %v3167_v50 = vadd.f32 0.18741608, %v3166_v4  ;;  %v7630_v4 = vld [vmem:[#allocation52_spill] sm:$0xff] }
 0x669   : > { %v3264_v6 = vadd.f32 1.0, %v4069_v33  ;;  %v3114_v15 = vsel %vm3111_vm11, %v3113_v12, %v3109_v16  ;;  %vm3226_vm12 = vweird.f32 %v6995_v58  ;;  %v3129_v25 = vadd.f32 1.1283791, %v3128_v42  ;;  %v7633_v42 = vld [vmem:[#allocation72_spill] sm:$0xff]  ;;  %v7634_v16 = vld [vmem:[#allocation89_spill] sm:$0xff] }
 0x66a   : > { %v3115_v43 = vmul.f32 %v3114_v15, %v3090_v18  ;;  %v3143_v34 = vsub.f32 1.0, %v3142_v53  ;;  %v3388_v8 = vadd.f32 %v7092_v17, %v3387_v44  ;;  %v3224_v61 = vmul.f32 %v7047_v55, %v3223_v30 }
 0x66b   : > { %v3296_v37 = vmul.f32 %v3264_v6, %v7627_v28  ;;  %v3150_v19 = vand.u32 2147483647, %v7045_v57  ;;  %v3152_v2 = vand.u32 2147483648, %v7045_v57  ;;  %vm3147_vm13 = vweird.f32 %v4463_v62  ;;  %v7636_v6 = vld [vmem:[#allocation59_spill] sm:$0xff] }
 0x66c   : > { %v4071_v45 = vclamps-f32 %v3115_v43, 1.0  ;;  %v3144_v11 = vmul.f32 %v4463_v62, %v3143_v34  ;;  %v3429_v47 = vadd.f32 %v3428_v14, %v3388_v8  ;;  %vm3227_vm14 = vweird.f32 %v7047_v55 }
 0x66d   : > { %v4465_v3 = vpop.eup %4464  ;;  %v3230_v52 = vand.u32 2147483647, %v6995_v58  ;;  %v3232_v23 = vand.u32 2147483648, %v6995_v58  ;;  %v3168_v63 = vmul.f32 %v3167_v50, %v7608_v56  ;;  %3486 = vmatmul.f32.gmra.mxu3 %v3296_v37  ;;  %vm3146_vm15 = vweird.f32 %v7045_v57  ;;  %v3390_v46 = vpop.f32.mrf.mxu0  ;;  %vm7123_vm3 = vmor %vm3226_vm12, %vm3227_vm14  ;;  %v7635_v50 = vld [vmem:[#allocation42_spill] sm:$0xff] }
 0x66e   : > { %v3266_v29 = vadd.f32 1.0, %v4071_v45  ;;  %v3145_v36 = vadd.f32 %v4463_v62, %v3144_v11  ;;  %v3182_v49 = vmul.f32 %v4465_v3, %v7078_v48  ;;  %v3225_v51 = vadd.f32 %v7047_v55, %v3224_v61  ;;  %vm3148_vm0 = vmor %vm3146_vm15, %vm3147_vm13  ;;  %v7638_v61 = vld [vmem:[#allocation35_spill] sm:$0xff] }
 0x66f   : > { %v3130_v35 = vmul.f32 %v3129_v25, %v7628_v32  ;;  %v3153_v39 = vor.u32 1.1754944e-38, %v3152_v2  ;;  %v7111_v41 = vadd.f32 %v3469_v59, %v3429_v47  ;;  %vm3151_vm1 = vcmp.eq.f32.partialorder %v3150_v19, 8.507059e+37  ;;  %v7639_v11 = vld [vmem:[#allocation87_spill] sm:$0xff] }
 0x670   : > { %v3298_v0 = vmul.f32 %v3266_v29, %v7629_v21  ;;  %v3149_v27 = vsel %vm3148_vm0, %v4463_v62, %v3145_v36  ;;  %v3183_v56 = vsub.f32 1.0, %v3182_v49  ;;  %v3169_v22 = vadd.f32 1.1283791, %v3168_v63  ;;  %v7641_v32 = vld [vmem:[#allocation83_spill] sm:$0xff] }
 0x671   : > { %v3154_v26 = vsel %vm3151_vm1, %v3153_v39, %v3149_v27  ;;  %v3192_v57 = vand.u32 2147483648, %v7078_v48  ;;  %v3391_v31 = vadd.f32 %v7092_v17, %v3390_v46  ;;  %vm3187_vm2 = vweird.f32 %v4465_v3 }
 0x672   : > { %3407 = vmatmul.f32.gmra.mxu0 %v3298_v0  ;;  %v3155_v20 = vmul.f32 %v3154_v26, %v3130_v35  ;;  %v3184_v7 = vmul.f32 %v4465_v3, %v3183_v56  ;;  %v3190_v24 = vand.u32 2147483647, %v7078_v48  ;;  %v3075_v54 = vmul.f32 %v3074_v9, %v7630_v4  ;;  %v3513_v9 = vpop.f32.mrf.mxu1 }
 0x673   : > { %v3209_v10 = vadd.f32 1.1283791, %v7074_v38  ;;  %v1923_v60 = vmul.f32 0.5, %v7633_v42  ;;  %v3432_v62 = vadd.f32 %v3431_v40, %v3391_v31  ;;  %v3229_v30 = vsel %vm7123_vm3, %v7047_v55, %v3225_v51  ;;  %v3472_v38 = vpop.f32.mrf.mxu3 }
 0x674   : > { %v4072_v33 = vclamps-f32 %v3155_v20, 1.0  ;;  %v3185_v12 = vadd.f32 %v4465_v3, %v3184_v7  ;;  %vm3186_vm4 = vweird.f32 %v7078_v48  ;;  %vm3231_vm5 = vcmp.eq.f32.partialorder %v3230_v52, 8.507059e+37  ;;  %v7637_v48 = vld [vmem:[#allocation84_spill] sm:$0xff]  ;;  %v7640_v52 = vld [vmem:[#allocation75_spill] sm:$0xff] }
 0x675   : > { %v3233_v5 = vor.u32 1.1754944e-38, %v3232_v23  ;;  %vm3188_vm6 = vmor %vm3186_vm4, %vm3187_vm2  ;;  %v3193_v58 = vor.u32 1.1754944e-38, %v3192_v57  ;;  %v3473_v18 = vadd.f32 %v3472_v38, %v3432_v62  ;;  %v3170_v53 = vmul.f32 %v3169_v22, %v7634_v16  ;;  %v3393_v51 = vpop.f32.mrf.mxu0  ;;  %v7642_v57 = vld [vmem:[#allocation36_spill] sm:$0xff] }
 0x676   : > { %v3267_v44 = vadd.f32 1.0, %v4072_v33  ;;  %v3189_v1 = vsel %vm3188_vm6, %v4465_v3, %v3185_v12  ;;  %vm3191_vm7 = vcmp.eq.f32.partialorder %v3190_v24, 8.507059e+37  ;;  %v3273_v15 = vmul.f32 %v7636_v6, %v7635_v50 }
 0x677   : > { %v3234_v55 = vsel %vm3231_vm5, %v3233_v5, %v3229_v30  ;;  %v3194_v14 = vsel %vm3191_vm7, %v3193_v58, %v3189_v1  ;;  %v3514_v25 = vadd.f32 %v3513_v9, %v3473_v18  ;;  %v4070_v43 = vclamps-f32 %v3075_v54, 1.0 }
 0x678   : > { %v3210_v34 = vmul.f32 %v3209_v10, %v7637_v48  ;;  %v3299_v8 = vmul.f32 %v3267_v44, %v1923_v60  ;;  %v3195_v59 = vmul.f32 %v3194_v14, %v3170_v53  ;;  %v1924_v47 = vmul.f32 0.5, %v7639_v11  ;;  %v7643_v60 = vld [vmem:[#allocation37_spill] sm:$0xff]  ;;  %v7644_v44 = vld [vmem:[#allocation38_spill] sm:$0xff] }
 0x679   : > { %v7137_v28 = vadd.f32 %v3514_v25, %v7638_v61  ;;  %v3265_v45 = vadd.f32 1.0, %v4070_v43  ;;  %v1921_v23 = vmul.f32 0.5, %v7640_v52  ;;  %v1925_v35 = vmul.f32 0.5, %v7641_v32 }
 0x67a   : > { %v3235_v37 = vmul.f32 %v3234_v55, %v3210_v34  ;;  %3448 = vmatmul.f32.gmra.mxu2 %v3299_v8  ;;  %v4073_v19 = vclamps-f32 %v3195_v59, 1.0  ;;  %3509 = vmatmul.f32.vlgmr.msrb.gmra.mxu0 %v3273_v15  ;;  %v3394_v0 = vadd.f32 %v7092_v17, %v3393_v51  ;;  %v3516_v22 = vpop.f32.mrf.mxu1  ;;  %v7645_v34 = vld [vmem:[#allocation39_spill] sm:$0xff] }
 0x67b   : > { %3546 = vadd.xlane.f32.xlu0 %v7137_v28  ;;  %v3561_v2 = vmul.f32 %v7137_v28, %v7137_v28  ;;  %v3297_v36 = vmul.f32 %v3265_v45, %v1921_v23  ;;  %v7646_v23 = vld [vmem:[#allocation34_spill] sm:$0xff] }
 0x67c   : > { %v3268_v3 = vadd.f32 1.0, %v4073_v19  ;;  %v4074_v63 = vclamps-f32 %v3235_v37, 1.0 }
 0x67d   : > { %3570 = vadd.xlane.f32.xlu2 %v3561_v2 }
 0x67e   : > { %v3300_v29 = vmul.f32 %v3268_v3, %v1924_v47  ;;  %v3269_v49 = vadd.f32 1.0, %v4074_v63  ;;  %v3434_v39 = vpop.f32.mrf.mxu2 }
 0x67f   : > { %v3435_v27 = vadd.f32 %v3434_v39, %v3394_v0 }
 0x680   : > { %3489 = vmatmul.f32.gmra.mxu3 %v3300_v29  ;;  %v3301_v21 = vmul.f32 %v3269_v49, %v1925_v35 }
 0x682   : > { %3527 = vmatmul.f32.vlgmr.msrb.gmra.mxu2 %v3297_v36 }
 0x688   : > { %3530 = vmatmul.f32.vlgmr.msrb.gmra.mxu3 %v3301_v21  ;;  %v3475_v56 = vpop.f32.mrf.mxu3  ;;  %v3396_v20 = vpop.f32.mrf.mxu0 }
 0x689   : > { %v3476_v46 = vadd.f32 %v3475_v56, %v3435_v27  ;;  %v3397_v24 = vadd.f32 %v7092_v17, %v3396_v20  ;;  %v7647_v20 = vld [vmem:[#allocation40_spill] sm:$0xff] }
 0x68b   : > { %v3517_v26 = vadd.f32 %v3516_v22, %v3476_v46 }
 0x68d   : > { %v7147_v31 = vadd.f32 %v3517_v26, %v7642_v57 }
 0x68f   : > { %3548 = vadd.xlane.f32.xlu1 %v7147_v31  ;;  %v3562_v40 = vmul.f32 %v7147_v31, %v7147_v31  ;;  %v3519_v13 = vpop.f32.mrf.mxu1 }
 0x691   : > { %3572 = vadd.xlane.f32.xlu0 %v3562_v40 }
 0x69b   : > { %v3437_v7 = vpop.f32.mrf.mxu2 }
 0x69c   : > { %v3438_v4 = vadd.f32 %v3437_v7, %v3397_v24 }
 0x6a2   : > { %v3399_v33 = vpop.f32.mrf.mxu0 }
 0x6a3   : > { %v3478_v54 = vpop.f32.mrf.mxu3  ;;  %v3400_v38 = vadd.f32 %v7092_v17, %v3399_v33 }
 0x6a4   : > { %v3479_v10 = vadd.f32 %v3478_v54, %v3438_v4 }
 0x6a6   : > { %v3520_v42 = vadd.f32 %v3519_v13, %v3479_v10 }
 0x6a7   : > { %v3522_v16 = vpop.f32.mrf.mxu1 }
 0x6a8   : > { %v7154_v62 = vadd.f32 %v3520_v42, %v7643_v60 }
 0x6aa   : > { %3550 = vadd.xlane.f32.xlu2 %v7154_v62  ;;  %v3563_v30 = vmul.f32 %v7154_v62, %v7154_v62 }
 0x6ac   : > { %3574 = vadd.xlane.f32.xlu1 %v3563_v30 }
 0x6b4   : > { %v3440_v12 = vpop.f32.mrf.mxu2 }
 0x6b5   : > { %v3441_v5 = vadd.f32 %v3440_v12, %v3400_v38  ;;  %v7648_v38 = vld [vmem:[#allocation41_spill] sm:$0xff] }
 0x6bf   : > { %v3402_v50 = vpop.f32.mrf.mxu0 }
 0x6c0   : > { %v3481_v58 = vpop.f32.mrf.mxu3  ;;  %v3403_v6 = vadd.f32 %v7092_v17, %v3402_v50  ;;  %v7201_v50 = vld [vmem:[%s7650_s19] ss:$0 sm:$0xff]  ;;  %s4742_s19 = scalar_lea.hbm %s7653_s27, 256 }
 0x6c1   : > { %v3482_v18 = vadd.f32 %v3481_v58, %v3441_v5 }
 0x6c3   : > { %v3523_v53 = vadd.f32 %v3522_v16, %v3482_v18 }
 0x6c4   : > { %v3525_v43 = vpop.f32.mrf.mxu1 }
 0x6c5   : > { %v7161_v1 = vadd.f32 %v3523_v53, %v7644_v44  ;;  %v7196_v44 = vld [vmem:[%s7649_s8] ss:$0 sm:$0xff]  ;;  %s4738_s8 = scalar_lea.hbm %s4737_s0, 64 }
 0x6c6   : > { %p4739_p1 = scmp.ne.s32.totalorder %s4737_s0, %s4738_s8  ;;  %p4744_p9 = scmp.lt.s32.totalorder %s4742_s19, %s4738_s8 }
 0x6c7   : > { %3552 = vadd.xlane.f32.xlu0 %v7161_v1  ;;  %v3564_v9 = vmul.f32 %v7161_v1, %v7161_v1 }
 0x6c8   : > { %p4740_p13 = pnand %p4739_p1, %p5157_p0  ;;  %p4745_p7 = por %p4744_p9, %p4743_p5 }
 0x6c9   : > { %3576 = vadd.xlane.f32.xlu2 %v3564_v9 }
 0x6ca   : > { %p4741_p4 = pneg %p4740_p13 }
 0x6cc   : > { %p4746_p10 = pnand %p4745_p7, %p4741_p4 }
 0x6d2   : > { %v3443_v15 = vpop.f32.mrf.mxu2 }
 0x6d3   : > { %v3444_v55 = vadd.f32 %v3443_v15, %v3403_v6 }
 0x6d6   : > { %v3484_v14 = vpop.f32.mrf.mxu3 }
 0x6d7   : > { %v3485_v25 = vadd.f32 %v3484_v14, %v3444_v55 }
 0x6d9   : > { %v3526_v48 = vadd.f32 %v3525_v43, %v3485_v25 }
 0x6db   : > { %v7168_v8 = vadd.f32 %v3526_v48, %v7645_v34 }
 0x6dd   : > { %3554 = vadd.xlane.f32.xlu1 %v7168_v8 }
 0x6de   : > { %v3405_v59 = vpop.f32.mrf.mxu0 }
 0x6df   : > { %v3406_v32 = vadd.f32 %v7092_v17, %v3405_v59 }
 0x6e5   : > { %v3446_v37 = vpop.f32.mrf.mxu2 }
 0x6e6   : > { %v3447_v35 = vadd.f32 %v3446_v37, %v3406_v32 }
 0x6ee   : > { %v3547_v45 = vpop.xlane.xlu0 %3546 }
 0x6ef   : > { %v3408_v61 = vpop.f32.mrf.mxu0  ;;  %v3585_v3 = vmul.f32 0.0078125, %v3547_v45 }
 0x6f0   : > { %v3571_v11 = vpop.xlane.xlu2 %3570  ;;  %v3487_v47 = vpop.f32.mrf.mxu3  ;;  %v3409_v21 = vadd.f32 %v7092_v17, %v3408_v61 }
 0x6f1   : > { %v3593_v52 = vmul.f32 0.0078125, %v3571_v11  ;;  %v3601_v29 = vmul.f32 %v3585_v3, %v3585_v3  ;;  %v3488_v0 = vadd.f32 %v3487_v47, %v3447_v35  ;;  %v3617_v53 = vsub.f32 %v7137_v28, %v3585_v3 }
 0x6f2   : > { %v3565_v28 = vmul.f32 %v7168_v8, %v7168_v8 }
 0x6f3   : > { %v3609_v51 = vsub.f32 %v3593_v52, %v3601_v29 }
 0x6f7   : > { %v3510_v19 = vpop.f32.mrf.mxu0 }
 0x6f8   : > { %v3511_v2 = vadd.f32 %v3510_v19, %v7111_v41  ;;  %v3625_v41 = vadd.f32 1e-05, %v3609_v51 }
 0x6fa   : > { %v7173_v63 = vadd.f32 %v3511_v2, %v7646_v23  ;;  %4466 = vrsqrt.f32 %v3625_v41  ;;  %vm3648_vm9 = vweird.f32 %v3625_v41 }
 0x6fc   : > { %3544 = vadd.xlane.f32.xlu2 %v7173_v63  ;;  %v3560_v36 = vmul.f32 %v7173_v63, %v7173_v63 }
 0x6fd   : > { %v3449_v49 = vpop.f32.mrf.mxu2 }
 0x6fe   : > { %3568 = vadd.xlane.f32.xlu1 %v3560_v36  ;;  %v3450_v46 = vadd.f32 %v3449_v49, %v3409_v21 }
 0x700   : > { %v4467_v57 = vpop.eup %4466 }
 0x701   : > { %v3643_v24 = vmul.f32 %v4467_v57, %v3625_v41  ;;  %vm3649_vm8 = vweird.f32 %v4467_v57 }
 0x702   : > { %v3549_v56 = vpop.xlane.xlu1 %3548  ;;  %vm3650_vm10 = vmor %vm3648_vm9, %vm3649_vm8 }
 0x703   : > { %v3490_v39 = vpop.f32.mrf.mxu3  ;;  %v3586_v26 = vmul.f32 0.0078125, %v3549_v56  ;;  %v3644_v13 = vmul.f32 %v4467_v57, %v3643_v24 }
 0x704   : > { %v3573_v40 = vpop.xlane.xlu0 %3572  ;;  %v3491_v10 = vadd.f32 %v3490_v39, %v3450_v46 }
 0x705   : > { %v3528_v27 = vpop.f32.mrf.mxu2  ;;  %v3602_v4 = vmul.f32 %v3586_v26, %v3586_v26  ;;  %v3594_v54 = vmul.f32 0.0078125, %v3573_v40  ;;  %v3645_v33 = vmul.f32 0.5, %v3644_v13  ;;  %v3618_v61 = vsub.f32 %v7147_v31, %v3586_v26 }
 0x706   : > { %v3529_v22 = vadd.f32 %v3528_v27, %v3488_v0 }
 0x707   : > { %v3610_v60 = vsub.f32 %v3594_v54, %v3602_v4  ;;  %v3646_v58 = vsub.f32 1.5, %v3645_v33 }
 0x708   : > { %v7181_v7 = vadd.f32 %v3529_v22, %v7647_v20 }
 0x709   : > { %v3626_v12 = vadd.f32 1e-05, %v3610_v60  ;;  %v3647_v16 = vmul.f32 %v4467_v57, %v3646_v58 }
 0x70a   : > { %3556 = vadd.xlane.f32.xlu2 %v7181_v7  ;;  %v3566_v17 = vmul.f32 %v7181_v7, %v7181_v7 }
 0x70b   : > { %v3531_v42 = vpop.f32.mrf.mxu3  ;;  %4468 = vrsqrt.f32 %v3626_v12  ;;  %v3651_v9 = vsel %vm3650_vm10, %v4467_v57, %v3647_v16  ;;  %vm3658_vm12 = vweird.f32 %v3626_v12 }
 0x70c   : > { %v3532_v30 = vadd.f32 %v3531_v42, %v3491_v10  ;;  %3580 = vadd.xlane.f32.xlu1 %v3566_v17  ;;  %v3713_v6 = vmul.f32 %v3651_v9, %v3617_v53 }
 0x70e   : > { %v7187_v5 = vadd.f32 %v3532_v30, %v7648_v38  ;;  %v3724_v55 = vmul.f32 %v7196_v44, %v3713_v6 }
 0x710   : > { %3558 = vadd.xlane.f32.xlu0 %v7187_v5  ;;  %v3567_v18 = vmul.f32 %v7187_v5, %v7187_v5  ;;  %v3735_v25 = vadd.f32 %v7201_v50, %v3724_v55 }
 0x711   : > { %v4469_v15 = vpop.eup %4468 }
 0x712   : > { %3582 = vadd.xlane.f32.xlu2 %v3567_v18  ;;  %v3653_v14 = vmul.f32 %v4469_v15, %v3626_v12  ;;  %3743 = vst [vmem:[%s5249_s28 + $0x8] sm:$0xff] %v3735_v25  ;;  %vm3659_vm11 = vweird.f32 %v4469_v15 }
 0x713   : > { %vm3660_vm13 = vmor %vm3658_vm12, %vm3659_vm11 }
 0x714   : > { %v3654_v43 = vmul.f32 %v4469_v15, %v3653_v14 }
 0x716   : > { %v3655_v48 = vmul.f32 0.5, %v3654_v43 }
 0x718   : > { %3578 = vadd.xlane.f32.xlu0 %v3565_v28  ;;  %v3656_v34 = vsub.f32 1.5, %v3655_v48 }
 0x71a   : > { %v3657_v59 = vmul.f32 %v4469_v15, %v3656_v34 }
 0x71c   : > { %v3661_v19 = vsel %vm3660_vm13, %v4469_v15, %v3657_v59 }
 0x71d   : > { %v3551_v37 = vpop.xlane.xlu2 %3550  ;;  %v3714_v45 = vmul.f32 %v3661_v19, %v3618_v61 }
 0x71e   : > { %v3587_v2 = vmul.f32 0.0078125, %v3551_v37 }
 0x71f   : > { %v3575_v11 = vpop.xlane.xlu1 %3574  ;;  %v3725_v52 = vmul.f32 %v7196_v44, %v3714_v45 }
 0x720   : > { %v3603_v47 = vmul.f32 %v3587_v2, %v3587_v2  ;;  %v3595_v3 = vmul.f32 0.0078125, %v3575_v11 }
 0x721   : > { %v3736_v29 = vadd.f32 %v7201_v50, %v3725_v52 }
 0x722   : > { %v3611_v23 = vsub.f32 %v3595_v3, %v3603_v47 }
 0x723   : > { %3744 = vst [vmem:[%s5249_s28 + $0x10] sm:$0xff] %v3736_v29 }
 0x724   : > { %v3627_v36 = vadd.f32 1e-05, %v3611_v23 }
 0x726   : > { %4470 = vrsqrt.f32 %v3627_v36 }
 0x72c   : > { %v4471_v31 = vpop.eup %4470 }
 0x72d   : > { %v3663_v49 = vmul.f32 %v4471_v31, %v3627_v36 }
 0x72e   : > { %4749 = shalt.err (!%p4746_p10)
}
 0x72f   : > { %s4908_s5 = smov 128   ;;  %s4909_s14 = smov 8   ;;  %v3664_v51 = vmul.f32 %v4471_v31, %v3663_v49  ;;  %vm3669_vm14 = vweird.f32 %v4471_v31  ;;  %vm3668_vm15 = vweird.f32 %v3627_v36  ;;  %v3619_v39 = vsub.f32 %v7154_v62, %v3587_v2 }
 0x730   : > { %4195 = dma.vmem_to_hbm [thread:$0]  (%p5157_p0), %s3806_s17, 1024, %s3808_s13, %s3772_s2, %s4908_s5, %s4908_s5, %s4909_s14   ;;  %vm3670_vm0 = vmor %vm3668_vm15, %vm3669_vm14 }
 0x731   : > { %v3665_v32 = vmul.f32 0.5, %v3664_v51  ;;  %s7654_s23 = sld [smem:[#allocation112_spill]]  ;;  %s3786_s13 = sshll.u32 %s5249_s28, 4  ;;  %s3787_s13 = int_to_ptr.vmem [resolvable:$true] %s3786_s13 }
 0x732   : > { %s3767_s7 = scalar_lea.sflag [#allocation6], %s5215_s10 }
 0x733   : > { %v3666_v41 = vsub.f32 1.5, %v3665_v32 }
 0x735   : > { %v3667_v35 = vmul.f32 %v4471_v31, %v3666_v41 }
 0x737   : > { %v3671_v21 = vsel %vm3670_vm0, %v4471_v31, %v3667_v35  ;;  %s7655_s18 = smov %s7654_s23  ;;  %s3785_s17 = scalar_lea.hbm %s7654_s23, %s4079_s26 }
 0x738   : > { %v3715_v0 = vmul.f32 %v3671_v21, %v3619_v39  ;;  %s3788_s2 = sshll.u32 %s3785_s17, 4  ;;  %s4770_s16 = scalar_lea.hbm %s7655_s18, 256  ;;  %s3789_s2 = int_to_ptr.hbm [resolvable:$true] %s3788_s2 }
 0x739   : > { %s4764_s0 = sshra.s32 %s3789_s2, 4  ;;  %s4765_s0 = int_to_ptr.hbm [resolvable:$true] %s4764_s0 }
 0x73a   : > { %v3726_v27 = vmul.f32 %v7196_v44, %v3715_v0  ;;  %v3553_v56 = vpop.xlane.xlu0 %3552  ;;  %s4766_s8 = scalar_lea.hbm %s4765_s0, 64  ;;  %p4771_p8 = scmp.lt.s32.totalorder %s4765_s0, %s7655_s18 }
 0x73b   : > { %v3588_v46 = vmul.f32 0.0078125, %v3553_v56  ;;  %p4767_p12 = scmp.ne.s32.totalorder %s4765_s0, %s4766_s8  ;;  %p4772_p3 = scmp.lt.s32.totalorder %s4770_s16, %s4766_s8 }
 0x73c   : > { %v3737_v22 = vadd.f32 %v7201_v50, %v3726_v27  ;;  %v3577_v26 = vpop.xlane.xlu2 %3576 }
 0x73d   : > { %v3604_v57 = vmul.f32 %v3588_v46, %v3588_v46  ;;  %v3596_v40 = vmul.f32 0.0078125, %v3577_v26  ;;  %v3620_v42 = vsub.f32 %v7161_v1, %v3588_v46  ;;  %p4768_p11 = pnand %p4767_p12, %p5157_p0  ;;  %p4773_p1 = por %p4772_p3, %p4771_p8 }
 0x73e   : > { %3745 = vst [vmem:[%s5249_s28 + $0x18] sm:$0xff] %v3737_v22 }
 0x73f   : > { %v3612_v20 = vsub.f32 %v3596_v40, %v3604_v57  ;;  %p4769_p2 = pneg %p4768_p11 }
 0x741   : > { %v3628_v24 = vadd.f32 1e-05, %v3612_v20  ;;  %p4774_p13 = pnand %p4773_p1, %p4769_p2 }
 0x743   : > { %4472 = vrsqrt.f32 %v3628_v24  ;;  %vm3678_vm2 = vweird.f32 %v3628_v24 }
 0x749   : > { %v4473_v4 = vpop.eup %4472 }
 0x74a   : > { %v3673_v54 = vmul.f32 %v4473_v4, %v3628_v24  ;;  %vm3679_vm1 = vweird.f32 %v4473_v4 }
 0x74b   : > { %vm3680_vm3 = vmor %vm3678_vm2, %vm3679_vm1 }
 0x74c   : > { %v3674_v62 = vmul.f32 %v4473_v4, %v3673_v54 }
 0x74e   : > { %v3675_v10 = vmul.f32 0.5, %v3674_v62 }
 0x750   : > { %v3676_v17 = vsub.f32 1.5, %v3675_v10  ;;  %v3555_v38 = vpop.xlane.xlu1 %3554 }
 0x751   : > { %v3589_v23 = vmul.f32 0.0078125, %v3555_v38 }
 0x752   : > { %v3677_v13 = vmul.f32 %v4473_v4, %v3676_v17 }
 0x753   : > { %v3605_v35 = vmul.f32 %v3589_v23, %v3589_v23 }
 0x754   : > { %v3681_v60 = vsel %vm3680_vm3, %v4473_v4, %v3677_v13 }
 0x755   : > { %v3716_v30 = vmul.f32 %v3681_v60, %v3620_v42 }
 0x757   : > { %v3727_v33 = vmul.f32 %v7196_v44, %v3716_v30 }
 0x759   : > { %v3738_v12 = vadd.f32 %v7201_v50, %v3727_v33 }
 0x75b   : > { %3746 = vst [vmem:[%s5249_s28 + $0x20] sm:$0xff] %v3738_v12 }
 0x76f   : > { %v3545_v58 = vpop.xlane.xlu2 %3544 }
 0x770   : > { %v3584_v18 = vmul.f32 0.0078125, %v3545_v58 }
 0x771   : > { %v3569_v16 = vpop.xlane.xlu1 %3568 }
 0x772   : > { %v3600_v53 = vmul.f32 %v3584_v18, %v3584_v18  ;;  %v3592_v9 = vmul.f32 0.0078125, %v3569_v16  ;;  %v3616_v29 = vsub.f32 %v7173_v63, %v3584_v18 }
 0x774   : > { %v3608_v6 = vsub.f32 %v3592_v9, %v3600_v53 }
 0x776   : > { %v3624_v15 = vadd.f32 1e-05, %v3608_v6  ;;  %v3621_v6 = vsub.f32 %v7168_v8, %v3589_v23 }
 0x778   : > { %4474 = vrsqrt.f32 %v3624_v15  ;;  %vm3638_vm5 = vweird.f32 %v3624_v15 }
 0x77d   : > { %v3557_v55 = vpop.xlane.xlu2 %3556 }
 0x77e   : > { %v4475_v28 = vpop.eup %4474  ;;  %v3590_v1 = vmul.f32 0.0078125, %v3557_v55 }
 0x77f   : > { %v3633_v14 = vmul.f32 %v4475_v28, %v3624_v15  ;;  %v3581_v25 = vpop.xlane.xlu1 %3580  ;;  %vm3639_vm4 = vweird.f32 %v4475_v28 }
 0x780   : > { %v3606_v43 = vmul.f32 %v3590_v1, %v3590_v1  ;;  %v3598_v48 = vmul.f32 0.0078125, %v3581_v25  ;;  %vm3640_vm6 = vmor %vm3638_vm5, %vm3639_vm4  ;;  %v3622_v24 = vsub.f32 %v7181_v7, %v3590_v1 }
 0x781   : > { %v3634_v34 = vmul.f32 %v4475_v28, %v3633_v14 }
 0x782   : > { %v3614_v59 = vsub.f32 %v3598_v48, %v3606_v43 }
 0x783   : > { %v3635_v61 = vmul.f32 0.5, %v3634_v34  ;;  %v3559_v37 = vpop.xlane.xlu0 %3558 }
 0x784   : > { %v3591_v19 = vmul.f32 0.0078125, %v3559_v37  ;;  %v3630_v2 = vadd.f32 1e-05, %v3614_v59 }
 0x785   : > { %v3636_v45 = vsub.f32 1.5, %v3635_v61  ;;  %v3583_v11 = vpop.xlane.xlu2 %3582 }
 0x786   : > { %4476 = vrsqrt.f32 %v3630_v2  ;;  %v3607_v3 = vmul.f32 %v3591_v19, %v3591_v19  ;;  %v3599_v52 = vmul.f32 0.0078125, %v3583_v11  ;;  %vm3698_vm8 = vweird.f32 %v3630_v2 }
 0x787   : > { %v3637_v47 = vmul.f32 %v4475_v28, %v3636_v45  ;;  %v3623_v7 = vsub.f32 %v7187_v5, %v3591_v19 }
 0x788   : > { %v3615_v31 = vsub.f32 %v3599_v52, %v3607_v3 }
 0x789   : > { %v3641_v36 = vsel %vm3640_vm6, %v4475_v28, %v3637_v47 }
 0x78a   : > { %v3712_v49 = vmul.f32 %v3641_v36, %v3616_v29  ;;  %v3631_v32 = vadd.f32 1e-05, %v3615_v31 }
 0x78b   : > { %v3579_v51 = vpop.xlane.xlu0 %3578 }
 0x78c   : > { %v4477_v41 = vpop.eup %4476  ;;  %v3723_v39 = vmul.f32 %v7196_v44, %v3712_v49  ;;  %v3597_v21 = vmul.f32 0.0078125, %v3579_v51  ;;  %4478 = vrsqrt.f32 %v3631_v32  ;;  %vm3708_vm11 = vweird.f32 %v3631_v32 }
 0x78d   : > { %v3693_v0 = vmul.f32 %v4477_v41, %v3630_v2  ;;  %vm3699_vm7 = vweird.f32 %v4477_v41 }
 0x78e   : > { %v3734_v27 = vadd.f32 %v7201_v50, %v3723_v39  ;;  %v3613_v56 = vsub.f32 %v3597_v21, %v3605_v35  ;;  %vm3700_vm9 = vmor %vm3698_vm8, %vm3699_vm7 }
 0x78f   : > { %v3694_v46 = vmul.f32 %v4477_v41, %v3693_v0 }
 0x790   : > { %3742 = vst [vmem:[%s5249_s28] sm:$0xff] %v3734_v27  ;;  %v3629_v63 = vadd.f32 1e-05, %v3613_v56 }
 0x791   : > { %v3695_v22 = vmul.f32 0.5, %v3694_v46 }
 0x792   : > { %4480 = vrsqrt.f32 %v3629_v63  ;;  %v4479_v26 = vpop.eup %4478  ;;  %vm3688_vm14 = vweird.f32 %v3629_v63 }
 0x793   : > { %v3696_v57 = vsub.f32 1.5, %v3695_v22  ;;  %v3703_v40 = vmul.f32 %v4479_v26, %v3631_v32  ;;  %vm3709_vm10 = vweird.f32 %v4479_v26 }
 0x794   : > { %vm3710_vm12 = vmor %vm3708_vm11, %vm3709_vm10 }
 0x795   : > { %v3697_v20 = vmul.f32 %v4477_v41, %v3696_v57  ;;  %v3704_v4 = vmul.f32 %v4479_v26, %v3703_v40 }
 0x797   : > { %v3701_v54 = vsel %vm3700_vm9, %v4477_v41, %v3697_v20  ;;  %v3705_v17 = vmul.f32 0.5, %v3704_v4 }
 0x798   : > { %v4481_v62 = vpop.eup %4480  ;;  %v3718_v10 = vmul.f32 %v3701_v54, %v3622_v24 }
 0x799   : > { %v3683_v13 = vmul.f32 %v4481_v62, %v3629_v63  ;;  %v3706_v60 = vsub.f32 1.5, %v3705_v17  ;;  %vm3689_vm13 = vweird.f32 %v4481_v62 }
 0x79a   : > { %v3729_v42 = vmul.f32 %v7196_v44, %v3718_v10  ;;  %vm3690_vm15 = vmor %vm3688_vm14, %vm3689_vm13 }
 0x79b   : > { %v3684_v30 = vmul.f32 %v4481_v62, %v3683_v13  ;;  %v3707_v12 = vmul.f32 %v4479_v26, %v3706_v60 }
 0x79c   : > { %v3740_v33 = vadd.f32 %v7201_v50, %v3729_v42 }
 0x79d   : > { %v3685_v38 = vmul.f32 0.5, %v3684_v30  ;;  %v3711_v58 = vsel %vm3710_vm12, %v4479_v26, %v3707_v12 }
 0x79e   : > { %3748 = vst [vmem:[%s5249_s28 + $0x30] sm:$0xff] %v3740_v33  ;;  %v3719_v16 = vmul.f32 %v3711_v58, %v3623_v7 }
 0x79f   : > { %v3686_v18 = vsub.f32 1.5, %v3685_v38 }
 0x7a0   : > { %v3730_v9 = vmul.f32 %v7196_v44, %v3719_v16 }
 0x7a1   : > { %v3687_v53 = vmul.f32 %v4481_v62, %v3686_v18 }
 0x7a2   : > { %v3741_v15 = vadd.f32 %v7201_v50, %v3730_v9 }
 0x7a3   : > { %v3691_v5 = vsel %vm3690_vm15, %v4481_v62, %v3687_v53 }
 0x7a4   : > { %v3717_v55 = vmul.f32 %v3691_v5, %v3621_v6  ;;  %3749 = vst [vmem:[%s5249_s28 + $0x38] sm:$0xff] %v3741_v15 }
 0x7a6   : > { %v3728_v28 = vmul.f32 %v7196_v44, %v3717_v55 }
 0x7a8   : > { %v3739_v1 = vadd.f32 %v7201_v50, %v3728_v28 }
 0x7aa   : > { %3747 = vst [vmem:[%s5249_s28 + $0x28] sm:$0xff] %v3739_v1 }
 0x7ab   : > { %4777 = shalt.err (!%p4774_p13)
}
 0x7ac   : > { %4194 = dma.vmem_to_hbm [thread:$0]  (%p5157_p0), %s3787_s13, 1024, %s3789_s2, %s3767_s7, %s4908_s5, %s4908_s5, %s4909_s14  }
 0x7ad PF: > { %p4244_p4 = scmp.ge.s32.totalorder %s4896_s3, 2  ;;  %s3822_s10 = sand.u32 1, %s4868_s21  }
 0x7ae   : > { %s3823_s28 = scalar_lea.sflag [#allocation6], %s3822_s10 }
 0x7af   : > { %p4225_p5 = pnand %p4244_p4, %p5163_p6 }
 0x7b1   : > { %p4226_p9 = pneg %p4225_p5 }
 0x7b3   : > { %4847 = dma.done.wait (%p4226_p9), %s3823_s28, 1024  }
 0x7b4   : > { %4849 = vsyncadd (%p4226_p9), %s3823_s28, 4294966272  ;;  %s3833_s29 = scalar_lea.sflag [#allocation20], %s3822_s10 }
 0x7b5   : > { %4851 = dma.done.wait (%p4226_p9), %s3833_s29, 1024  }
 0x7b6   : > { %4853 = vsyncadd (%p4226_p9), %s3833_s29, 4294966272  ;;  %s45_s3 = sadd.s32 1, %s4896_s3   ;;  %s7656_s15 = sld [smem:[#allocation33_spill]] }
 0x7b7   : > { %p42_p7 = scmp.ge.s32.totalorder %s45_s3, 6   ;;  %s7657_s2 = sld [smem:[#allocation30_spill]] }
 0x7b8   : > { %s7658_s24 = sld [smem:[#allocation31_spill]]  ;;  %s7660_s0 = smov %s4860_s30 }
 0x7b9   : > { %s7659_s6 = sld [smem:[#allocation32_spill]]  ;;  %s7661_s30 = smov %s4864_s20 }
 0x7ba   : > { %s7662_s20 = smov %s5189_s4  ;;  %s7663_s21 = smov %s4872_s1 }
 0x7bb   : > { %s7664_s1 = smov %s4876_s22  ;;  %s7666_s23 = smov %s4892_s25 }
 0x7bc   : > { %s7665_s22 = smov %s7656_s15  ;;  %44 = sbr.rel (!%p42_p7) target bundleno = 37 (0x25), region = 195 }
 0x7bf   : > { %s7667_s25 = smov %s7659_s6 }
 0x7c1   :  { %3839 = vsyncpa [#allocation5], 1 }
 0x7c2   :  { %3841 = vsyncpa [#allocation5 + $0x1], 1 }
 0x7c3   :  { %3842 = vsyncpa [#allocation8], 1 }
 0x7c4   :  { %3844 = vsyncpa [#allocation8 + $0x1], 1 }
 0x7c5   :  { %3845 = vsyncpa [#allocation11], 1 }
 0x7c6   :  { %3846 = vsyncpa [#allocation14], 1 }
 0x7c7   :  { %3847 = vsyncpa [#allocation17], 1 }
 0x7c8   :  { %3848 = vsyncpa [#allocation6], 1 }
 0x7c9   :  { %3850 = vsyncpa [#allocation6 + $0x1], 1 }
 0x7ca   :  { %3851 = vsyncpa [#allocation20], 1 }
 0x7cb   :  { %3853 = vsyncpa [#allocation20 + $0x1], 1 }

</bundles_post_ra>
